<compile_context>
chip_gen: v5e
topology: v5e:2x2
jax: 0.10.0
libtpu: 0.0.40
codegen_flags: <defaults>
</compile_context>

<pallas_src>
import functools
import math

import jax
import jax.numpy as jnp
from jax.experimental import pallas as pl
from jax.experimental.pallas import tpu as pltpu

HSIZE = 128            # attention model dim
HEADS = 4
HEAD_DIM = HSIZE // HEADS
ENC_DIM = 2 * HSIZE    # Electra-small hidden size (256) feeding queryW/keyW/valueW
NUM_OUT = 1            # num_outputs (final_layer); kernel specialized to 1

# Raw (unfused) parameters, PyTorch-layout transposed to (in_features, out_features).
_PARAM_SHAPES = [
    ("wq1", (ENC_DIM, HSIZE)), ("bq1", (1, HSIZE)),   # queryW
    ("wk1", (ENC_DIM, HSIZE)), ("bk1", (1, HSIZE)),   # keyW
    ("wv1", (ENC_DIM, HSIZE)), ("bv1", (1, HSIZE)),   # valueW
    ("a1wq", (HSIZE, HSIZE)), ("a1bq", (1, HSIZE)),   # attention_layer in_proj q/k/v + out_proj
    ("a1wk", (HSIZE, HSIZE)), ("a1bk", (1, HSIZE)),
    ("a1wv", (HSIZE, HSIZE)), ("a1bv", (1, HSIZE)),
    ("a1wo", (HSIZE, HSIZE)), ("a1bo", (1, HSIZE)),
    ("wq2", (HSIZE, HSIZE)), ("bq2", (1, HSIZE)),     # queryW2
    ("wk2", (HSIZE, HSIZE)), ("bk2", (1, HSIZE)),     # keyW2
    ("wv2", (HSIZE, HSIZE)), ("bv2", (1, HSIZE)),     # valueW2
    ("a2wq", (HSIZE, HSIZE)), ("a2bq", (1, HSIZE)),   # attention_layer2
    ("a2wk", (HSIZE, HSIZE)), ("a2bk", (1, HSIZE)),
    ("a2wv", (HSIZE, HSIZE)), ("a2bv", (1, HSIZE)),
    ("a2wo", (HSIZE, HSIZE)), ("a2bo", (1, HSIZE)),
    ("wf", (HSIZE, NUM_OUT)), ("bf", (1, NUM_OUT)),   # final_layer
]


def _round_up(x, m):
    return (x + m - 1) // m * m


# ---------------------------------------------------------------------------
# Offline parameter fusion (exact linear-algebra composition, done once in the
# wrapper): fewer, larger matmuls inside the kernel and only 3 packed arrays.
# ---------------------------------------------------------------------------
def _fuse_params(p):
    assert NUM_OUT == 1, "kernel specialized to num_outputs == 1"
    scale = 1.0 / math.sqrt(HEAD_DIM)
    # Stage 1: (x @ wq1 + bq1) @ a1wq + a1bq  ==  x @ (wq1@a1wq) + (bq1@a1wq + a1bq)
    w1q = (p["wq1"] @ p["a1wq"]) * scale                 # q-scale folded in
    b1q = (p["bq1"] @ p["a1wq"] + p["a1bq"]) * scale
    w1k = p["wk1"] @ p["a1wk"]
    b1k = p["bk1"] @ p["a1wk"] + p["a1bk"]
    w1v = p["wv1"] @ p["a1wv"]
    b1v = p["bv1"] @ p["a1wv"] + p["a1bv"]
    # Stage 2
    w2q = (p["wq2"] @ p["a2wq"]) * scale
    b2q = (p["bq2"] @ p["a2wq"] + p["a2bq"]) * scale
    w2k = p["wk2"] @ p["a2wk"]
    b2k = p["bk2"] @ p["a2wk"] + p["a2bk"]
    w2v = p["wv2"] @ p["a2wv"]
    b2v = p["bv2"] @ p["a2wv"] + p["a2bv"]
    # attention_layer2.out_proj composed with final_layer
    wfin = p["a2wo"] @ p["wf"]                           # (128, 1)
    bfin = p["a2bo"] @ p["wf"] + p["bf"]                 # (1, 1)

    wp1 = jnp.concatenate([w1q, w1k, w1v], axis=1)                       # (256, 384)
    wp2 = jnp.concatenate([p["a1wo"], w2q, w2k, w2v], axis=1)            # (128, 512)
    rows = [b1q, b1k, b1v, p["a1bo"], b2q, b2k, b2v,
            wfin.reshape(1, HSIZE),
            jnp.broadcast_to(bfin, (1, HSIZE))]
    bp = jnp.concatenate(rows + [jnp.zeros((16 - len(rows), HSIZE), jnp.float32)],
                         axis=0)                                         # (16, 128)
    # Weights in bf16 (full-rate MXU, half the DMA bytes); biases stay f32.
    return (wp1.astype(jnp.bfloat16), wp2.astype(jnp.bfloat16),
            bp.astype(jnp.float32))


# ---------------------------------------------------------------------------
# Kernel
# ---------------------------------------------------------------------------
def _kernel(ev_ref, top_ref, wp1_ref, wp2_ref, bp_ref, out_ref,
            *, b_tile, s_ev, s_top):
    f32 = jnp.float32
    bf16 = jnp.bfloat16

    ev = ev_ref[0]                               # (Bt*S_ev, 256) bf16
    top = top_ref[0]                             # (Bt*S_top, 256) bf16 (sign pre-folded)
    wp1 = wp1_ref[...]                           # (256, 384) bf16  [W1q | W1k | W1v]
    wp2 = wp2_ref[...]                           # (128, 512) bf16  [W1o | W2q | W2k | W2v]
    bp = bp_ref[...]                             # (16, 128)  f32   packed biases / final vec

    # --- stage 1: fused projections (bf16 MXU, f32 accumulate, M = Bt*S) ----
    q1 = jnp.dot(top, wp1[:, :HSIZE], preferred_element_type=f32) + bp[0:1, :]
    kv1 = jnp.dot(ev, wp1[:, HSIZE:], preferred_element_type=f32)
    k1 = kv1[:, :HSIZE] + bp[1:2, :]
    v1 = kv1[:, HSIZE:] + bp[2:3, :]

    q1_3 = q1.reshape(b_tile, s_top, HSIZE)
    k1_3 = k1.reshape(b_tile, s_ev, HSIZE)
    v1_3 = v1.reshape(b_tile, s_ev, HSIZE)

    # --- stage-1 MHA; out-projection accumulated per head (no lane concats) -
    h1 = jnp.zeros((b_tile * s_top, HSIZE), f32)
    for h in range(HEADS):                        # static 4-iteration loop
        sl = slice(h * HEAD_DIM, (h + 1) * HEAD_DIM)
        s = jnp.einsum("bqd,bkd->bqk", q1_3[:, :, sl].astype(bf16),
                       k1_3[:, :, sl].astype(bf16), preferred_element_type=f32)
        s = s - jnp.max(s, axis=-1, keepdims=True)
        e = jnp.exp(s)
        p = e * pl.reciprocal(jnp.sum(e, axis=-1, keepdims=True), approx=True)
        ctx = jnp.einsum("bqk,bkd->bqd", p.astype(bf16), v1_3[:, :, sl].astype(bf16),
                         preferred_element_type=f32)          # (Bt, S_top, 32)
        h1 = h1 + jnp.dot(ctx.reshape(b_tile * s_top, HEAD_DIM).astype(bf16),
                          wp2[sl, :HSIZE], preferred_element_type=f32)
    h1 = h1 + bp[3:4, :]                                      # attention_layer.out_proj bias

    # --- stage 2: fused K|V projection over all rows; query only at pos 0 ---
    h1_bf = h1.astype(bf16)
    kv2 = jnp.dot(h1_bf, wp2[:, 2 * HSIZE:], preferred_element_type=f32)   # (M, 256)
    k2_3 = (kv2[:, :HSIZE] + bp[5:6, :]).reshape(b_tile, s_top, HSIZE)
    v2_3 = (kv2[:, HSIZE:] + bp[6:7, :]).reshape(b_tile, s_top, HSIZE)

    h1_0 = h1.reshape(b_tile, s_top, HSIZE)[:, 0, :]                       # (Bt, 128)
    q2 = jnp.dot(h1_0.astype(bf16), wp2[:, HSIZE:2 * HSIZE],
                 preferred_element_type=f32) + bp[4:5, :]
    q2_3 = q2.reshape(b_tile, 1, HSIZE)                                    # Sq = 1

    ctxs = []
    for h in range(HEADS):
        sl = slice(h * HEAD_DIM, (h + 1) * HEAD_DIM)
        s = jnp.einsum("bqd,bkd->bqk", q2_3[:, :, sl].astype(bf16),
                       k2_3[:, :, sl].astype(bf16), preferred_element_type=f32)
        s = s - jnp.max(s, axis=-1, keepdims=True)
        e = jnp.exp(s)
        p = e * pl.reciprocal(jnp.sum(e, axis=-1, keepdims=True), approx=True)
        ctxs.append(jnp.einsum("bqk,bkd->bqd", p.astype(bf16),
                               v2_3[:, :, sl].astype(bf16),
                               preferred_element_type=f32))                # (Bt, 1, 32)
    h2 = jnp.concatenate(ctxs, axis=-1).reshape(b_tile, HSIZE)             # (Bt, 128)

    # attention_layer2.out_proj composed with final_layer -> one 128-vector,
    # evaluated lane-major so the output block is lane-dense.
    out = jnp.dot(bp[7:8, :], h2.T, preferred_element_type=f32) + bp[8:9, 0:1]   # (1, Bt)
    out_ref[...] = out.reshape(1, 1, b_tile)


# ---------------------------------------------------------------------------
# Wrapper
# ---------------------------------------------------------------------------
def _choose_b_tile(B, s_ev, s_top, requested):
    # Rough per-batch-element VMEM footprint: double-buffered bf16 input blocks
    # plus f32 intermediates (q/k/v/h1/kv2/...) plus per-head score tiles.
    per_elem = ((s_ev + s_top) * ENC_DIM * 2 * 2
                + (s_ev + s_top) * HSIZE * 4 * 8
                + s_top * s_ev * 4 * 2)
    budget = 24 << 20
    bt = max(8, min(requested, (budget // per_elem) // 8 * 8))
    # Prefer >= 2 grid steps so the "parallel" axis can shard across v7x's 2 TCs.
    bt = min(bt, max(8, _round_up((B + 1) // 2, 8)))
    bt = min(bt, _round_up(B, 8))
    return max(8, bt)


def distilbert_attention_head(h_ev, h_top, procon, params, *, b_tile=64):
    B, s_ev, enc = h_ev.shape
    _, s_top, enc2 = h_top.shape
    assert enc == ENC_DIM and enc2 == ENC_DIM
    # TODO(synk): padding S would need key masking inside the attention; require
    # multiples of 8 so the in-kernel (b, s, 128) reshapes stay layout-free.
    assert s_ev % 8 == 0 and s_top % 8 == 0, "sequence lengths must be multiples of 8"

    wp1, wp2, bp = _fuse_params(params)

    b_tile = _choose_b_tile(B, s_ev, s_top, b_tile)
    b_pad = _round_up(B, b_tile)
    n_tiles = b_pad // b_tile

    # weird_procon = 2*procon - 1 only feeds the query path; fold it into the
    # (bf16) topic activations here — removes the lane-1 sgn input stream.
    sgn = (2.0 * procon.astype(jnp.float32) - 1.0)[:, None, None]
    top_signed = (h_top.astype(jnp.float32) * sgn).astype(jnp.bfloat16)
    ev_bf = h_ev.astype(jnp.bfloat16)

    def pad_b(x):
        return jnp.pad(x, ((0, b_pad - B),) + ((0, 0),) * (x.ndim - 1))

    ev_r = pad_b(ev_bf).reshape(n_tiles, b_tile * s_ev, ENC_DIM)
    top_r = pad_b(top_signed).reshape(n_tiles, b_tile * s_top, ENC_DIM)

    kernel = functools.partial(_kernel, b_tile=b_tile, s_ev=s_ev, s_top=s_top)

    # Cost estimate (whole call) so XLA can schedule around the custom call.
    m_top, m_ev = b_pad * s_top, b_pad * s_ev
    flops = 2 * (m_top * ENC_DIM * HSIZE            # q1 projection
                 + m_ev * ENC_DIM * 2 * HSIZE       # fused k1|v1 projection
                 + b_pad * s_top * s_ev * HSIZE * 2 # stage-1 scores + PV (all heads)
                 + m_top * HSIZE * HSIZE            # stage-1 out-proj
                 + m_top * HSIZE * 2 * HSIZE        # fused k2|v2 projection
                 + b_pad * HSIZE * HSIZE            # q2 (row 0 only)
                 + b_pad * s_top * HSIZE * 2        # stage-2 scores + PV (Sq=1)
                 + b_pad * HSIZE)                   # final dot
    transcendentals = b_pad * HEADS * (s_top * s_ev + s_top)
    bytes_accessed = (int(ev_r.size + top_r.size) * 2
                      + n_tiles * int(wp1.size + wp2.size) * 2
                      + n_tiles * int(bp.size) * 4 + b_pad * 4)

    # VMEM budgeting: double-buffered bf16 inputs + weights + f32 intermediates.
    est = (2 * b_tile * (s_ev + s_top) * ENC_DIM * 2
           + 2 * int(wp1.size + wp2.size) * 2 + 2 * int(bp.size) * 4
           + b_tile * (s_ev + s_top) * HSIZE * 4 * 8
           + b_tile * s_top * s_ev * 4 * 2)
    vmem_limit = int(min(max(2 * est, 32 << 20), 48 << 20))

    out = pl.pallas_call(
        kernel,
        out_shape=jax.ShapeDtypeStruct((n_tiles, 1, b_tile), jnp.float32),
        grid_spec=pltpu.PrefetchScalarGridSpec(
            num_scalar_prefetch=0,
            grid=(n_tiles,),
            in_specs=[
                pl.BlockSpec((1, b_tile * s_ev, ENC_DIM), lambda b: (b, 0, 0)),
                pl.BlockSpec((1, b_tile * s_top, ENC_DIM), lambda b: (b, 0, 0)),
                pl.BlockSpec(wp1.shape, lambda b: (0, 0)),
                pl.BlockSpec(wp2.shape, lambda b: (0, 0)),
                pl.BlockSpec(bp.shape, lambda b: (0, 0)),
            ],
            out_specs=pl.BlockSpec((1, 1, b_tile), lambda b: (b, 0, 0)),
        ),
        compiler_params=pltpu.CompilerParams(
            dimension_semantics=("parallel",),
            vmem_limit_bytes=vmem_limit),
        cost_estimate=pl.CostEstimate(flops=flops,
                                      transcendentals=transcendentals,
                                      bytes_accessed=bytes_accessed),
    )(ev_r, top_r, wp1, wp2, bp)

    return out.reshape(b_pad)[:B].reshape(B, NUM_OUT)


# ---------------------------------------------------------------------------
# Init + independent pure-JAX reference (literal, unfused f32 math)
# ---------------------------------------------------------------------------
def init_params(key):
    params = {}
    keys = jax.random.split(key, len(_PARAM_SHAPES))
    for (name, shape), k in zip(_PARAM_SHAPES, keys):
        params[name] = 0.05 * jax.random.normal(k, shape, jnp.float32)
    return params


def _mha_ref(q_in, k_in, v_in, wq, bq, wk, bk, wv, bv, wo, bo):
    q = q_in @ wq + bq
    k = k_in @ wk + bk
    v = v_in @ wv + bv
    scale = 1.0 / math.sqrt(HEAD_DIM)
    heads = []
    for h in range(HEADS):
        sl = slice(h * HEAD_DIM, (h + 1) * HEAD_DIM)
        s = (q[:, sl] * scale) @ k[:, sl].T
        p = jax.nn.softmax(s, axis=-1)
        heads.append(p @ v[:, sl])
    return jnp.concatenate(heads, axis=-1) @ wo + bo


def _reference(h_ev, h_top, procon, params):
    def one(ev, top, pc):
        top = top * (2.0 * pc - 1.0)
        q = top @ params["wq1"] + params["bq1"]
        k = ev @ params["wk1"] + params["bk1"]
        v = ev @ params["wv1"] + params["bv1"]
        h1 = _mha_ref(q, k, v, params["a1wq"], params["a1bq"], params["a1wk"], params["a1bk"],
                      params["a1wv"], params["a1bv"], params["a1wo"], params["a1bo"])
        q2 = h1[0:1, :] @ params["wq2"] + params["bq2"]
        k2 = h1 @ params["wk2"] + params["bk2"]
        v2 = h1 @ params["wv2"] + params["bv2"]
        h2 = _mha_ref(q2, k2, v2, params["a2wq"], params["a2bq"], params["a2wk"], params["a2bk"],
                      params["a2wv"], params["a2bv"], params["a2wo"], params["a2bo"])
        return (h2 @ params["wf"] + params["bf"])[0]
    return jax.vmap(one)(h_ev, h_top, procon)


if __name__ == "__main__":
    key = jax.random.PRNGKey(0)
    kp, k1, k2, k3 = jax.random.split(key, 4)

    B, S_EV, S_TOP = 2, 8, 8
    params = init_params(kp)
    # Stand-ins for the Electra last-hidden-state outputs h_ev[0], h_topic[0].
    h_ev = jax.random.normal(k1, (B, S_EV, ENC_DIM), jnp.float32)
    h_top = jax.random.normal(k2, (B, S_TOP, ENC_DIM), jnp.float32)
    procon = jax.random.bernoulli(k3, 0.5, (B,)).astype(jnp.float32)   # 0/1 flag

    out = distilbert_attention_head(h_ev, h_top, procon, params)
    out = jax.block_until_ready(out)

    ref = _reference(h_ev, h_top, procon, params)
    assert out.shape == (B, NUM_OUT)
    assert jnp.allclose(out, ref, atol=2e-2, rtol=2e-2), (out, ref)
    print("KERNEL_OK")
</pallas_src>

<mosaic_0001>
module attributes {stable_mosaic.version = 11 : i64} {
  func.func @_kernel(%arg0: i32, %arg1: memref<1x64x256xbf16, #tpu.memory_space<vmem>>, %arg2: memref<1x64x256xbf16, #tpu.memory_space<vmem>>, %arg3: memref<256x384xbf16, #tpu.memory_space<vmem>>, %arg4: memref<128x512xbf16, #tpu.memory_space<vmem>>, %arg5: memref<16x128xf32, #tpu.memory_space<vmem>>, %arg6: memref<1x1x8xf32, #tpu.memory_space<vmem>>) attributes {dimension_semantics = [#tpu.dimension_semantics<parallel>], iteration_bounds = array<i64: 1>, scalar_prefetch = 0 : i64, scratch_operands = 0 : i64, tpu.core_type = #tpu.core_type<tc>, window_params = [{transform_indices = @transform_0, window_bounds = array<i64: 1, 64, 256>}, {transform_indices = @transform_1, window_bounds = array<i64: 1, 64, 256>}, {pipeline_mode = #tpu.pipeline_mode<synchronous>, transform_indices = @transform_2, window_bounds = array<i64: 256, 384>}, {pipeline_mode = #tpu.pipeline_mode<synchronous>, transform_indices = @transform_3, window_bounds = array<i64: 128, 512>}, {pipeline_mode = #tpu.pipeline_mode<synchronous>, transform_indices = @transform_4, window_bounds = array<i64: 16, 128>}, {transform_indices = @transform_5, window_bounds = array<i64: 1, 1, 8>}]} {
    %c0 = arith.constant 0 : index
    %c0_0 = arith.constant 0 : index
    %c0_1 = arith.constant 0 : index
    %0 = vector.load %arg1[%c0, %c0_0, %c0_1] : memref<1x64x256xbf16, #tpu.memory_space<vmem>>, vector<1x64x256xbf16>
    %1 = vector.shape_cast %0 : vector<1x64x256xbf16> to vector<64x256xbf16>
    %c0_2 = arith.constant 0 : index
    %c0_3 = arith.constant 0 : index
    %c0_4 = arith.constant 0 : index
    %2 = vector.load %arg2[%c0_2, %c0_3, %c0_4] : memref<1x64x256xbf16, #tpu.memory_space<vmem>>, vector<1x64x256xbf16>
    %3 = vector.shape_cast %2 : vector<1x64x256xbf16> to vector<64x256xbf16>
    %c0_5 = arith.constant 0 : index
    %c0_6 = arith.constant 0 : index
    %4 = vector.load %arg3[%c0_5, %c0_6] : memref<256x384xbf16, #tpu.memory_space<vmem>>, vector<256x384xbf16>
    %c0_7 = arith.constant 0 : index
    %c0_8 = arith.constant 0 : index
    %5 = vector.load %arg4[%c0_7, %c0_8] : memref<128x512xbf16, #tpu.memory_space<vmem>>, vector<128x512xbf16>
    %c0_9 = arith.constant 0 : index
    %c0_10 = arith.constant 0 : index
    %6 = vector.load %arg5[%c0_9, %c0_10] : memref<16x128xf32, #tpu.memory_space<vmem>>, vector<16x128xf32>
    %7 = vector.extract_strided_slice %4 {offsets = [0, 0], sizes = [256, 128], strides = [1, 1]} : vector<256x384xbf16> to vector<256x128xbf16>
    %cst = arith.constant dense<0.000000e+00> : vector<64x128xf32>
    %8 = tpu.matmul %3, %7, %cst {dimension_numbers = #tpu.dot_dimension_numbers<[1], [0], [0], [1], [0, 0, 1, 1], [], []>} : vector<64x256xbf16>, vector<256x128xbf16>, vector<64x128xf32> -> vector<64x128xf32>
    %9 = vector.extract_strided_slice %6 {offsets = [0, 0], sizes = [1, 128], strides = [1, 1]} : vector<16x128xf32> to vector<1x128xf32>
    %10 = vector.broadcast %9 : vector<1x128xf32> to vector<64x128xf32>
    %11 = arith.addf %8, %10 : vector<64x128xf32>
    %12 = vector.extract_strided_slice %4 {offsets = [0, 128], sizes = [256, 256], strides = [1, 1]} : vector<256x384xbf16> to vector<256x256xbf16>
    %cst_11 = arith.constant dense<0.000000e+00> : vector<64x256xf32>
    %13 = tpu.matmul %1, %12, %cst_11 {dimension_numbers = #tpu.dot_dimension_numbers<[1], [0], [0], [1], [0, 0, 1, 1], [], []>} : vector<64x256xbf16>, vector<256x256xbf16>, vector<64x256xf32> -> vector<64x256xf32>
    %14 = vector.extract_strided_slice %13 {offsets = [0, 0], sizes = [64, 128], strides = [1, 1]} : vector<64x256xf32> to vector<64x128xf32>
    %15 = vector.extract_strided_slice %6 {offsets = [1, 0], sizes = [1, 128], strides = [1, 1]} : vector<16x128xf32> to vector<1x128xf32>
    %16 = vector.broadcast %15 : vector<1x128xf32> to vector<64x128xf32>
    %17 = arith.addf %14, %16 : vector<64x128xf32>
    %18 = vector.extract_strided_slice %13 {offsets = [0, 128], sizes = [64, 128], strides = [1, 1]} : vector<64x256xf32> to vector<64x128xf32>
    %19 = vector.extract_strided_slice %6 {offsets = [2, 0], sizes = [1, 128], strides = [1, 1]} : vector<16x128xf32> to vector<1x128xf32>
    %20 = vector.broadcast %19 : vector<1x128xf32> to vector<64x128xf32>
    %21 = arith.addf %18, %20 : vector<64x128xf32>
    %22 = vector.shape_cast %11 : vector<64x128xf32> to vector<8x8x128xf32>
    %23 = vector.shape_cast %17 : vector<64x128xf32> to vector<8x8x128xf32>
    %24 = vector.shape_cast %21 : vector<64x128xf32> to vector<8x8x128xf32>
    %cst_12 = arith.constant 0.000000e+00 : f32
    %25 = vector.broadcast %cst_12 : f32 to vector<64x128xf32>
    %26 = vector.extract_strided_slice %22 {offsets = [0, 0, 0], sizes = [8, 8, 32], strides = [1, 1, 1]} : vector<8x8x128xf32> to vector<8x8x32xf32>
    %27 = arith.truncf %26 : vector<8x8x32xf32> to vector<8x8x32xbf16>
    %28 = vector.extract_strided_slice %23 {offsets = [0, 0, 0], sizes = [8, 8, 32], strides = [1, 1, 1]} : vector<8x8x128xf32> to vector<8x8x32xf32>
    %29 = arith.truncf %28 : vector<8x8x32xf32> to vector<8x8x32xbf16>
    "tpu.trace_start"() <{level = 10 : i32, message = "bqd,bkd->bqk"}> : () -> ()
    %cst_13 = arith.constant dense<0.000000e+00> : vector<8x8x8xf32>
    %30 = tpu.matmul %27, %29, %cst_13 {dimension_numbers = #tpu.dot_dimension_numbers<[2], [2], [1], [1], [0, 0, 0, 1, 1, 1], [0], [0]>} : vector<8x8x32xbf16>, vector<8x8x32xbf16>, vector<8x8x8xf32> -> vector<8x8x8xf32>
    "tpu.trace_stop"() : () -> ()
    %cst_14 = arith.constant dense<0xFF800000> : vector<8x8xf32>
    %31 = vector.multi_reduction <maximumf>, %30, %cst_14 [2] : vector<8x8x8xf32> to vector<8x8xf32>
    %32 = vector.shape_cast %31 : vector<8x8xf32> to vector<8x8x1xf32>
    %33 = vector.broadcast %32 : vector<8x8x1xf32> to vector<8x8x8xf32>
    %34 = arith.subf %30, %33 : vector<8x8x8xf32>
    %35 = math.exp %34 : vector<8x8x8xf32>
    %cst_15 = arith.constant dense<0.000000e+00> : vector<8x8xf32>
    %36 = vector.multi_reduction <add>, %35, %cst_15 [2] : vector<8x8x8xf32> to vector<8x8xf32>
    %37 = vector.shape_cast %36 : vector<8x8xf32> to vector<8x8x1xf32>
    %38 = tpu.reciprocal %37 {approx = true} : vector<8x8x1xf32> -> vector<8x8x1xf32>
    %39 = vector.broadcast %38 : vector<8x8x1xf32> to vector<8x8x8xf32>
    %40 = arith.mulf %35, %39 : vector<8x8x8xf32>
    %41 = arith.truncf %40 : vector<8x8x8xf32> to vector<8x8x8xbf16>
    %42 = vector.extract_strided_slice %24 {offsets = [0, 0, 0], sizes = [8, 8, 32], strides = [1, 1, 1]} : vector<8x8x128xf32> to vector<8x8x32xf32>
    %43 = arith.truncf %42 : vector<8x8x32xf32> to vector<8x8x32xbf16>
    "tpu.trace_start"() <{level = 10 : i32, message = "bqk,bkd->bqd"}> : () -> ()
    %cst_16 = arith.constant dense<0.000000e+00> : vector<8x8x32xf32>
    %44 = tpu.matmul %41, %43, %cst_16 {dimension_numbers = #tpu.dot_dimension_numbers<[2], [1], [1], [2], [0, 0, 0, 1, 1, 2], [0], [0]>} : vector<8x8x8xbf16>, vector<8x8x32xbf16>, vector<8x8x32xf32> -> vector<8x8x32xf32>
    "tpu.trace_stop"() : () -> ()
    %45 = vector.shape_cast %44 : vector<8x8x32xf32> to vector<64x32xf32>
    %46 = arith.truncf %45 : vector<64x32xf32> to vector<64x32xbf16>
    %47 = vector.extract_strided_slice %5 {offsets = [0, 0], sizes = [32, 128], strides = [1, 1]} : vector<128x512xbf16> to vector<32x128xbf16>
    %cst_17 = arith.constant dense<0.000000e+00> : vector<64x128xf32>
    %48 = tpu.matmul %46, %47, %cst_17 {dimension_numbers = #tpu.dot_dimension_numbers<[1], [0], [0], [1], [0, 0, 1, 1], [], []>} : vector<64x32xbf16>, vector<32x128xbf16>, vector<64x128xf32> -> vector<64x128xf32>
    %49 = arith.addf %25, %48 : vector<64x128xf32>
    %50 = vector.extract_strided_slice %22 {offsets = [0, 0, 32], sizes = [8, 8, 32], strides = [1, 1, 1]} : vector<8x8x128xf32> to vector<8x8x32xf32>
    %51 = arith.truncf %50 : vector<8x8x32xf32> to vector<8x8x32xbf16>
    %52 = vector.extract_strided_slice %23 {offsets = [0, 0, 32], sizes = [8, 8, 32], strides = [1, 1, 1]} : vector<8x8x128xf32> to vector<8x8x32xf32>
    %53 = arith.truncf %52 : vector<8x8x32xf32> to vector<8x8x32xbf16>
    "tpu.trace_start"() <{level = 10 : i32, message = "bqd,bkd->bqk"}> : () -> ()
    %cst_18 = arith.constant dense<0.000000e+00> : vector<8x8x8xf32>
    %54 = tpu.matmul %51, %53, %cst_18 {dimension_numbers = #tpu.dot_dimension_numbers<[2], [2], [1], [1], [0, 0, 0, 1, 1, 1], [0], [0]>} : vector<8x8x32xbf16>, vector<8x8x32xbf16>, vector<8x8x8xf32> -> vector<8x8x8xf32>
    "tpu.trace_stop"() : () -> ()
    %cst_19 = arith.constant dense<0xFF800000> : vector<8x8xf32>
    %55 = vector.multi_reduction <maximumf>, %54, %cst_19 [2] : vector<8x8x8xf32> to vector<8x8xf32>
    %56 = vector.shape_cast %55 : vector<8x8xf32> to vector<8x8x1xf32>
    %57 = vector.broadcast %56 : vector<8x8x1xf32> to vector<8x8x8xf32>
    %58 = arith.subf %54, %57 : vector<8x8x8xf32>
    %59 = math.exp %58 : vector<8x8x8xf32>
    %cst_20 = arith.constant dense<0.000000e+00> : vector<8x8xf32>
    %60 = vector.multi_reduction <add>, %59, %cst_20 [2] : vector<8x8x8xf32> to vector<8x8xf32>
    %61 = vector.shape_cast %60 : vector<8x8xf32> to vector<8x8x1xf32>
    %62 = tpu.reciprocal %61 {approx = true} : vector<8x8x1xf32> -> vector<8x8x1xf32>
    %63 = vector.broadcast %62 : vector<8x8x1xf32> to vector<8x8x8xf32>
    %64 = arith.mulf %59, %63 : vector<8x8x8xf32>
    %65 = arith.truncf %64 : vector<8x8x8xf32> to vector<8x8x8xbf16>
    %66 = vector.extract_strided_slice %24 {offsets = [0, 0, 32], sizes = [8, 8, 32], strides = [1, 1, 1]} : vector<8x8x128xf32> to vector<8x8x32xf32>
    %67 = arith.truncf %66 : vector<8x8x32xf32> to vector<8x8x32xbf16>
    "tpu.trace_start"() <{level = 10 : i32, message = "bqk,bkd->bqd"}> : () -> ()
    %cst_21 = arith.constant dense<0.000000e+00> : vector<8x8x32xf32>
    %68 = tpu.matmul %65, %67, %cst_21 {dimension_numbers = #tpu.dot_dimension_numbers<[2], [1], [1], [2], [0, 0, 0, 1, 1, 2], [0], [0]>} : vector<8x8x8xbf16>, vector<8x8x32xbf16>, vector<8x8x32xf32> -> vector<8x8x32xf32>
    "tpu.trace_stop"() : () -> ()
    %69 = vector.shape_cast %68 : vector<8x8x32xf32> to vector<64x32xf32>
    %70 = arith.truncf %69 : vector<64x32xf32> to vector<64x32xbf16>
    %71 = vector.extract_strided_slice %5 {offsets = [32, 0], sizes = [32, 128], strides = [1, 1]} : vector<128x512xbf16> to vector<32x128xbf16>
    %cst_22 = arith.constant dense<0.000000e+00> : vector<64x128xf32>
    %72 = tpu.matmul %70, %71, %cst_22 {dimension_numbers = #tpu.dot_dimension_numbers<[1], [0], [0], [1], [0, 0, 1, 1], [], []>} : vector<64x32xbf16>, vector<32x128xbf16>, vector<64x128xf32> -> vector<64x128xf32>
    %73 = arith.addf %49, %72 : vector<64x128xf32>
    %74 = vector.extract_strided_slice %22 {offsets = [0, 0, 64], sizes = [8, 8, 32], strides = [1, 1, 1]} : vector<8x8x128xf32> to vector<8x8x32xf32>
    %75 = arith.truncf %74 : vector<8x8x32xf32> to vector<8x8x32xbf16>
    %76 = vector.extract_strided_slice %23 {offsets = [0, 0, 64], sizes = [8, 8, 32], strides = [1, 1, 1]} : vector<8x8x128xf32> to vector<8x8x32xf32>
    %77 = arith.truncf %76 : vector<8x8x32xf32> to vector<8x8x32xbf16>
    "tpu.trace_start"() <{level = 10 : i32, message = "bqd,bkd->bqk"}> : () -> ()
    %cst_23 = arith.constant dense<0.000000e+00> : vector<8x8x8xf32>
    %78 = tpu.matmul %75, %77, %cst_23 {dimension_numbers = #tpu.dot_dimension_numbers<[2], [2], [1], [1], [0, 0, 0, 1, 1, 1], [0], [0]>} : vector<8x8x32xbf16>, vector<8x8x32xbf16>, vector<8x8x8xf32> -> vector<8x8x8xf32>
    "tpu.trace_stop"() : () -> ()
    %cst_24 = arith.constant dense<0xFF800000> : vector<8x8xf32>
    %79 = vector.multi_reduction <maximumf>, %78, %cst_24 [2] : vector<8x8x8xf32> to vector<8x8xf32>
    %80 = vector.shape_cast %79 : vector<8x8xf32> to vector<8x8x1xf32>
    %81 = vector.broadcast %80 : vector<8x8x1xf32> to vector<8x8x8xf32>
    %82 = arith.subf %78, %81 : vector<8x8x8xf32>
    %83 = math.exp %82 : vector<8x8x8xf32>
    %cst_25 = arith.constant dense<0.000000e+00> : vector<8x8xf32>
    %84 = vector.multi_reduction <add>, %83, %cst_25 [2] : vector<8x8x8xf32> to vector<8x8xf32>
    %85 = vector.shape_cast %84 : vector<8x8xf32> to vector<8x8x1xf32>
    %86 = tpu.reciprocal %85 {approx = true} : vector<8x8x1xf32> -> vector<8x8x1xf32>
    %87 = vector.broadcast %86 : vector<8x8x1xf32> to vector<8x8x8xf32>
    %88 = arith.mulf %83, %87 : vector<8x8x8xf32>
    %89 = arith.truncf %88 : vector<8x8x8xf32> to vector<8x8x8xbf16>
    %90 = vector.extract_strided_slice %24 {offsets = [0, 0, 64], sizes = [8, 8, 32], strides = [1, 1, 1]} : vector<8x8x128xf32> to vector<8x8x32xf32>
    %91 = arith.truncf %90 : vector<8x8x32xf32> to vector<8x8x32xbf16>
    "tpu.trace_start"() <{level = 10 : i32, message = "bqk,bkd->bqd"}> : () -> ()
    %cst_26 = arith.constant dense<0.000000e+00> : vector<8x8x32xf32>
    %92 = tpu.matmul %89, %91, %cst_26 {dimension_numbers = #tpu.dot_dimension_numbers<[2], [1], [1], [2], [0, 0, 0, 1, 1, 2], [0], [0]>} : vector<8x8x8xbf16>, vector<8x8x32xbf16>, vector<8x8x32xf32> -> vector<8x8x32xf32>
    "tpu.trace_stop"() : () -> ()
    %93 = vector.shape_cast %92 : vector<8x8x32xf32> to vector<64x32xf32>
    %94 = arith.truncf %93 : vector<64x32xf32> to vector<64x32xbf16>
    %95 = vector.extract_strided_slice %5 {offsets = [64, 0], sizes = [32, 128], strides = [1, 1]} : vector<128x512xbf16> to vector<32x128xbf16>
    %cst_27 = arith.constant dense<0.000000e+00> : vector<64x128xf32>
    %96 = tpu.matmul %94, %95, %cst_27 {dimension_numbers = #tpu.dot_dimension_numbers<[1], [0], [0], [1], [0, 0, 1, 1], [], []>} : vector<64x32xbf16>, vector<32x128xbf16>, vector<64x128xf32> -> vector<64x128xf32>
    %97 = arith.addf %73, %96 : vector<64x128xf32>
    %98 = vector.extract_strided_slice %22 {offsets = [0, 0, 96], sizes = [8, 8, 32], strides = [1, 1, 1]} : vector<8x8x128xf32> to vector<8x8x32xf32>
    %99 = arith.truncf %98 : vector<8x8x32xf32> to vector<8x8x32xbf16>
    %100 = vector.extract_strided_slice %23 {offsets = [0, 0, 96], sizes = [8, 8, 32], strides = [1, 1, 1]} : vector<8x8x128xf32> to vector<8x8x32xf32>
    %101 = arith.truncf %100 : vector<8x8x32xf32> to vector<8x8x32xbf16>
    "tpu.trace_start"() <{level = 10 : i32, message = "bqd,bkd->bqk"}> : () -> ()
    %cst_28 = arith.constant dense<0.000000e+00> : vector<8x8x8xf32>
    %102 = tpu.matmul %99, %101, %cst_28 {dimension_numbers = #tpu.dot_dimension_numbers<[2], [2], [1], [1], [0, 0, 0, 1, 1, 1], [0], [0]>} : vector<8x8x32xbf16>, vector<8x8x32xbf16>, vector<8x8x8xf32> -> vector<8x8x8xf32>
    "tpu.trace_stop"() : () -> ()
    %cst_29 = arith.constant dense<0xFF800000> : vector<8x8xf32>
    %103 = vector.multi_reduction <maximumf>, %102, %cst_29 [2] : vector<8x8x8xf32> to vector<8x8xf32>
    %104 = vector.shape_cast %103 : vector<8x8xf32> to vector<8x8x1xf32>
    %105 = vector.broadcast %104 : vector<8x8x1xf32> to vector<8x8x8xf32>
    %106 = arith.subf %102, %105 : vector<8x8x8xf32>
    %107 = math.exp %106 : vector<8x8x8xf32>
    %cst_30 = arith.constant dense<0.000000e+00> : vector<8x8xf32>
    %108 = vector.multi_reduction <add>, %107, %cst_30 [2] : vector<8x8x8xf32> to vector<8x8xf32>
    %109 = vector.shape_cast %108 : vector<8x8xf32> to vector<8x8x1xf32>
    %110 = tpu.reciprocal %109 {approx = true} : vector<8x8x1xf32> -> vector<8x8x1xf32>
    %111 = vector.broadcast %110 : vector<8x8x1xf32> to vector<8x8x8xf32>
    %112 = arith.mulf %107, %111 : vector<8x8x8xf32>
    %113 = arith.truncf %112 : vector<8x8x8xf32> to vector<8x8x8xbf16>
    %114 = vector.extract_strided_slice %24 {offsets = [0, 0, 96], sizes = [8, 8, 32], strides = [1, 1, 1]} : vector<8x8x128xf32> to vector<8x8x32xf32>
    %115 = arith.truncf %114 : vector<8x8x32xf32> to vector<8x8x32xbf16>
    "tpu.trace_start"() <{level = 10 : i32, message = "bqk,bkd->bqd"}> : () -> ()
    %cst_31 = arith.constant dense<0.000000e+00> : vector<8x8x32xf32>
    %116 = tpu.matmul %113, %115, %cst_31 {dimension_numbers = #tpu.dot_dimension_numbers<[2], [1], [1], [2], [0, 0, 0, 1, 1, 2], [0], [0]>} : vector<8x8x8xbf16>, vector<8x8x32xbf16>, vector<8x8x32xf32> -> vector<8x8x32xf32>
    "tpu.trace_stop"() : () -> ()
    %117 = vector.shape_cast %116 : vector<8x8x32xf32> to vector<64x32xf32>
    %118 = arith.truncf %117 : vector<64x32xf32> to vector<64x32xbf16>
    %119 = vector.extract_strided_slice %5 {offsets = [96, 0], sizes = [32, 128], strides = [1, 1]} : vector<128x512xbf16> to vector<32x128xbf16>
    %cst_32 = arith.constant dense<0.000000e+00> : vector<64x128xf32>
    %120 = tpu.matmul %118, %119, %cst_32 {dimension_numbers = #tpu.dot_dimension_numbers<[1], [0], [0], [1], [0, 0, 1, 1], [], []>} : vector<64x32xbf16>, vector<32x128xbf16>, vector<64x128xf32> -> vector<64x128xf32>
    %121 = arith.addf %97, %120 : vector<64x128xf32>
    %122 = vector.extract_strided_slice %6 {offsets = [3, 0], sizes = [1, 128], strides = [1, 1]} : vector<16x128xf32> to vector<1x128xf32>
    %123 = vector.broadcast %122 : vector<1x128xf32> to vector<64x128xf32>
    %124 = arith.addf %121, %123 : vector<64x128xf32>
    %125 = arith.truncf %124 : vector<64x128xf32> to vector<64x128xbf16>
    %126 = vector.extract_strided_slice %5 {offsets = [0, 256], sizes = [128, 256], strides = [1, 1]} : vector<128x512xbf16> to vector<128x256xbf16>
    %cst_33 = arith.constant dense<0.000000e+00> : vector<64x256xf32>
    %127 = tpu.matmul %125, %126, %cst_33 {dimension_numbers = #tpu.dot_dimension_numbers<[1], [0], [0], [1], [0, 0, 1, 1], [], []>} : vector<64x128xbf16>, vector<128x256xbf16>, vector<64x256xf32> -> vector<64x256xf32>
    %128 = vector.extract_strided_slice %127 {offsets = [0, 0], sizes = [64, 128], strides = [1, 1]} : vector<64x256xf32> to vector<64x128xf32>
    %129 = vector.extract_strided_slice %6 {offsets = [5, 0], sizes = [1, 128], strides = [1, 1]} : vector<16x128xf32> to vector<1x128xf32>
    %130 = vector.broadcast %129 : vector<1x128xf32> to vector<64x128xf32>
    %131 = arith.addf %128, %130 : vector<64x128xf32>
    %132 = vector.shape_cast %131 : vector<64x128xf32> to vector<8x8x128xf32>
    %133 = vector.extract_strided_slice %127 {offsets = [0, 128], sizes = [64, 128], strides = [1, 1]} : vector<64x256xf32> to vector<64x128xf32>
    %134 = vector.extract_strided_slice %6 {offsets = [6, 0], sizes = [1, 128], strides = [1, 1]} : vector<16x128xf32> to vector<1x128xf32>
    %135 = vector.broadcast %134 : vector<1x128xf32> to vector<64x128xf32>
    %136 = arith.addf %133, %135 : vector<64x128xf32>
    %137 = vector.shape_cast %136 : vector<64x128xf32> to vector<8x8x128xf32>
    %138 = vector.shape_cast %124 : vector<64x128xf32> to vector<8x8x128xf32>
    %139 = vector.extract_strided_slice %138 {offsets = [0, 0, 0], sizes = [8, 1, 128], strides = [1, 1, 1]} : vector<8x8x128xf32> to vector<8x1x128xf32>
    %140 = vector.shape_cast %139 : vector<8x1x128xf32> to vector<8x128xf32>
    %141 = arith.truncf %140 : vector<8x128xf32> to vector<8x128xbf16>
    %142 = vector.extract_strided_slice %5 {offsets = [0, 128], sizes = [128, 128], strides = [1, 1]} : vector<128x512xbf16> to vector<128x128xbf16>
    %cst_34 = arith.constant dense<0.000000e+00> : vector<8x128xf32>
    %143 = tpu.matmul %141, %142, %cst_34 {dimension_numbers = #tpu.dot_dimension_numbers<[1], [0], [0], [1], [0, 0, 1, 1], [], []>} : vector<8x128xbf16>, vector<128x128xbf16>, vector<8x128xf32> -> vector<8x128xf32>
    %144 = vector.extract_strided_slice %6 {offsets = [4, 0], sizes = [1, 128], strides = [1, 1]} : vector<16x128xf32> to vector<1x128xf32>
    %145 = vector.broadcast %144 : vector<1x128xf32> to vector<8x128xf32>
    %146 = arith.addf %143, %145 : vector<8x128xf32>
    %147 = vector.shape_cast %146 : vector<8x128xf32> to vector<8x1x128xf32>
    %148 = vector.extract_strided_slice %147 {offsets = [0, 0, 0], sizes = [8, 1, 32], strides = [1, 1, 1]} : vector<8x1x128xf32> to vector<8x1x32xf32>
    %149 = arith.truncf %148 : vector<8x1x32xf32> to vector<8x1x32xbf16>
    %150 = vector.extract_strided_slice %132 {offsets = [0, 0, 0], sizes = [8, 8, 32], strides = [1, 1, 1]} : vector<8x8x128xf32> to vector<8x8x32xf32>
    %151 = arith.truncf %150 : vector<8x8x32xf32> to vector<8x8x32xbf16>
    "tpu.trace_start"() <{level = 10 : i32, message = "bqd,bkd->bqk"}> : () -> ()
    %cst_35 = arith.constant dense<0.000000e+00> : vector<8x1x8xf32>
    %152 = tpu.matmul %149, %151, %cst_35 {dimension_numbers = #tpu.dot_dimension_numbers<[2], [2], [1], [1], [0, 0, 0, 1, 1, 1], [0], [0]>} : vector<8x1x32xbf16>, vector<8x8x32xbf16>, vector<8x1x8xf32> -> vector<8x1x8xf32>
    "tpu.trace_stop"() : () -> ()
    %cst_36 = arith.constant dense<0xFF800000> : vector<8x1xf32>
    %153 = vector.multi_reduction <maximumf>, %152, %cst_36 [2] : vector<8x1x8xf32> to vector<8x1xf32>
    %154 = vector.shape_cast %153 : vector<8x1xf32> to vector<8x1x1xf32>
    %155 = vector.broadcast %154 : vector<8x1x1xf32> to vector<8x1x8xf32>
    %156 = arith.subf %152, %155 : vector<8x1x8xf32>
    %157 = math.exp %156 : vector<8x1x8xf32>
    %cst_37 = arith.constant dense<0.000000e+00> : vector<8x1xf32>
    %158 = vector.multi_reduction <add>, %157, %cst_37 [2] : vector<8x1x8xf32> to vector<8x1xf32>
    %159 = vector.shape_cast %158 : vector<8x1xf32> to vector<8x1x1xf32>
    %160 = tpu.reciprocal %159 {approx = true} : vector<8x1x1xf32> -> vector<8x1x1xf32>
    %161 = vector.broadcast %160 : vector<8x1x1xf32> to vector<8x1x8xf32>
    %162 = arith.mulf %157, %161 : vector<8x1x8xf32>
    %163 = arith.truncf %162 : vector<8x1x8xf32> to vector<8x1x8xbf16>
    %164 = vector.extract_strided_slice %137 {offsets = [0, 0, 0], sizes = [8, 8, 32], strides = [1, 1, 1]} : vector<8x8x128xf32> to vector<8x8x32xf32>
    %165 = arith.truncf %164 : vector<8x8x32xf32> to vector<8x8x32xbf16>
    "tpu.trace_start"() <{level = 10 : i32, message = "bqk,bkd->bqd"}> : () -> ()
    %cst_38 = arith.constant dense<0.000000e+00> : vector<8x1x32xf32>
    %166 = tpu.matmul %163, %165, %cst_38 {dimension_numbers = #tpu.dot_dimension_numbers<[2], [1], [1], [2], [0, 0, 0, 1, 1, 2], [0], [0]>} : vector<8x1x8xbf16>, vector<8x8x32xbf16>, vector<8x1x32xf32> -> vector<8x1x32xf32>
    "tpu.trace_stop"() : () -> ()
    %167 = vector.extract_strided_slice %147 {offsets = [0, 0, 32], sizes = [8, 1, 32], strides = [1, 1, 1]} : vector<8x1x128xf32> to vector<8x1x32xf32>
    %168 = arith.truncf %167 : vector<8x1x32xf32> to vector<8x1x32xbf16>
    %169 = vector.extract_strided_slice %132 {offsets = [0, 0, 32], sizes = [8, 8, 32], strides = [1, 1, 1]} : vector<8x8x128xf32> to vector<8x8x32xf32>
    %170 = arith.truncf %169 : vector<8x8x32xf32> to vector<8x8x32xbf16>
    "tpu.trace_start"() <{level = 10 : i32, message = "bqd,bkd->bqk"}> : () -> ()
    %cst_39 = arith.constant dense<0.000000e+00> : vector<8x1x8xf32>
    %171 = tpu.matmul %168, %170, %cst_39 {dimension_numbers = #tpu.dot_dimension_numbers<[2], [2], [1], [1], [0, 0, 0, 1, 1, 1], [0], [0]>} : vector<8x1x32xbf16>, vector<8x8x32xbf16>, vector<8x1x8xf32> -> vector<8x1x8xf32>
    "tpu.trace_stop"() : () -> ()
    %cst_40 = arith.constant dense<0xFF800000> : vector<8x1xf32>
    %172 = vector.multi_reduction <maximumf>, %171, %cst_40 [2] : vector<8x1x8xf32> to vector<8x1xf32>
    %173 = vector.shape_cast %172 : vector<8x1xf32> to vector<8x1x1xf32>
    %174 = vector.broadcast %173 : vector<8x1x1xf32> to vector<8x1x8xf32>
    %175 = arith.subf %171, %174 : vector<8x1x8xf32>
    %176 = math.exp %175 : vector<8x1x8xf32>
    %cst_41 = arith.constant dense<0.000000e+00> : vector<8x1xf32>
    %177 = vector.multi_reduction <add>, %176, %cst_41 [2] : vector<8x1x8xf32> to vector<8x1xf32>
    %178 = vector.shape_cast %177 : vector<8x1xf32> to vector<8x1x1xf32>
    %179 = tpu.reciprocal %178 {approx = true} : vector<8x1x1xf32> -> vector<8x1x1xf32>
    %180 = vector.broadcast %179 : vector<8x1x1xf32> to vector<8x1x8xf32>
    %181 = arith.mulf %176, %180 : vector<8x1x8xf32>
    %182 = arith.truncf %181 : vector<8x1x8xf32> to vector<8x1x8xbf16>
    %183 = vector.extract_strided_slice %137 {offsets = [0, 0, 32], sizes = [8, 8, 32], strides = [1, 1, 1]} : vector<8x8x128xf32> to vector<8x8x32xf32>
    %184 = arith.truncf %183 : vector<8x8x32xf32> to vector<8x8x32xbf16>
    "tpu.trace_start"() <{level = 10 : i32, message = "bqk,bkd->bqd"}> : () -> ()
    %cst_42 = arith.constant dense<0.000000e+00> : vector<8x1x32xf32>
    %185 = tpu.matmul %182, %184, %cst_42 {dimension_numbers = #tpu.dot_dimension_numbers<[2], [1], [1], [2], [0, 0, 0, 1, 1, 2], [0], [0]>} : vector<8x1x8xbf16>, vector<8x8x32xbf16>, vector<8x1x32xf32> -> vector<8x1x32xf32>
    "tpu.trace_stop"() : () -> ()
    %186 = vector.extract_strided_slice %147 {offsets = [0, 0, 64], sizes = [8, 1, 32], strides = [1, 1, 1]} : vector<8x1x128xf32> to vector<8x1x32xf32>
    %187 = arith.truncf %186 : vector<8x1x32xf32> to vector<8x1x32xbf16>
    %188 = vector.extract_strided_slice %132 {offsets = [0, 0, 64], sizes = [8, 8, 32], strides = [1, 1, 1]} : vector<8x8x128xf32> to vector<8x8x32xf32>
    %189 = arith.truncf %188 : vector<8x8x32xf32> to vector<8x8x32xbf16>
    "tpu.trace_start"() <{level = 10 : i32, message = "bqd,bkd->bqk"}> : () -> ()
    %cst_43 = arith.constant dense<0.000000e+00> : vector<8x1x8xf32>
    %190 = tpu.matmul %187, %189, %cst_43 {dimension_numbers = #tpu.dot_dimension_numbers<[2], [2], [1], [1], [0, 0, 0, 1, 1, 1], [0], [0]>} : vector<8x1x32xbf16>, vector<8x8x32xbf16>, vector<8x1x8xf32> -> vector<8x1x8xf32>
    "tpu.trace_stop"() : () -> ()
    %cst_44 = arith.constant dense<0xFF800000> : vector<8x1xf32>
    %191 = vector.multi_reduction <maximumf>, %190, %cst_44 [2] : vector<8x1x8xf32> to vector<8x1xf32>
    %192 = vector.shape_cast %191 : vector<8x1xf32> to vector<8x1x1xf32>
    %193 = vector.broadcast %192 : vector<8x1x1xf32> to vector<8x1x8xf32>
    %194 = arith.subf %190, %193 : vector<8x1x8xf32>
    %195 = math.exp %194 : vector<8x1x8xf32>
    %cst_45 = arith.constant dense<0.000000e+00> : vector<8x1xf32>
    %196 = vector.multi_reduction <add>, %195, %cst_45 [2] : vector<8x1x8xf32> to vector<8x1xf32>
    %197 = vector.shape_cast %196 : vector<8x1xf32> to vector<8x1x1xf32>
    %198 = tpu.reciprocal %197 {approx = true} : vector<8x1x1xf32> -> vector<8x1x1xf32>
    %199 = vector.broadcast %198 : vector<8x1x1xf32> to vector<8x1x8xf32>
    %200 = arith.mulf %195, %199 : vector<8x1x8xf32>
    %201 = arith.truncf %200 : vector<8x1x8xf32> to vector<8x1x8xbf16>
    %202 = vector.extract_strided_slice %137 {offsets = [0, 0, 64], sizes = [8, 8, 32], strides = [1, 1, 1]} : vector<8x8x128xf32> to vector<8x8x32xf32>
    %203 = arith.truncf %202 : vector<8x8x32xf32> to vector<8x8x32xbf16>
    "tpu.trace_start"() <{level = 10 : i32, message = "bqk,bkd->bqd"}> : () -> ()
    %cst_46 = arith.constant dense<0.000000e+00> : vector<8x1x32xf32>
    %204 = tpu.matmul %201, %203, %cst_46 {dimension_numbers = #tpu.dot_dimension_numbers<[2], [1], [1], [2], [0, 0, 0, 1, 1, 2], [0], [0]>} : vector<8x1x8xbf16>, vector<8x8x32xbf16>, vector<8x1x32xf32> -> vector<8x1x32xf32>
    "tpu.trace_stop"() : () -> ()
    %205 = vector.extract_strided_slice %147 {offsets = [0, 0, 96], sizes = [8, 1, 32], strides = [1, 1, 1]} : vector<8x1x128xf32> to vector<8x1x32xf32>
    %206 = arith.truncf %205 : vector<8x1x32xf32> to vector<8x1x32xbf16>
    %207 = vector.extract_strided_slice %132 {offsets = [0, 0, 96], sizes = [8, 8, 32], strides = [1, 1, 1]} : vector<8x8x128xf32> to vector<8x8x32xf32>
    %208 = arith.truncf %207 : vector<8x8x32xf32> to vector<8x8x32xbf16>
    "tpu.trace_start"() <{level = 10 : i32, message = "bqd,bkd->bqk"}> : () -> ()
    %cst_47 = arith.constant dense<0.000000e+00> : vector<8x1x8xf32>
    %209 = tpu.matmul %206, %208, %cst_47 {dimension_numbers = #tpu.dot_dimension_numbers<[2], [2], [1], [1], [0, 0, 0, 1, 1, 1], [0], [0]>} : vector<8x1x32xbf16>, vector<8x8x32xbf16>, vector<8x1x8xf32> -> vector<8x1x8xf32>
    "tpu.trace_stop"() : () -> ()
    %cst_48 = arith.constant dense<0xFF800000> : vector<8x1xf32>
    %210 = vector.multi_reduction <maximumf>, %209, %cst_48 [2] : vector<8x1x8xf32> to vector<8x1xf32>
    %211 = vector.shape_cast %210 : vector<8x1xf32> to vector<8x1x1xf32>
    %212 = vector.broadcast %211 : vector<8x1x1xf32> to vector<8x1x8xf32>
    %213 = arith.subf %209, %212 : vector<8x1x8xf32>
    %214 = math.exp %213 : vector<8x1x8xf32>
    %cst_49 = arith.constant dense<0.000000e+00> : vector<8x1xf32>
    %215 = vector.multi_reduction <add>, %214, %cst_49 [2] : vector<8x1x8xf32> to vector<8x1xf32>
    %216 = vector.shape_cast %215 : vector<8x1xf32> to vector<8x1x1xf32>
    %217 = tpu.reciprocal %216 {approx = true} : vector<8x1x1xf32> -> vector<8x1x1xf32>
    %218 = vector.broadcast %217 : vector<8x1x1xf32> to vector<8x1x8xf32>
    %219 = arith.mulf %214, %218 : vector<8x1x8xf32>
    %220 = arith.truncf %219 : vector<8x1x8xf32> to vector<8x1x8xbf16>
    %221 = vector.extract_strided_slice %137 {offsets = [0, 0, 96], sizes = [8, 8, 32], strides = [1, 1, 1]} : vector<8x8x128xf32> to vector<8x8x32xf32>
    %222 = arith.truncf %221 : vector<8x8x32xf32> to vector<8x8x32xbf16>
    "tpu.trace_start"() <{level = 10 : i32, message = "bqk,bkd->bqd"}> : () -> ()
    %cst_50 = arith.constant dense<0.000000e+00> : vector<8x1x32xf32>
    %223 = tpu.matmul %220, %222, %cst_50 {dimension_numbers = #tpu.dot_dimension_numbers<[2], [1], [1], [2], [0, 0, 0, 1, 1, 2], [0], [0]>} : vector<8x1x8xbf16>, vector<8x8x32xbf16>, vector<8x1x32xf32> -> vector<8x1x32xf32>
    "tpu.trace_stop"() : () -> ()
    %224 = tpu.concatenate %166, %185, %204, %223 in 2 : vector<8x1x32xf32>, vector<8x1x32xf32>, vector<8x1x32xf32>, vector<8x1x32xf32> -> vector<8x1x128xf32>
    %225 = vector.shape_cast %224 : vector<8x1x128xf32> to vector<8x128xf32>
    %226 = vector.extract_strided_slice %6 {offsets = [7, 0], sizes = [1, 128], strides = [1, 1]} : vector<16x128xf32> to vector<1x128xf32>
    %227 = tpu.transpose %225, [1, 0] : vector<8x128xf32> -> vector<128x8xf32>
    %cst_51 = arith.constant dense<0.000000e+00> : vector<1x8xf32>
    %228 = tpu.matmul %226, %227, %cst_51 {dimension_numbers = #tpu.dot_dimension_numbers<[1], [0], [0], [1], [0, 0, 1, 1], [], []>} : vector<1x128xf32>, vector<128x8xf32>, vector<1x8xf32> -> vector<1x8xf32>
    %229 = vector.extract_strided_slice %6 {offsets = [8, 0], sizes = [1, 1], strides = [1, 1]} : vector<16x128xf32> to vector<1x1xf32>
    %230 = vector.broadcast %229 : vector<1x1xf32> to vector<1x8xf32>
    %231 = arith.addf %228, %230 : vector<1x8xf32>
    %232 = vector.shape_cast %231 : vector<1x8xf32> to vector<1x1x8xf32>
    %c0_52 = arith.constant 0 : index
    %c0_53 = arith.constant 0 : index
    %c0_54 = arith.constant 0 : index
    %233 = vector.load %arg6[%c0_52, %c0_53, %c0_54] : memref<1x1x8xf32, #tpu.memory_space<vmem>>, vector<1x1x8xf32>
    tpu.vector_store %arg6[%c0_52, %c0_53, %c0_54], %232 {strides = array<i32>} : memref<1x1x8xf32, #tpu.memory_space<vmem>>, vector<1x1x8xf32>,
    return
  }
  func.func @transform_0(%arg0: i32) -> (i32, i32, i32) {
    %c0_i32 = arith.constant 0 : i32
    %c0_i32_0 = arith.constant 0 : i32
    %c0_i32_1 = arith.constant 0 : i32
    return %arg0, %c0_i32, %c0_i32_0 : i32, i32, i32
  }
  func.func @transform_1(%arg0: i32) -> (i32, i32, i32) {
    %c0_i32 = arith.constant 0 : i32
    %c0_i32_0 = arith.constant 0 : i32
    %c0_i32_1 = arith.constant 0 : i32
    return %arg0, %c0_i32, %c0_i32_0 : i32, i32, i32
  }
  func.func @transform_2(%arg0: i32) -> (i32, i32) {
    %c0_i32 = arith.constant 0 : i32
    %c0_i32_0 = arith.constant 0 : i32
    %c0_i32_1 = arith.constant 0 : i32
    return %c0_i32, %c0_i32_0 : i32, i32
  }
  func.func @transform_3(%arg0: i32) -> (i32, i32) {
    %c0_i32 = arith.constant 0 : i32
    %c0_i32_0 = arith.constant 0 : i32
    %c0_i32_1 = arith.constant 0 : i32
    return %c0_i32, %c0_i32_0 : i32, i32
  }
  func.func @transform_4(%arg0: i32) -> (i32, i32) {
    %c0_i32 = arith.constant 0 : i32
    %c0_i32_0 = arith.constant 0 : i32
    %c0_i32_1 = arith.constant 0 : i32
    return %c0_i32, %c0_i32_0 : i32, i32
  }
  func.func @transform_5(%arg0: i32) -> (i32, i32, i32) {
    %c0_i32 = arith.constant 0 : i32
    %c0_i32_0 = arith.constant 0 : i32
    %c0_i32_1 = arith.constant 0 : i32
    return %arg0, %c0_i32, %c0_i32_0 : i32, i32, i32
  }
}

</mosaic_0001>

<bundles_post_ra>
// kernel: tpu_custom_call.1
= control target key start
LH: loop header
LB: loop body
LE: loop exit
PB: predicated region body
PF: predicated region fallthrough
CT: control target
= control target key end

     0   :  { %10 = vsyncpa [#allocation3], 0  ;;  %s8114_s0 = inlined_call_operand.hbm [shape: bf16[1,64,256], index: 0, kind: input, shape index: {}]   ;;  %s8115_s1 = inlined_call_operand.hbm [shape: bf16[1,64,256], index: 1, kind: input, shape index: {}]   ;;  %s8116_s2 = inlined_call_operand.hbm [shape: bf16[256,384], index: 2, kind: input, shape index: {}]   ;;  %s8117_s3 = inlined_call_operand.hbm [shape: bf16[128,512], index: 3, kind: input, shape index: {}]   ;;  %s8118_s4 = inlined_call_operand.hbm [shape: f32[16,128], index: 4, kind: input, shape index: {}]   ;;  %s8119_s5 = inlined_call_operand.hbm [shape: f32[1,1,8], index: 5, kind: output, shape index: {}]  }
   0x1   :  { %11 = vsyncpa [#allocation6], 0 }
   0x2   :  { %12 = vsyncpa [#allocation9], 0 }
   0x3   :  { %13 = vsyncpa [#allocation4], 0  ;;  %s31_s20 = sshll.u32 %s8115_s1, 4  ;;  %s6253_s21 = smov [#allocation5]   ;;  %s32_s20 = int_to_ptr.hbm [resolvable:$true] %s31_s20 }
   0x4   :  { %s33_s22 = sshll.u32 %s6253_s21, 4  ;;  %s57_s25 = sshll.u32 %s8117_s3, 4  ;;  %s34_s22 = int_to_ptr.vmem [resolvable:$true] %s33_s22  ;;  %s58_s25 = int_to_ptr.hbm [resolvable:$true] %s57_s25 }
   0x5   :  { %s6254_s26 = smov 128   ;;  %s6255_s27 = smov 8  }
   0x6   :  { %39 = dma.hbm_to_vmem [thread:$0]  %s32_s20, 1024, %s34_s22, [#allocation6], %s6254_s26, %s6254_s26, %s6255_s27  }
   0x7   :  { %s6256_s28 = smov [#allocation8]   ;;  %s6257_s30 = smov 256  }
   0x8   :  { %s59_s29 = sshll.u32 %s6256_s28, 4  ;;  %s6258_s1 = smov 16   ;;  %s60_s29 = int_to_ptr.vmem [resolvable:$true] %s59_s29 }
   0x9   :  { %65 = dma.hbm_to_vmem [thread:$0]  %s58_s25, 4096, %s60_s29, [#allocation9], %s6257_s30, %s6257_s30, %s6258_s1  }
   0xa   :  { %s18_s8 = sshll.u32 %s8114_s0, 4  ;;  %s6259_s9 = smov [#allocation2]   ;;  %s19_s8 = int_to_ptr.hbm [resolvable:$true] %s18_s8 }
   0xb   :  { %s20_s3 = sshll.u32 %s6259_s9, 4  ;;  %s44_s12 = sshll.u32 %s8116_s2, 4  ;;  %s21_s3 = int_to_ptr.vmem [resolvable:$true] %s20_s3  ;;  %s45_s12 = int_to_ptr.hbm [resolvable:$true] %s44_s12 }
   0xc   :  { %26 = dma.hbm_to_vmem [thread:$0]  %s19_s8, 1024, %s21_s3, [#allocation3], %s6254_s26, %s6254_s26, %s6255_s27  }
   0xd   :  { %s6260_s13 = smov [#allocation7]   ;;  %s6261_s15 = smov 192  }
   0xe   :  { %s46_s14 = sshll.u32 %s6260_s13, 4  ;;  %s6262_s16 = smov 12   ;;  %s47_s14 = int_to_ptr.vmem [resolvable:$true] %s46_s14 }
   0xf   :  { %52 = dma.hbm_to_vmem [thread:$0]  %s45_s12, 6144, %s47_s14, [#allocation6], %s6261_s15, %s6261_s15, %s6262_s16  }
  0x10   :  { %s70_s18 = sshll.u32 %s8118_s4, 4  ;;  %s6263_s19 = smov [#allocation10]   ;;  %s71_s18 = int_to_ptr.hbm [resolvable:$true] %s70_s18 }
  0x11   :  { %s72_s20 = sshll.u32 %s6263_s19, 4  ;;  %s73_s20 = int_to_ptr.vmem [resolvable:$true] %s72_s20 }
  0x12   :  { %78 = dma.hbm_to_vmem [thread:$0]  %s71_s18, 256, %s73_s20, [#allocation9], %s6254_s26, %s6254_s26, %s6255_s27  }
  0x13   :  { %6245 = dma.done.wait [#allocation3], 1024  }
  0x14   :  { %6246 = vsyncadd [#allocation3], 4294966272 }
  0x15   :  { %6247 = dma.done.wait [#allocation6], 7168  }
  0x16   :  { %6248 = vsyncadd [#allocation6], 4294960128 }
  0x17   :  { %6249 = dma.done.wait [#allocation9], 4352  }
  0x18   :  { %6250 = vsyncadd [#allocation9], 4294962944  ;;  %v5706_v0 = vld [vmem:[#allocation7 + $0xac] sm:$0xf]  ;;  %v5325_v1 = vld [vmem:[#allocation7 + $0xb4] sm:$0xf0] }
  0x19   :  { %v5730_v2 = vld [vmem:[#allocation7 + $0x16c] sm:$0xf]  ;;  %v5328_v3 = vor.u32 %v5706_v0, %v5325_v1  ;;  %v5389_v4 = vld [vmem:[#allocation7 + $0x174] sm:$0xf0]  ;;  %v5703_v5 = vld [vmem:[#allocation7 + $0x94] sm:$0xf] }
  0x1a   :  { %v5317_v6 = vld [vmem:[#allocation7 + $0x9c] sm:$0xf0]  ;;  %v5392_v7 = vor.u32 %v5730_v2, %v5389_v4  ;;  %v5727_v8 = vld [vmem:[#allocation7 + $0x154] sm:$0xf]  ;;  %v5700_v12 = vld [vmem:[#allocation7 + $0x7c] sm:$0xf] }
  0x1b   :  { %v5381_v9 = vld [vmem:[#allocation7 + $0x15c] sm:$0xf0]  ;;  %609 = vmatpush.bf16.msra.mxu2 %v5328_v3  ;;  %v5320_v10 = vor.u32 %v5703_v5, %v5317_v6  ;;  %v5309_v13 = vld [vmem:[#allocation7 + $0x84] sm:$0xf0]  ;;  %v5724_v14 = vld [vmem:[#allocation7 + $0x13c] sm:$0xf] }
  0x1c   :  { %638 = vmatpush.bf16.msra.mxu3 %v5392_v7  ;;  %v5384_v11 = vor.u32 %v5727_v8, %v5381_v9  ;;  %v5373_v15 = vld [vmem:[#allocation7 + $0x144] sm:$0xf0]  ;;  %v5707_v17 = vld [vmem:[#allocation7 + $0xb0] sm:$0xf0]  ;;  %v5312_v21 = vor.u32 %v5700_v12, %v5309_v13  ;;  %v5697_v22 = vld [vmem:[#allocation7 + $0x64] sm:$0xf] }
  0x1d   :  { %v5203_v16 = vld [vmem:[#allocation7 + $0xa8] sm:$0xf]  ;;  %v5731_v20 = vld [vmem:[#allocation7 + $0x170] sm:$0xf0]  ;;  %v5301_v23 = vld [vmem:[#allocation7 + $0x6c] sm:$0xf0]  ;;  %v5376_v25 = vor.u32 %v5724_v14, %v5373_v15 }
  0x1e   :  { %v5204_v18 = vor.u32 %v5707_v17, %v5203_v16  ;;  %v5235_v19 = vld [vmem:[#allocation7 + $0x168] sm:$0xf]  ;;  %v5199_v26 = vld [vmem:[#allocation7 + $0x90] sm:$0xf]  ;;  %v5704_v27 = vld [vmem:[#allocation7 + $0x98] sm:$0xf0]  ;;  %v5304_v35 = vor.u32 %v5697_v22, %v5301_v23 }
  0x1f   :  { %610 = vmatpush.bf16.msra.mxu2 %v5320_v10  ;;  %v5236_v24 = vor.u32 %v5731_v20, %v5235_v19  ;;  %v5231_v28 = vld [vmem:[#allocation7 + $0x150] sm:$0xf]  ;;  %v5721_v29 = vld [vmem:[#allocation7 + $0x124] sm:$0xf]  ;;  %v5200_v31 = vor.u32 %v5704_v27, %v5199_v26  ;;  %v5728_v32 = vld [vmem:[#allocation7 + $0x158] sm:$0xf0] }
  0x20   :  { %639 = vmatpush.bf16.msra.mxu3 %v5384_v11  ;;  %351 = vmatpush.bf16.msra.mxu0 %v5204_v18  ;;  %v5365_v30 = vld [vmem:[#allocation7 + $0x12c] sm:$0xf0]  ;;  %v5232_v33 = vor.u32 %v5728_v32, %v5231_v28  ;;  %v5195_v34 = vld [vmem:[#allocation7 + $0x78] sm:$0xf]  ;;  %v5701_v36 = vld [vmem:[#allocation7 + $0x80] sm:$0xf0] }
  0x21   :  { %380 = vmatpush.bf16.msra.mxu1 %v5236_v24  ;;  %v5227_v37 = vld [vmem:[#allocation7 + $0x138] sm:$0xf]  ;;  %v5725_v38 = vld [vmem:[#allocation7 + $0x140] sm:$0xf0]  ;;  %v5368_v39 = vor.u32 %v5721_v29, %v5365_v30  ;;  %v5694_v40 = vld [vmem:[#allocation7 + $0x4c] sm:$0xf]  ;;  %v5196_v43 = vor.u32 %v5701_v36, %v5195_v34 }
  0x22   :  { %v5293_v41 = vld [vmem:[#allocation7 + $0x54] sm:$0xf0]  ;;  %v5718_v42 = vld [vmem:[#allocation7 + $0x10c] sm:$0xf]  ;;  %v5228_v45 = vor.u32 %v5725_v38, %v5227_v37  ;;  %v5191_v46 = vld [vmem:[#allocation7 + $0x60] sm:$0xf] }
  0x23   :  { %611 = vmatpush.bf16.msra.mxu2 %v5312_v21  ;;  %v5357_v44 = vld [vmem:[#allocation7 + $0x114] sm:$0xf0]  ;;  %v5698_v47 = vld [vmem:[#allocation7 + $0x68] sm:$0xf0]  ;;  %v5223_v48 = vld [vmem:[#allocation7 + $0x120] sm:$0xf]  ;;  %v5296_v50 = vor.u32 %v5694_v40, %v5293_v41 }
  0x24   :  { %640 = vmatpush.bf16.msra.mxu3 %v5376_v25  ;;  %352 = vmatpush.bf16.msra.mxu0 %v5200_v31  ;;  %v5722_v49 = vld [vmem:[#allocation7 + $0x128] sm:$0xf0]  ;;  %v5360_v51 = vor.u32 %v5718_v42, %v5357_v44  ;;  %v5691_v52 = vld [vmem:[#allocation7 + $0x34] sm:$0xf]  ;;  %v5285_v53 = vld [vmem:[#allocation7 + $0x3c] sm:$0xf0]  ;;  %v5192_v55 = vor.u32 %v5698_v47, %v5191_v46 }
  0x25   :  { %381 = vmatpush.bf16.msra.mxu1 %v5232_v33  ;;  %v5715_v54 = vld [vmem:[#allocation7 + $0xf4] sm:$0xf]  ;;  %v5349_v56 = vld [vmem:[#allocation7 + $0xfc] sm:$0xf0]  ;;  %v5224_v57 = vor.u32 %v5722_v49, %v5223_v48  ;;  %v5187_v58 = vld [vmem:[#allocation7 + $0x48] sm:$0xf]  ;;  %v5288_v62 = vor.u32 %v5691_v52, %v5285_v53 }
  0x26   :  { %v5695_v59 = vld [vmem:[#allocation7 + $0x50] sm:$0xf0]  ;;  %v5219_v60 = vld [vmem:[#allocation7 + $0x108] sm:$0xf]  ;;  %v5352_v63 = vor.u32 %v5715_v54, %v5349_v56  ;;  %v5688_v0 = vld [vmem:[#allocation7 + $0x1c] sm:$0xf] }
  0x27   :  { %612 = vmatpush.bf16.msra.mxu2 %v5304_v35  ;;  %v5719_v61 = vld [vmem:[#allocation7 + $0x110] sm:$0xf0]  ;;  %v5277_v1 = vld [vmem:[#allocation7 + $0x24] sm:$0xf0]  ;;  %v5712_v2 = vld [vmem:[#allocation7 + $0xdc] sm:$0xf]  ;;  %v5188_v3 = vor.u32 %v5695_v59, %v5187_v58 }
  0x28   :  { %641 = vmatpush.bf16.msra.mxu3 %v5368_v39  ;;  %353 = vmatpush.bf16.msra.mxu0 %v5196_v43  ;;  %v5341_v4 = vld [vmem:[#allocation7 + $0xe4] sm:$0xf0]  ;;  %v5220_v5 = vor.u32 %v5719_v61, %v5219_v60  ;;  %v5183_v6 = vld [vmem:[#allocation7 + $0x30] sm:$0xf]  ;;  %v5692_v7 = vld [vmem:[#allocation7 + $0x38] sm:$0xf0]  ;;  %v5280_v10 = vor.u32 %v5688_v0, %v5277_v1 }
  0x29   :  { %382 = vmatpush.bf16.msra.mxu1 %v5228_v45  ;;  %v5215_v8 = vld [vmem:[#allocation7 + $0xf0] sm:$0xf]  ;;  %v5716_v9 = vld [vmem:[#allocation7 + $0xf8] sm:$0xf0]  ;;  %v5344_v11 = vor.u32 %v5712_v2, %v5341_v4  ;;  %v5685_v12 = vld [vmem:[#allocation7 + $0x4] sm:$0xf]  ;;  %v5184_v15 = vor.u32 %v5692_v7, %v5183_v6 }
  0x2a   :  { %v5269_v13 = vld [vmem:[#allocation7 + $0xc] sm:$0xf0]  ;;  %v5709_v14 = vld [vmem:[#allocation7 + $0xc4] sm:$0xf]  ;;  %v5216_v17 = vor.u32 %v5716_v9, %v5215_v8  ;;  %v5179_v18 = vld [vmem:[#allocation7 + $0x18] sm:$0xf] }
  0x2b   :  { %613 = vmatpush.bf16.msra.mxu2 %v5296_v50  ;;  %v5333_v16 = vld [vmem:[#allocation7 + $0xcc] sm:$0xf0]  ;;  %v5689_v19 = vld [vmem:[#allocation7 + $0x20] sm:$0xf0]  ;;  %v5211_v20 = vld [vmem:[#allocation7 + $0xd8] sm:$0xf]  ;;  %v5272_v22 = vor.u32 %v5685_v12, %v5269_v13 }
  0x2c   :  { %642 = vmatpush.bf16.msra.mxu3 %v5360_v51  ;;  %354 = vmatpush.bf16.msra.mxu0 %v5192_v55  ;;  %v5713_v21 = vld [vmem:[#allocation7 + $0xe0] sm:$0xf0]  ;;  %v5239_v23 = vld [vmem:[#allocation2] sm:$0xf]  ;;  %v5670_v24 = vld [vmem:[#allocation2 + $0x4] sm:$0xf0]  ;;  %v5336_v25 = vor.u32 %v5709_v14, %v5333_v16  ;;  %v5180_v28 = vor.u32 %v5689_v19, %v5179_v18 }
  0x2d   :  { %383 = vmatpush.bf16.msra.mxu1 %v5224_v57  ;;  %v5669_v26 = vld [vmem:[#allocation2 + $0x4] sm:$0xf]  ;;  %v5241_v27 = vld [vmem:[#allocation2 + $0x8] sm:$0xf0]  ;;  %v5212_v29 = vor.u32 %v5713_v21, %v5211_v20  ;;  %v5175_v30 = vld [vmem:[#allocation7] sm:$0xf]  ;;  %v6323_v32 = vor.u32 %v5670_v24, %v5239_v23 }
  0x2e   :  { %v5686_v31 = vld [vmem:[#allocation7 + $0x8] sm:$0xf0]  ;;  %v5207_v33 = vld [vmem:[#allocation7 + $0xc0] sm:$0xf]  ;;  %v6325_v35 = vor.u32 %v5669_v26, %v5241_v27  ;;  %v5678_v38 = vld [vmem:[#allocation5 + $0x4] sm:$0xf0] }
  0x2f   :  { %614 = vmatpush.bf16.msra.mxu2 %v5288_v62  ;;  %v5710_v34 = vld [vmem:[#allocation7 + $0xc8] sm:$0xf0]  ;;  %v5176_v36 = vor.u32 %v5686_v31, %v5175_v30  ;;  %v5143_v37 = vld [vmem:[#allocation5] sm:$0xf]  ;;  %v5677_v40 = vld [vmem:[#allocation5 + $0x4] sm:$0xf] }
  0x30   :  { %643 = vmatpush.bf16.msra.mxu3 %v5352_v63  ;;  %355 = vmatpush.bf16.msra.mxu0 %v5188_v3  ;;  %v5208_v39 = vor.u32 %v5710_v34, %v5207_v33  ;;  %v5145_v41 = vld [vmem:[#allocation5 + $0x8] sm:$0xf0]  ;;  %v5144_v42 = vor.u32 %v5678_v38, %v5143_v37  ;;  %v5247_v44 = vld [vmem:[#allocation2 + $0x10] sm:$0xf]  ;;  %v5672_v45 = vld [vmem:[#allocation2 + $0x14] sm:$0xf0] }
  0x31   :  { %384 = vmatpush.bf16.msra.mxu1 %v5220_v5  ;;  %v5148_v43 = vor.u32 %v5677_v40, %v5145_v41  ;;  %v5671_v46 = vld [vmem:[#allocation2 + $0x14] sm:$0xf]  ;;  %v5249_v47 = vld [vmem:[#allocation2 + $0x18] sm:$0xf0]  ;;  %v6329_v48 = vor.u32 %v5672_v45, %v5247_v44  ;;  %v5151_v50 = vld [vmem:[#allocation5 + $0x10] sm:$0xf] }
  0x32   :  { %v6331_v49 = vor.u32 %v5671_v46, %v5249_v47  ;;  %v5680_v51 = vld [vmem:[#allocation5 + $0x14] sm:$0xf0]  ;;  %v5679_v52 = vld [vmem:[#allocation5 + $0x14] sm:$0xf]  ;;  %v5153_v53 = vld [vmem:[#allocation5 + $0x18] sm:$0xf0] }
  0x33   :  { %615 = vmatpush.bf16.msra.mxu2 %v5280_v10  ;;  %v5152_v54 = vor.u32 %v5680_v51, %v5151_v50  ;;  %v5156_v55 = vor.u32 %v5679_v52, %v5153_v53  ;;  %v5255_v56 = vld [vmem:[#allocation2 + $0x20] sm:$0xf]  ;;  %v5674_v57 = vld [vmem:[#allocation2 + $0x24] sm:$0xf0]  ;;  %v5673_v58 = vld [vmem:[#allocation2 + $0x24] sm:$0xf] }
  0x34   :  { %644 = vmatpush.bf16.msra.mxu3 %v5344_v11  ;;  %356 = vmatpush.bf16.msra.mxu0 %v5184_v15  ;;  %v5257_v59 = vld [vmem:[#allocation2 + $0x28] sm:$0xf0]  ;;  %v6335_v60 = vor.u32 %v5674_v57, %v5255_v56  ;;  %v5159_v62 = vld [vmem:[#allocation5 + $0x20] sm:$0xf]  ;;  %v5682_v63 = vld [vmem:[#allocation5 + $0x24] sm:$0xf0] }
  0x35   :  { %385 = vmatpush.bf16.msra.mxu1 %v5216_v17  ;;  %v6337_v61 = vor.u32 %v5673_v58, %v5257_v59  ;;  %v5681_v0 = vld [vmem:[#allocation5 + $0x24] sm:$0xf]  ;;  %v5161_v1 = vld [vmem:[#allocation5 + $0x28] sm:$0xf0]  ;;  %v5160_v2 = vor.u32 %v5682_v63, %v5159_v62  ;;  %v5263_v4 = vld [vmem:[#allocation2 + $0x30] sm:$0xf] }
  0x36   :  { %v5164_v3 = vor.u32 %v5681_v0, %v5161_v1  ;;  %v5676_v5 = vld [vmem:[#allocation2 + $0x34] sm:$0xf0]  ;;  %v5675_v6 = vld [vmem:[#allocation2 + $0x34] sm:$0xf]  ;;  %v5265_v7 = vld [vmem:[#allocation2 + $0x38] sm:$0xf0] }
  0x37   :  { %616 = vmatpush.bf16.msra.mxu2 %v5272_v22  ;;  %v6341_v8 = vor.u32 %v5676_v5, %v5263_v4  ;;  %v6343_v9 = vor.u32 %v5675_v6, %v5265_v7  ;;  %v5167_v10 = vld [vmem:[#allocation5 + $0x30] sm:$0xf]  ;;  %v5684_v11 = vld [vmem:[#allocation5 + $0x34] sm:$0xf0]  ;;  %v5683_v12 = vld [vmem:[#allocation5 + $0x34] sm:$0xf] }
  0x38   :  { %645 = vmatpush.bf16.msra.mxu3 %v5336_v25  ;;  %357 = vmatpush.bf16.msra.mxu0 %v5180_v28  ;;  %v5169_v13 = vld [vmem:[#allocation5 + $0x38] sm:$0xf0]  ;;  %v5168_v14 = vor.u32 %v5684_v11, %v5167_v10  ;;  %v6347_v16 = vld [vmem:[#allocation10] sm:$0xff]  ;;  %vm759_vm0 = vcmask 261120   ;;  %vm912_vm1 = vcmask 64512   ;;  %s6264_s2 = smov 96  }
  0x39   :  { %386 = vmatpush.bf16.msra.mxu1 %v5212_v29  ;;  %v5172_v15 = vor.u32 %v5683_v12, %v5169_v13  ;;  %v6350_v19 = vperm.slane %v6347_v16, 1  ;;  %v6353_v20 = vperm.slane %v6347_v16, 0  ;;  %vm1020_vm2 = vcmask 1043456   ;;  %s6265_s4 = smov 64   ;;  %s6266_s21 = smov 32  }
  0x3a   :  { %617 = vmatmul.bf16.vlgmr.msra.gmra.mxu2 %v6323_v32  ;;  %vm3025_vm3 = vcmask 1041409   ;;  %vm3028_vm4 = vcmask 1042434   ;;  %vm3031_vm5 = vcmask 1043459   ;;  %vm3034_vm6 = vcmask 1044484   ;;  %s6268_s22 = smov [#allocation11]   ;;  %s5129_s26 = sshll.u32 %s8119_s5, 4  ;;  %s5130_s26 = int_to_ptr.hbm [resolvable:$true] %s5129_s26 }
  0x3b   :  { %646 = vmatmul.bf16.vlgmr.msra.gmra.mxu3 %v6325_v35  ;;  %vm3037_vm7 = vcmask 1045509   ;;  %vm3040_vm8 = vcmask 1046534   ;;  %vm3043_vm9 = vcmask 1047559   ;;  %vm3275_vm10 = vcmask 57344   ;;  %s5127_s23 = sshll.u32 %s6268_s22, 4  ;;  %s5128_s23 = int_to_ptr.vmem [resolvable:$true] %s5127_s23 }
  0x3c   :  { %358 = vmatpush.bf16.msra.mxu0 %v5176_v36  ;;  %vm5052_vm11 = vcmask 523264   ;;  %vm5061_vm12 = vcmask 785408  }
  0x3d   :  { %387 = vmatpush.bf16.msra.mxu1 %v5208_v39 }
  0x3f   :  { %359 = vmatmul.bf16.vlgmr.msra.gmra.mxu0 %v5144_v42 }
  0x40   :  { %388 = vmatmul.bf16.vlgmr.msra.gmra.mxu1 %v5148_v43 }
  0x4a   :  { %622 = vmatmul.bf16.gmra.mxu2 %v6329_v48 }
  0x4b   :  { %651 = vmatmul.bf16.gmra.mxu3 %v6331_v49 }
  0x4f   :  { %364 = vmatmul.bf16.gmra.mxu0 %v5152_v54 }
  0x50   :  { %393 = vmatmul.bf16.gmra.mxu1 %v5156_v55 }
  0x5a   :  { %627 = vmatmul.bf16.gmra.mxu2 %v6335_v60 }
  0x5b   :  { %656 = vmatmul.bf16.gmra.mxu3 %v6337_v61 }
  0x5f   :  { %369 = vmatmul.bf16.gmra.mxu0 %v5160_v2 }
  0x60   :  { %398 = vmatmul.bf16.gmra.mxu1 %v5164_v3 }
  0x6a   :  { %632 = vmatmul.bf16.gmra.mxu2 %v6341_v8 }
  0x6b   :  { %661 = vmatmul.bf16.gmra.mxu3 %v6343_v9 }
  0x6f   :  { %374 = vmatmul.bf16.gmra.mxu0 %v5168_v14 }
  0x70   :  { %403 = vmatmul.bf16.gmra.mxu1 %v5172_v15 }
  0xbc   :  { %v360_v17 = vpop.f32.mrf.mxu0 }
  0xbd   :  { %v618_v18 = vpop.f32.mrf.mxu2  ;;  %v389_v21 = vpop.f32.mrf.mxu1  ;;  %v361_v25 = vadd.f32 %v360_v17, %v6353_v20 }
  0xbe   :  { %v647_v22 = vpop.f32.mrf.mxu3 }
  0xbf   :  { %v648_v23 = vadd.f32 %v647_v22, %v618_v18  ;;  %v390_v30 = vadd.f32 %v389_v21, %v361_v25 }
  0xc1   :  { %v726_v24 = vadd.f32 %v6350_v19, %v648_v23  ;;  %v6361_v36 = vpack.c.bf16 %v390_v30, %v390_v30 }
  0xc3   :  { %v6357_v26 = vpack.c.bf16 %v726_v24, %v726_v24 }
  0xc4   :  { %v362_v27 = vpop.f32.mrf.mxu0 }
  0xc5   :  { %v620_v28 = vpop.f32.mrf.mxu2  ;;  %v764_v29 = vsel %vm759_vm0, %v6357_v26, 0  ;;  %v391_v31 = vpop.f32.mrf.mxu1  ;;  %v363_v38 = vadd.f32 %v362_v27, %v6353_v20 }
  0xc6   :  { %v649_v33 = vpop.f32.mrf.mxu3  ;;  %773 = vmatpush.bf16.xpose.msrb.mxu2 %v764_v29 }
  0xc7   :  { %v650_v34 = vadd.f32 %v649_v33, %v620_v28  ;;  %v392_v46 = vadd.f32 %v391_v31, %v363_v38 }
  0xc9   :  { %v727_v37 = vadd.f32 %v6350_v19, %v650_v34  ;;  %v6375_v52 = vpack.c.bf16 %v392_v46, %v392_v46 }
  0xcb   :  { %v6365_v39 = vpack.c.bf16 %v727_v37, %v727_v37 }
  0xcc   :  { %v365_v40 = vpop.f32.mrf.mxu0 }
  0xcd   :  { %5397 = vmatmul.msk.bf16.vlgmr.msrb.gmra.mxu2 %vm759_vm0, %v6361_v36  ;;  %v623_v41 = vpop.f32.mrf.mxu2  ;;  %v783_v42 = vsel %vm759_vm0, %v6365_v39, 0  ;;  %v394_v43 = vpop.f32.mrf.mxu1  ;;  %v366_v50 = vadd.f32 %v365_v40, %v6353_v20 }
  0xce   :  { %v652_v44 = vpop.f32.mrf.mxu3  ;;  %792 = vmatpush.bf16.xpose.msrb.mxu3 %v783_v42 }
  0xcf   :  { %v653_v45 = vadd.f32 %v652_v44, %v623_v41  ;;  %v395_v56 = vadd.f32 %v394_v43, %v366_v50 }
  0xd1   :  { %v728_v47 = vadd.f32 %v6350_v19, %v653_v45  ;;  %v6382_v63 = vpack.c.bf16 %v395_v56, %v395_v56 }
  0xd3   :  { %v6373_v51 = vpack.c.bf16 %v728_v47, %v728_v47 }
  0xd4   :  { %v367_v53 = vpop.f32.mrf.mxu0 }
  0xd5   :  { %5398 = vmatmul.msk.bf16.vlgmr.msrb.gmra.mxu3 %vm759_vm0, %v6375_v52  ;;  %v625_v54 = vpop.f32.mrf.mxu2  ;;  %v802_v55 = vsel %vm759_vm0, %v6373_v51, 0  ;;  %v396_v57 = vpop.f32.mrf.mxu1  ;;  %v368_v1 = vadd.f32 %v367_v53, %v6353_v20 }
  0xd6   :  { %v654_v58 = vpop.f32.mrf.mxu3  ;;  %811 = vmatpush.bf16.xpose.msra.mxu2 %v802_v55 }
  0xd7   :  { %v655_v59 = vadd.f32 %v654_v58, %v625_v54  ;;  %v397_v10 = vadd.f32 %v396_v57, %v368_v1 }
  0xd9   :  { %v729_v62 = vadd.f32 %v6350_v19, %v655_v59  ;;  %v6395_v14 = vpack.c.bf16 %v397_v10, %v397_v10 }
  0xdb   :  { %v6384_v0 = vpack.c.bf16 %v729_v62, %v729_v62 }
  0xdc   :  { %v370_v2 = vpop.f32.mrf.mxu0 }
  0xdd   :  { %5399 = vmatmul.msk.bf16.vlgmr.msra.gmra.mxu2 %vm759_vm0, %v6382_v63  ;;  %v628_v3 = vpop.f32.mrf.mxu2  ;;  %v821_v4 = vsel %vm759_vm0, %v6384_v0, 0  ;;  %v399_v6 = vpop.f32.mrf.mxu1  ;;  %v371_v12 = vadd.f32 %v370_v2, %v6353_v20 }
  0xde   :  { %v657_v5 = vpop.f32.mrf.mxu3  ;;  %830 = vmatpush.bf16.xpose.msra.mxu3 %v821_v4 }
  0xdf   :  { %v658_v7 = vadd.f32 %v657_v5, %v628_v3  ;;  %v400_v21 = vadd.f32 %v399_v6, %v371_v12  ;;  %v5331_v12 = vld [vmem:[#allocation7 + $0xb0] sm:$0xf] }
  0xe1   :  { %v730_v11 = vadd.f32 %v6350_v19, %v658_v7  ;;  %v6402_v27 = vpack.c.bf16 %v400_v21, %v400_v21  ;;  %v5732_v21 = vld [vmem:[#allocation7 + $0x178] sm:$0xf0] }
  0xe3   :  { %v6393_v13 = vpack.c.bf16 %v730_v11, %v730_v11 }
  0xe4   :  { %v372_v15 = vpop.f32.mrf.mxu0 }
  0xe5   :  { %5400 = vmatmul.msk.bf16.vlgmr.msra.gmra.mxu3 %vm759_vm0, %v6395_v14  ;;  %v630_v17 = vpop.f32.mrf.mxu2  ;;  %v840_v18 = vsel %vm759_vm0, %v6393_v13, 0  ;;  %v401_v24 = vpop.f32.mrf.mxu1  ;;  %v373_v29 = vadd.f32 %v372_v15, %v6353_v20  ;;  %v5708_v15 = vld [vmem:[#allocation7 + $0xb8] sm:$0xf0] }
  0xe6   :  { %v659_v22 = vpop.f32.mrf.mxu3  ;;  %849 = vmatpush.bf16.xpose.msrb.mxu2 %v840_v18  ;;  %v5395_v18 = vld [vmem:[#allocation7 + $0x170] sm:$0xf] }
  0xe7   :  { %v660_v23 = vadd.f32 %v659_v22, %v630_v17  ;;  %v402_v38 = vadd.f32 %v401_v24, %v373_v29  ;;  %v5332_v17 = vor.u32 %v5708_v15, %v5331_v12  ;;  %v5323_v22 = vld [vmem:[#allocation7 + $0x98] sm:$0xf]  ;;  %v5705_v24 = vld [vmem:[#allocation7 + $0xa0] sm:$0xf0] }
  0xe8   :  { %v5729_v29 = vld [vmem:[#allocation7 + $0x160] sm:$0xf0]  ;;  %v5291_v12 = vld [vmem:[#allocation7 + $0x38] sm:$0xf] }
  0xe9   :  { %v731_v25 = vadd.f32 %v6350_v19, %v660_v23  ;;  %v6415_v44 = vpack.c.bf16 %v402_v38, %v402_v38  ;;  %v5396_v23 = vor.u32 %v5732_v21, %v5395_v18  ;;  %667 = vmatpush.bf16.msrb.mxu0 %v5332_v17  ;;  %v5726_v38 = vld [vmem:[#allocation7 + $0x148] sm:$0xf0]  ;;  %v5693_v15 = vld [vmem:[#allocation7 + $0x40] sm:$0xf0]  ;;  %v5355_v17 = vld [vmem:[#allocation7 + $0xf8] sm:$0xf] }
  0xea   :  { %v5717_v18 = vld [vmem:[#allocation7 + $0x100] sm:$0xf0] }
  0xeb   :  { %v6404_v28 = vpack.c.bf16 %v731_v25, %v731_v25  ;;  %v5387_v25 = vld [vmem:[#allocation7 + $0x158] sm:$0xf]  ;;  %696 = vmatpush.bf16.msrb.mxu1 %v5396_v23  ;;  %v5356_v23 = vor.u32 %v5717_v18, %v5355_v17 }
  0xec   :  { %v375_v34 = vpop.f32.mrf.mxu0 }
  0xed   :  { %5401 = vmatmul.msk.bf16.vlgmr.msrb.gmra.mxu2 %vm759_vm0, %v6402_v27  ;;  %v633_v30 = vpop.f32.mrf.mxu2  ;;  %v859_v31 = vsel %vm759_vm0, %v6404_v28, 0  ;;  %v376_v41 = vadd.f32 %v375_v34, %v6353_v20  ;;  %v404_v42 = vpop.f32.mrf.mxu1  ;;  %v5702_v34 = vld [vmem:[#allocation7 + $0x88] sm:$0xf0] }
  0xee   :  { %v662_v33 = vpop.f32.mrf.mxu3  ;;  %868 = vmatpush.bf16.xpose.msrb.mxu3 %v859_v31  ;;  %v5388_v31 = vor.u32 %v5729_v29, %v5387_v25  ;;  %v5283_v29 = vld [vmem:[#allocation7 + $0x20] sm:$0xf] }
  0xef   :  { %v663_v37 = vadd.f32 %v662_v33, %v633_v30  ;;  %v405_v47 = vadd.f32 %v404_v42, %v376_v41  ;;  %v5324_v30 = vor.u32 %v5705_v24, %v5323_v22  ;;  %v5315_v33 = vld [vmem:[#allocation7 + $0x80] sm:$0xf]  ;;  %v5292_v22 = vor.u32 %v5693_v15, %v5291_v12 }
  0xf0   :  { %v5316_v42 = vor.u32 %v5702_v34, %v5315_v33  ;;  %697 = vmatpush.bf16.msrb.mxu1 %v5388_v31  ;;  %v5347_v33 = vld [vmem:[#allocation7 + $0xe0] sm:$0xf]  ;;  %v5714_v34 = vld [vmem:[#allocation7 + $0xe8] sm:$0xf0] }
  0xf1   :  { %v732_v40 = vadd.f32 %v6350_v19, %v663_v37  ;;  %v6422_v56 = vpack.c.bf16 %v405_v47, %v405_v47  ;;  %v5379_v37 = vld [vmem:[#allocation7 + $0x140] sm:$0xf]  ;;  %668 = vmatpush.bf16.msrb.mxu0 %v5324_v30  ;;  %v5699_v47 = vld [vmem:[#allocation7 + $0x70] sm:$0xf0]  ;;  %v5690_v30 = vld [vmem:[#allocation7 + $0x28] sm:$0xf0] }
  0xf2   :  { %v5284_v31 = vor.u32 %v5690_v30, %v5283_v29  ;;  %v1262_v29 = vunpack.c.l.b16 %v6395_v14 }
  0xf3   :  { %v6413_v43 = vpack.c.bf16 %v732_v40, %v732_v40 }
  0xf4   :  { %v377_v54 = vpop.f32.mrf.mxu0 }
  0xf5   :  { %5402 = vmatmul.msk.bf16.vlgmr.msrb.gmra.mxu3 %vm759_vm0, %v6415_v44  ;;  %v635_v45 = vpop.f32.mrf.mxu2  ;;  %v878_v46 = vsel %vm759_vm0, %v6413_v43, 0  ;;  %v378_v58 = vadd.f32 %v377_v54, %v6353_v20  ;;  %v406_v59 = vpop.f32.mrf.mxu1  ;;  %669 = vmatpush.bf16.msrb.mxu0 %v5316_v42  ;;  %v5339_v42 = vld [vmem:[#allocation7 + $0xc8] sm:$0xf]  ;;  %v1354_v18 = vunpack.c.l.b16 %v6413_v43 }
  0xf6   :  { %v664_v50 = vpop.f32.mrf.mxu3  ;;  %887 = vmatpush.bf16.xpose.msra.mxu2 %v878_v46  ;;  %v5307_v46 = vld [vmem:[#allocation7 + $0x68] sm:$0xf] }
  0xf7   :  { %v665_v53 = vadd.f32 %v664_v50, %v635_v45  ;;  %v407_v1 = vadd.f32 %v406_v59, %v378_v58  ;;  %v5380_v45 = vor.u32 %v5726_v38, %v5379_v37  ;;  %v5371_v50 = vld [vmem:[#allocation7 + $0x128] sm:$0xf]  ;;  %v5308_v54 = vor.u32 %v5699_v47, %v5307_v46  ;;  %v5299_v58 = vld [vmem:[#allocation7 + $0x50] sm:$0xf]  ;;  %v5696_v59 = vld [vmem:[#allocation7 + $0x58] sm:$0xf0] }
  0xf8   :  { %v5348_v37 = vor.u32 %v5714_v34, %v5347_v33  ;;  %v5275_v38 = vld [vmem:[#allocation7 + $0x8] sm:$0xf]  ;;  %v5711_v46 = vld [vmem:[#allocation7 + $0xd0] sm:$0xf0]  ;;  %v6505_v33 = vpack.c.b16 %v1262_v29, %v1262_v29 }
  0xf9   :  { %v733_v55 = vadd.f32 %v6350_v19, %v665_v53  ;;  %v6431_v2 = vpack.c.bf16 %v407_v1, %v407_v1  ;;  %v5723_v53 = vld [vmem:[#allocation7 + $0x130] sm:$0xf0]  ;;  %698 = vmatpush.bf16.msrb.mxu1 %v5380_v45  ;;  %v5720_v1 = vld [vmem:[#allocation7 + $0x118] sm:$0xf0]  ;;  %670 = vmatpush.bf16.msrb.mxu0 %v5308_v54  ;;  %v5340_v47 = vor.u32 %v5711_v46, %v5339_v42 }
  0xfb   :  { %v6424_v57 = vpack.c.bf16 %v733_v55, %v733_v55  ;;  %v5372_v55 = vor.u32 %v5723_v53, %v5371_v50  ;;  %v1378_v34 = vunpack.c.l.b16 %v6431_v2 }
  0xfd   :  { %5403 = vmatmul.msk.bf16.vlgmr.msra.gmra.mxu2 %vm759_vm0, %v6422_v56  ;;  %v897_v62 = vsel %vm759_vm0, %v6424_v57, 0  ;;  %699 = vmatpush.bf16.msrb.mxu1 %v5372_v55  ;;  %v1383_v14 = vunpack.c.l.b16 %v6424_v57 }
  0xfe   :  { %906 = vmatpush.bf16.xpose.msra.mxu3 %v897_v62  ;;  %v5363_v62 = vld [vmem:[#allocation7 + $0x110] sm:$0xf] }
  0xff   :  { %v6515_v42 = vpack.c.b16 %v1383_v14, %v1383_v14 }
 0x105   :  { %5404 = vmatmul.msk.bf16.vlgmr.msra.gmra.mxu3 %vm759_vm0, %v6431_v2 }
 0x150   :  { %v6435_v19 = vpop.f32.mrf.mxu2 }
 0x158   :  { %v777_v3 = vpop.f32.mrf.mxu2  ;;  %v6437_v4 = vpop.f32.mrf.mxu3 }
 0x159   :  { %v1233_v3 = vunpack.c.l.b16 %v6382_v63 }
 0x15b   :  { %v6452_v21 = vpack.c.b16 %v1233_v3, %v1233_v3 }
 0x160   :  { %v796_v20 = vpop.f32.mrf.mxu3  ;;  %v6439_v5 = vpop.f32.mrf.mxu2 }
 0x161   :  { %v919_v6 = vsel %vm912_vm1, %v6439_v5, -inf }
 0x162   :  { %920 = vmax.xlane.f32.xlu0 %v919_v6 }
 0x168   :  { %v815_v7 = vpop.f32.mrf.mxu2  ;;  %v6443_v10 = vpop.f32.mrf.mxu3 }
 0x169   :  { %v922_v11 = vsel %vm912_vm1, %v6443_v10, -inf  ;;  %v5300_v7 = vor.u32 %v5696_v59, %v5299_v58  ;;  %v1267_v58 = vunpack.c.l.b16 %v6384_v0 }
 0x16a   :  { %923 = vmax.xlane.f32.xlu0 %v922_v11  ;;  %v5364_v11 = vor.u32 %v5720_v1, %v5363_v62 }
 0x16b   :  { %671 = vmatpush.bf16.msrb.mxu0 %v5300_v7  ;;  %v6463_v59 = vpack.c.b16 %v1267_v58, %v1267_v58 }
 0x16c   :  { %700 = vmatpush.bf16.msrb.mxu1 %v5364_v11 }
 0x16f   :  { %672 = vmatpush.bf16.msrb.mxu0 %v5292_v22 }
 0x170   :  { %v834_v40 = vpop.f32.mrf.mxu3  ;;  %v6447_v41 = vpop.f32.mrf.mxu2  ;;  %701 = vmatpush.bf16.msrb.mxu1 %v5356_v23 }
 0x171   :  { %v5687_v40 = vld [vmem:[#allocation7 + $0x10] sm:$0xf0] }
 0x172   :  { %v5276_v45 = vor.u32 %v5687_v40, %v5275_v38  ;;  %v6510_v40 = vpack.c.b16 %v1378_v34, %v1378_v34 }
 0x173   :  { %673 = vmatpush.bf16.msrb.mxu0 %v5284_v31 }
 0x174   :  { %702 = vmatpush.bf16.msrb.mxu1 %v5348_v37 }
 0x177   :  { %674 = vmatpush.bf16.msrb.mxu0 %v5276_v45 }
 0x178   :  { %v853_v20 = vpop.f32.mrf.mxu2  ;;  %v6450_v6 = vpop.f32.mrf.mxu3  ;;  %703 = vmatpush.bf16.msrb.mxu1 %v5340_v47  ;;  %v734_v47 = vperm.slane %v6347_v16, 2 }
 0x17a   :  { %675 = vmatmul.bf16.vlgmr.msrb.gmra.mxu0 %v6323_v32 }
 0x17b   :  { %704 = vmatmul.bf16.vlgmr.msrb.gmra.mxu1 %v6325_v35 }
 0x17e   :  { %1235 = vrot.lane.b32.xlu0 %v6452_v21, %s6264_s2 }
 0x180   :  { %v872_v63 = vpop.f32.mrf.mxu3  ;;  %v889_v24 = vpop.f32.mrf.mxu2 }
 0x181   :  { %v931_v25 = vsel %vm912_vm1, %v889_v24, -inf }
 0x182   :  { %932 = vmax.xlane.f32.xlu1 %v931_v25  ;;  %v1349_v25 = vunpack.c.l.b16 %v6422_v56 }
 0x184   :  { %v6501_v30 = vpack.c.b16 %v1349_v25, %v1349_v25 }
 0x188   :  { %v908_v50 = vpop.f32.mrf.mxu3  ;;  %v891_v53 = vpop.f32.mrf.mxu2 }
 0x189   :  { %v934_v54 = vsel %vm912_vm1, %v908_v50, -inf }
 0x18a   :  { %935 = vmax.xlane.f32.xlu1 %v934_v54  ;;  %680 = vmatmul.bf16.gmra.mxu0 %v6329_v48 }
 0x18b   :  { %709 = vmatmul.bf16.gmra.mxu1 %v6331_v49 }
 0x190   :  { %v910_v55 = vpop.f32.mrf.mxu3 }
 0x19a   :  { %685 = vmatmul.bf16.gmra.mxu0 %v6335_v60 }
 0x19b   :  { %714 = vmatmul.bf16.gmra.mxu1 %v6337_v61 }
 0x1a3   :  { %1269 = vrot.lane.b32.xlu1 %v6463_v59, %s6264_s2 }
 0x1aa   :  { %690 = vmatmul.bf16.gmra.mxu0 %v6341_v8 }
 0x1ab   :  { %719 = vmatmul.bf16.gmra.mxu1 %v6343_v9 }
 0x1d5   :  { %v921_v32 = vpop.xlane.xlu0 %920 }
 0x1d6   :  { %v939_v35 = vsub.f32 %v6439_v5, %v921_v32 }
 0x1d8   :  { %v949_v48 = vmul.f32 1.442695, %v939_v35 }
 0x1da   :  { %5843 = vpow2.f32 %v949_v48 }
 0x1dd   :  { %v924_v49 = vpop.xlane.xlu0 %923 }
 0x1de   :  { %v940_v0 = vsub.f32 %v6443_v10, %v924_v49  ;;  %v1238_v10 = vunpack.c.l.b16 %v6373_v51  ;;  %v6493_v51 = vpack.c.b16 %v1354_v18, %v1354_v18 }
 0x1e0   :  { %v6473_v62 = vpop.eup %5843  ;;  %v951_v1 = vmul.f32 1.442695, %v940_v0  ;;  %v6484_v15 = vpack.c.b16 %v1238_v10, %v1238_v10  ;;  %v916_v10 = vsel %vm912_vm1, %v6437_v4, -inf }
 0x1e1   :  { %v967_v60 = vsel %vm912_vm1, %v6473_v62, 0.0 }
 0x1e2   :  { %5845 = vpow2.f32 %v951_v1  ;;  %968 = vadd.xlane.f32.xlu2 %v967_v60 }
 0x1e8   :  { %v6477_v61 = vpop.eup %5845 }
 0x1e9   :  { %v970_v8 = vsel %vm912_vm1, %v6477_v61, 0.0 }
 0x1ea   :  { %971 = vadd.xlane.f32.xlu2 %v970_v8 }
 0x1f5   :  { %v933_v9 = vpop.xlane.xlu1 %932 }
 0x1f6   :  { %v943_v5 = vsub.f32 %v889_v24, %v933_v9 }
 0x1f7   :  { %v676_v23 = vpop.f32.mrf.mxu0 }
 0x1f8   :  { %v957_v3 = vmul.f32 1.442695, %v943_v5  ;;  %v705_v24 = vpop.f32.mrf.mxu1 }
 0x1f9   :  { %v706_v46 = vadd.f32 %v705_v24, %v676_v23 }
 0x1fa   :  { %5847 = vpow2.f32 %v957_v3 }
 0x1fb   :  { %v735_v2 = vadd.f32 %v734_v47, %v706_v46 }
 0x1fd   :  { %v936_v20 = vpop.xlane.xlu1 %935  ;;  %v6520_v58 = vpack.c.bf16 %v735_v2, %v735_v2  ;;  %v913_v2 = vsel %vm912_vm1, %v6435_v19, -inf }
 0x1fe   :  { %v944_v7 = vsub.f32 %v908_v50, %v936_v20 }
 0x1ff   :  { %v678_v43 = vpop.f32.mrf.mxu0  ;;  %v1022_v32 = vsel %vm1020_vm2, %v6520_v58, 0 }
 0x200   :  { %v6482_v11 = vpop.eup %5847  ;;  %v959_v12 = vmul.f32 1.442695, %v944_v7  ;;  %v707_v31 = vpop.f32.mrf.mxu1  ;;  %1031 = vmatpush.bf16.msra.mxu0 %v1022_v32 }
 0x201   :  { %v979_v17 = vsel %vm912_vm1, %v6482_v11, 0.0  ;;  %v708_v50 = vadd.f32 %v707_v31, %v678_v43 }
 0x202   :  { %5849 = vpow2.f32 %v959_v12  ;;  %1240 = vrot.lane.b32.xlu2 %v6484_v15, %s6264_s2  ;;  %980 = vadd.xlane.f32.xlu0 %v979_v17 }
 0x203   :  { %v736_v53 = vadd.f32 %v734_v47, %v708_v50 }
 0x205   :  { %v6522_v57 = vpack.c.bf16 %v736_v53, %v736_v53 }
 0x207   :  { %v681_v37 = vpop.f32.mrf.mxu0  ;;  %v1041_v35 = vsel %vm1020_vm2, %v6522_v57, 0 }
 0x208   :  { %v6491_v22 = vpop.eup %5849  ;;  %v710_v38 = vpop.f32.mrf.mxu1  ;;  %1050 = vmatpush.bf16.msra.mxu1 %v1041_v35 }
 0x209   :  { %v982_v63 = vsel %vm912_vm1, %v6491_v22, 0.0  ;;  %v711_v48 = vadd.f32 %v710_v38, %v681_v37 }
 0x20a   :  { %1356 = vrot.lane.b32.xlu2 %v6493_v51, %s6264_s2  ;;  %983 = vadd.xlane.f32.xlu1 %v982_v63  ;;  %v925_v63 = vsel %vm912_vm1, %v6447_v41, -inf }
 0x20b   :  { %v737_v1 = vadd.f32 %v734_v47, %v711_v48 }
 0x20d   :  { %v6528_v9 = vpack.c.bf16 %v737_v1, %v737_v1 }
 0x20f   :  { %v683_v56 = vpop.f32.mrf.mxu0  ;;  %v1060_v20 = vsel %vm1020_vm2, %v6528_v9, 0 }
 0x210   :  { %v712_v45 = vpop.f32.mrf.mxu1  ;;  %1069 = vmatpush.bf16.msrb.mxu2 %v1060_v20 }
 0x211   :  { %v713_v49 = vadd.f32 %v712_v45, %v683_v56  ;;  %v928_v56 = vsel %vm912_vm1, %v6450_v6, -inf }
 0x212   :  { %1351 = vrot.lane.b32.xlu2 %v6501_v30, %s6264_s2 }
 0x213   :  { %v738_v60 = vadd.f32 %v734_v47, %v713_v49  ;;  %v1175_v49 = vunpack.c.l.b16 %v6361_v36 }
 0x215   :  { %v6530_v5 = vpack.c.bf16 %v738_v60, %v738_v60  ;;  %v6568_v1 = vpack.c.b16 %v1175_v49, %v1175_v49 }
 0x216   :  { %1264 = vrot.lane.b32.xlu0 %v6505_v33, %s6264_s2 }
 0x217   :  { %v686_v54 = vpop.f32.mrf.mxu0  ;;  %v1079_v7 = vsel %vm1020_vm2, %v6530_v5, 0 }
 0x218   :  { %v715_v55 = vpop.f32.mrf.mxu1  ;;  %1088 = vmatpush.bf16.msrb.mxu3 %v1079_v7 }
 0x219   :  { %v716_v24 = vadd.f32 %v715_v55, %v686_v54  ;;  %v1180_v55 = vunpack.c.l.b16 %v6357_v26 }
 0x21b   :  { %v739_v37 = vadd.f32 %v734_v47, %v716_v24  ;;  %v6561_v32 = vpack.c.b16 %v1180_v55, %v1180_v55 }
 0x21d   :  { %v6550_v46 = vpack.c.bf16 %v739_v37, %v739_v37 }
 0x21e   :  { %1380 = vrot.lane.b32.xlu0 %v6510_v40, %s6264_s2 }
 0x21f   :  { %v688_v16 = vpop.f32.mrf.mxu0 }
 0x220   :  { %v717_v0 = vpop.f32.mrf.mxu1 }
 0x221   :  { %v718_v25 = vadd.f32 %v717_v0, %v688_v16 }
 0x223   :  { %1385 = vrot.lane.b32.xlu1 %v6515_v42, %s6264_s2  ;;  %v740_v38 = vadd.f32 %v734_v47, %v718_v25 }
 0x225   :  { %v6552_v50 = vpack.c.bf16 %v740_v38, %v740_v38 }
 0x227   :  { %v691_v8 = vpop.f32.mrf.mxu0  ;;  %v1117_v53 = vsel %vm1020_vm2, %v6552_v50, 0 }
 0x228   :  { %v720_v3 = vpop.f32.mrf.mxu1  ;;  %1126 = vmatpush.bf16.msrb.mxu1 %v1117_v53 }
 0x229   :  { %v721_v12 = vadd.f32 %v720_v3, %v691_v8  ;;  %v1270_v3 = vpop.permute.xlu1 %1269 }
 0x22a   :  { %v1275_v36 = vsel %vm759_vm0, %v1270_v3, 0 }
 0x22b   :  { %v741_v18 = vadd.f32 %v734_v47, %v721_v12  ;;  %v1236_v12 = vpop.permute.xlu0 %1235 }
 0x22d   :  { %v6540_v43 = vpack.c.bf16 %v741_v18, %v741_v18 }
 0x22f   :  { %v693_v17 = vpop.f32.mrf.mxu0  ;;  %v1136_v34 = vsel %vm1020_vm2, %v6540_v43, 0 }
 0x230   :  { %v722_v23 = vpop.f32.mrf.mxu1  ;;  %1145 = vmatpush.bf16.msra.mxu2 %v1136_v34 }
 0x231   :  { %v723_v29 = vadd.f32 %v722_v23, %v693_v17 }
 0x233   :  { %v742_v31 = vadd.f32 %v734_v47, %v723_v29  ;;  %v1098_v47 = vsel %vm1020_vm2, %v6550_v46, 0 }
 0x234   :  { %1107 = vmatpush.bf16.msrb.mxu0 %v1098_v47 }
 0x235   :  { %v6544_v14 = vpack.c.bf16 %v742_v31, %v742_v31 }
 0x237   :  { %v1155_v45 = vsel %vm1020_vm2, %v6544_v14, 0 }
 0x238   :  { %1164 = vmatpush.bf16.msra.mxu3 %v1155_v45 }
 0x23b   :  { %917 = vmax.xlane.f32.xlu2 %v916_v10 }
 0x243   :  { %926 = vmax.xlane.f32.xlu2 %v925_v63 }
 0x248   :  { %929 = vmax.xlane.f32.xlu0 %v928_v56 }
 0x24d   :  { %914 = vmax.xlane.f32.xlu1 %v913_v2 }
 0x255   :  { %v969_v54 = vpop.xlane.xlu2 %968 }
 0x256   :  { %5851 = vrcp.f32 %v969_v54 }
 0x25c   :  { %v5852_v35 = vpop.eup %5851  ;;  %1182 = vrot.lane.b32.xlu0 %v6561_v32, %s6264_s2 }
 0x25d   :  { %v995_v16 = vmul.f32 %v5852_v35, %v6473_v62  ;;  %v972_v48 = vpop.xlane.xlu2 %971  ;;  %v1551_v62 = vunpack.c.l.b16 %v6528_v9 }
 0x25e   :  { %5853 = vrcp.f32 %v972_v48 }
 0x25f   :  { %v1003_v0 = vpack.c.bf16 %v995_v16, %v995_v16  ;;  %v6577_v7 = vpack.c.b16 %v1551_v62, %v1551_v62 }
 0x261   :  { %5407 = vmatmul.msk.bf16.vlgmr.msrb.gmra.mxu2 %vm912_vm1, %v1003_v0 }
 0x264   :  { %v5854_v60 = vpop.eup %5853  ;;  %1177 = vrot.lane.b32.xlu0 %v6568_v1, %s6264_s2 }
 0x265   :  { %v996_v26 = vmul.f32 %v5854_v60, %v6477_v61  ;;  %v1241_v8 = vpop.permute.xlu2 %1240 }
 0x266   :  { %v1246_v10 = vsel %vm759_vm0, %v1241_v8, 0 }
 0x267   :  { %v1004_v20 = vpack.c.bf16 %v996_v26, %v996_v26  ;;  %1255 = vmatpush.bf16.xpose.msrb.mxu2 %v1246_v10 }
 0x269   :  { %5408 = vmatmul.msk.bf16.vlgmr.msrb.gmra.mxu3 %vm912_vm1, %v1004_v20 }
 0x26a   :  { %1284 = vmatpush.bf16.xpose.msrb.mxu3 %v1275_v36  ;;  %v1209_v36 = vunpack.c.l.b16 %v6365_v39 }
 0x26c   :  { %1553 = vrot.lane.b32.xlu0 %v6577_v7, %s6264_s2 }
 0x26d   :  { %v1357_v9 = vpop.permute.xlu2 %1356 }
 0x26e   :  { %v1362_v24 = vsel %vm759_vm0, %v1357_v9, 0  ;;  %v1325_v9 = vunpack.c.l.b16 %v6404_v28 }
 0x270   :  { %v6629_v39 = vpack.c.b16 %v1325_v9, %v1325_v9  ;;  %v1671_v9 = vunpack.c.l.b16 %v6544_v14 }
 0x275   :  { %v981_v61 = vpop.xlane.xlu0 %980  ;;  %v1352_v38 = vpop.permute.xlu2 %1351 }
 0x276   :  { %5855 = vrcp.f32 %v981_v61  ;;  %v1204_v61 = vunpack.c.l.b16 %v6375_v52 }
 0x27c   :  { %v5856_v17 = vpop.eup %5855 }
 0x27d   :  { %v999_v18 = vmul.f32 %v5856_v17, %v6482_v11  ;;  %v984_v23 = vpop.xlane.xlu1 %983  ;;  %v6618_v17 = vpack.c.b16 %v1209_v36, %v1209_v36  ;;  %v1647_v36 = vunpack.c.l.b16 %v6540_v43 }
 0x27e   :  { %5857 = vrcp.f32 %v984_v23  ;;  %v6624_v23 = vpack.c.b16 %v1204_v61, %v1204_v61 }
 0x27f   :  { %v1007_v63 = vpack.c.bf16 %v999_v18, %v999_v18  ;;  %v6672_v61 = vpack.c.b16 %v1647_v36, %v1647_v36 }
 0x281   :  { %5411 = vmatmul.msk.bf16.vlgmr.msra.gmra.mxu2 %vm912_vm1, %v1007_v63 }
 0x282   :  { %1371 = vmatpush.bf16.xpose.msra.mxu2 %v1362_v24 }
 0x284   :  { %v5858_v25 = vpop.eup %5857 }
 0x285   :  { %v1000_v29 = vmul.f32 %v5858_v25, %v6491_v22  ;;  %v1320_v25 = vunpack.c.l.b16 %v6415_v44 }
 0x287   :  { %v1008_v31 = vpack.c.bf16 %v1000_v29, %v1000_v29  ;;  %v6638_v29 = vpack.c.b16 %v1320_v25, %v1320_v25  ;;  %v6679_v25 = vpack.c.b16 %v1671_v9, %v1671_v9 }
 0x288   :  { %v1265_v37 = vpop.permute.xlu0 %1264 }
 0x289   :  { %5412 = vmatmul.msk.bf16.vlgmr.msra.gmra.mxu3 %vm912_vm1, %v1008_v31 }
 0x290   :  { %v1381_v56 = vpop.permute.xlu0 %1380 }
 0x291   :  { %5415 = vmatmul.msk.bf16.vlgmr.msrb.gmra.mxu2 %vm759_vm0, %v1236_v12 }
 0x295   :  { %v1386_v34 = vpop.permute.xlu1 %1385 }
 0x296   :  { %v1391_v11 = vsel %vm759_vm0, %v1386_v34, 0 }
 0x297   :  { %1400 = vmatpush.bf16.xpose.msra.mxu3 %v1391_v11 }
 0x299   :  { %5416 = vmatmul.msk.bf16.vlgmr.msrb.gmra.mxu3 %vm759_vm0, %v1265_v37 }
 0x2a1   :  { %5419 = vmatmul.msk.bf16.vlgmr.msra.gmra.mxu2 %vm759_vm0, %v1352_v38 }
 0x2a9   :  { %5420 = vmatmul.msk.bf16.vlgmr.msra.gmra.mxu3 %vm759_vm0, %v1381_v56 }
 0x2ae   :  { %v918_v45 = vpop.xlane.xlu2 %917 }
 0x2af   :  { %v938_v22 = vsub.f32 %v6437_v4, %v918_v45 }
 0x2b1   :  { %v947_v2 = vmul.f32 1.442695, %v938_v22 }
 0x2b3   :  { %5859 = vpow2.f32 %v947_v2 }
 0x2b6   :  { %v927_v54 = vpop.xlane.xlu2 %926 }
 0x2b7   :  { %v941_v16 = vsub.f32 %v6447_v41, %v927_v54 }
 0x2b9   :  { %v6592_v47 = vpop.eup %5859  ;;  %v953_v4 = vmul.f32 1.442695, %v941_v16 }
 0x2ba   :  { %v964_v53 = vsel %vm912_vm1, %v6592_v47, 0.0 }
 0x2bb   :  { %v930_v55 = vpop.xlane.xlu0 %929  ;;  %965 = vadd.xlane.f32.xlu1 %v964_v53 }
 0x2bc   :  { %v942_v35 = vsub.f32 %v6450_v6, %v930_v55 }
 0x2be   :  { %v955_v48 = vmul.f32 1.442695, %v942_v35 }
 0x2c0   :  { %5861 = vpow2.f32 %v955_v48  ;;  %v915_v49 = vpop.xlane.xlu1 %914 }
 0x2c1   :  { %v937_v0 = vsub.f32 %v6435_v19, %v915_v49 }
 0x2c3   :  { %v945_v60 = vmul.f32 1.442695, %v937_v0 }
 0x2c5   :  { %5863 = vpow2.f32 %v945_v60 }
 0x2c6   :  { %v6599_v26 = vpop.eup %5861  ;;  %5865 = vpow2.f32 %v953_v4 }
 0x2c7   :  { %v976_v8 = vsel %vm912_vm1, %v6599_v26, 0.0 }
 0x2c8   :  { %977 = vadd.xlane.f32.xlu1 %v976_v8 }
 0x2cb   :  { %v6603_v3 = vpop.eup %5863 }
 0x2cc   :  { %v6605_v6 = vpop.eup %5865  ;;  %v961_v41 = vsel %vm912_vm1, %v6603_v3, 0.0 }
 0x2cd   :  { %962 = vadd.xlane.f32.xlu2 %v961_v41  ;;  %v973_v19 = vsel %vm912_vm1, %v6605_v6, 0.0  ;;  %v1296_v41 = vunpack.c.l.b16 %v6393_v13  ;;  %v1291_v13 = vunpack.c.l.b16 %v6402_v27 }
 0x2ce   :  { %v6609_v10 = vpop.permute.xlu0 %1182 }
 0x2cf   :  { %v1188_v27 = vsel %vm759_vm0, %v6609_v10, 0 }
 0x2d0   :  { %974 = vadd.xlane.f32.xlu1 %v973_v19 }
 0x2d6   :  { %v6613_v62 = vpop.permute.xlu0 %1177 }
 0x2de   :  { %v1554_v20 = vpop.permute.xlu0 %1553 }
 0x2df   :  { %v1559_v12 = vsel %vm1020_vm2, %v1554_v20, 0  ;;  %v6667_v20 = vpack.c.b16 %v1296_v41, %v1296_v41 }
 0x2e0   :  { %1568 = vmatpush.bf16.msrb.mxu2 %v1559_v12 }
 0x2e4   :  { %v6620_v18 = vpop.f32.mrf.mxu2 }
 0x2e5   :  { %1211 = vrot.lane.b32.xlu2 %v6618_v17, %s6264_s2 }
 0x2e9   :  { %1206 = vrot.lane.b32.xlu1 %v6624_v23, %s6264_s2 }
 0x2ec   :  { %v1073_v63 = vpop.f32.mrf.mxu2  ;;  %v6631_v24 = vpop.f32.mrf.mxu3 }
 0x2ed   :  { %v1171_v52 = vpack.c.bf16 %v6631_v24, %v6620_v18  ;;  %1327 = vrot.lane.b32.xlu2 %v6629_v39, %s6264_s2 }
 0x2f4   :  { %v1092_v31 = vpop.f32.mrf.mxu3 }
 0x2f5   :  { %1322 = vrot.lane.b32.xlu2 %v6638_v29, %s6264_s2  ;;  %v6683_v31 = vpack.c.b16 %v1291_v13, %v1291_v13 }
 0x304   :  { %v6642_v28 = vpop.f32.mrf.mxu2 }
 0x30c   :  { %v1149_v34 = vpop.f32.mrf.mxu2  ;;  %v6644_v11 = vpop.f32.mrf.mxu3 }
 0x30d   :  { %v1173_v37 = vpack.c.bf16 %v6644_v11, %v6642_v28 }
 0x314   :  { %v1168_v38 = vpop.f32.mrf.mxu3  ;;  %v6648_v56 = vpop.f32.mrf.mxu2 }
 0x315   :  { %v1412_v44 = vsel %vm912_vm1, %v6648_v56, -inf }
 0x316   :  { %1413 = vmax.xlane.f32.xlu0 %v1412_v44 }
 0x31c   :  { %v1259_v45 = vpop.f32.mrf.mxu2  ;;  %v6652_v22 = vpop.f32.mrf.mxu3 }
 0x31d   :  { %v1415_v2 = vsel %vm912_vm1, %v6652_v22, -inf }
 0x31e   :  { %1416 = vmax.xlane.f32.xlu0 %v1415_v2 }
 0x324   :  { %v1288_v53 = vpop.f32.mrf.mxu3  ;;  %v6656_v54 = vpop.f32.mrf.mxu2 }
 0x325   :  { %v1424_v55 = vsel %vm912_vm1, %v6656_v54, -inf }
 0x326   :  { %1425 = vmax.xlane.f32.xlu2 %v1424_v55 }
 0x32c   :  { %v1375_v35 = vpop.f32.mrf.mxu2  ;;  %v6660_v16 = vpop.f32.mrf.mxu3 }
 0x32d   :  { %v1427_v48 = vsel %vm912_vm1, %v6660_v16, -inf }
 0x32e   :  { %v966_v49 = vpop.xlane.xlu1 %965  ;;  %1428 = vmax.xlane.f32.xlu0 %v1427_v48 }
 0x32f   :  { %5867 = vrcp.f32 %v966_v49 }
 0x334   :  { %v1404_v0 = vpop.f32.mrf.mxu3 }
 0x335   :  { %v5868_v4 = vpop.eup %5867 }
 0x336   :  { %v994_v60 = vmul.f32 %v5868_v4, %v6592_v47 }
 0x338   :  { %v1002_v8 = vpack.c.bf16 %v994_v60, %v994_v60 }
 0x33a   :  { %5406 = vmatmul.msk.bf16.vlgmr.msra.gmra.mxu1 %vm912_vm1, %v1002_v8 }
 0x33b   :  { %v978_v19 = vpop.xlane.xlu1 %977 }
 0x33c   :  { %5869 = vrcp.f32 %v978_v19 }
 0x33e   :  { %1298 = vrot.lane.b32.xlu2 %v6667_v20, %s6264_s2 }
 0x340   :  { %v963_v12 = vpop.xlane.xlu2 %962 }
 0x341   :  { %5871 = vrcp.f32 %v963_v12 }
 0x342   :  { %v5870_v47 = vpop.eup %5869  ;;  %1649 = vrot.lane.b32.xlu0 %v6672_v61, %s6264_s2 }
 0x343   :  { %v998_v63 = vmul.f32 %v5870_v47, %v6599_v26  ;;  %v975_v2 = vpop.xlane.xlu1 %974 }
 0x344   :  { %5873 = vrcp.f32 %v975_v2 }
 0x345   :  { %v1006_v34 = vpack.c.bf16 %v998_v63, %v998_v63 }
 0x346   :  { %1673 = vrot.lane.b32.xlu2 %v6679_v25, %s6264_s2 }
 0x347   :  { %v5872_v43 = vpop.eup %5871 }
 0x348   :  { %v993_v14 = vmul.f32 %v5872_v43, %v6603_v3  ;;  %v1212_v38 = vpop.permute.xlu2 %1211 }
 0x349   :  { %v1217_v44 = vsel %vm759_vm0, %v1212_v38, 0 }
 0x34a   :  { %v1001_v45 = vpack.c.bf16 %v993_v14, %v993_v14  ;;  %5410 = vmatmul.msk.bf16.vlgmr.msrb.gmra.mxu1 %vm912_vm1, %v1006_v34  ;;  %1293 = vrot.lane.b32.xlu0 %v6683_v31, %s6264_s2  ;;  %v5874_v53 = vpop.eup %5873 }
 0x34b   :  { %1226 = vmatpush.bf16.xpose.msra.mxu1 %v1217_v44  ;;  %v997_v55 = vmul.f32 %v5874_v53, %v6605_v6 }
 0x34c   :  { %5405 = vmatmul.msk.bf16.vlgmr.msra.gmra.mxu0 %vm912_vm1, %v1001_v45 }
 0x34d   :  { %1197 = vmatpush.bf16.xpose.msra.mxu0 %v1188_v27  ;;  %v1005_v10 = vpack.c.bf16 %v997_v55, %v997_v55 }
 0x34e   :  { %1804 = vrot.lane.b32.xlu2 %v6568_v1, %s6265_s4 }
 0x350   :  { %v1328_v26 = vpop.permute.xlu2 %1327 }
 0x351   :  { %v1333_v3 = vsel %vm759_vm0, %v1328_v26, 0 }
 0x352   :  { %1806 = vrot.lane.b32.xlu0 %v6561_v32, %s6265_s4 }
 0x353   :  { %1342 = vmatpush.bf16.xpose.msrb.mxu1 %v1333_v3 }
 0x356   :  { %1852 = vrot.lane.b32.xlu2 %v6484_v15, %s6265_s4 }
 0x358   :  { %v1323_v48 = vpop.permute.xlu2 %1322 }
 0x35a   :  { %1829 = vrot.lane.b32.xlu0 %v6618_v17, %s6265_s4 }
 0x35b   :  { %v1207_v35 = vpop.permute.xlu1 %1206 }
 0x35c   :  { %5409 = vmatmul.msk.bf16.vlgmr.msrb.gmra.mxu0 %vm912_vm1, %v1005_v10  ;;  %5414 = vmatmul.msk.bf16.vlgmr.msra.gmra.mxu1 %vm759_vm0, %v1207_v35 }
 0x36c   :  { %5413 = vmatmul.msk.bf16.vlgmr.msra.gmra.mxu0 %vm759_vm0, %v6613_v62  ;;  %5418 = vmatmul.msk.bf16.vlgmr.msrb.gmra.mxu1 %vm759_vm0, %v1323_v48 }
 0x389   :  { %v1414_v49 = vpop.xlane.xlu0 %1413 }
 0x38a   :  { %v1432_v6 = vsub.f32 %v6648_v56, %v1414_v49 }
 0x38c   :  { %v1442_v0 = vmul.f32 1.442695, %v1432_v6 }
 0x38e   :  { %5875 = vpow2.f32 %v1442_v0 }
 0x391   :  { %v1417_v4 = vpop.xlane.xlu0 %1416 }
 0x392   :  { %v1433_v60 = vsub.f32 %v6652_v22, %v1417_v4 }
 0x394   :  { %v6710_v8 = vpop.eup %5875  ;;  %v1444_v41 = vmul.f32 1.442695, %v1433_v60 }
 0x395   :  { %v1460_v19 = vsel %vm912_vm1, %v6710_v8, 0.0 }
 0x396   :  { %5877 = vpow2.f32 %v1444_v41  ;;  %1461 = vadd.xlane.f32.xlu1 %v1460_v19 }
 0x399   :  { %v1426_v36 = vpop.xlane.xlu2 %1425 }
 0x39a   :  { %v1436_v62 = vsub.f32 %v6656_v54, %v1426_v36  ;;  %v1575_v54 = vunpack.c.l.b16 %v6530_v5 }
 0x39c   :  { %v6715_v12 = vpop.eup %5877  ;;  %v1450_v9 = vmul.f32 1.442695, %v1436_v62  ;;  %v6725_v34 = vpack.c.b16 %v1575_v54, %v1575_v54 }
 0x39d   :  { %v1463_v56 = vsel %vm912_vm1, %v6715_v12, 0.0 }
 0x39e   :  { %5879 = vpow2.f32 %v1450_v9  ;;  %1464 = vadd.xlane.f32.xlu2 %v1463_v56 }
 0x3a1   :  { %v1299_v22 = vpop.permute.xlu2 %1298  ;;  %v1429_v43 = vpop.xlane.xlu0 %1428 }
 0x3a2   :  { %v1304_v47 = vsel %vm759_vm0, %v1299_v22, 0  ;;  %v1437_v2 = vsub.f32 %v6660_v16, %v1429_v43 }
 0x3a3   :  { %1313 = vmatpush.bf16.xpose.msrb.mxu0 %v1304_v47 }
 0x3a4   :  { %v6720_v13 = vpop.eup %5879  ;;  %v1452_v53 = vmul.f32 1.442695, %v1437_v2 }
 0x3a5   :  { %v1472_v63 = vsel %vm912_vm1, %v6720_v13, 0.0 }
 0x3a6   :  { %1473 = vadd.xlane.f32.xlu0 %v1472_v63  ;;  %5881 = vpow2.f32 %v1452_v53 }
 0x3a9   :  { %v1674_v62 = vpop.permute.xlu2 %1673 }
 0x3ac   :  { %v6756_v16 = vpop.eup %5881 }
 0x3ad   :  { %v1475_v35 = vsel %vm912_vm1, %v6756_v16, 0.0 }
 0x3af   :  { %1577 = vrot.lane.b32.xlu1 %v6725_v34, %s6264_s2 }
 0x3b1   :  { %v1805_v56 = vpop.permute.xlu2 %1804 }
 0x3b4   :  { %v1650_v14 = vpop.permute.xlu0 %1649 }
 0x3b5   :  { %v1655_v38 = vsel %vm1020_vm2, %v1650_v14, 0 }
 0x3b6   :  { %1664 = vmatpush.bf16.msra.mxu2 %v1655_v38  ;;  %1850 = vrot.lane.b32.xlu2 %v6452_v21, %s6265_s4 }
 0x3b7   :  { %v6732_v44 = vpop.f32.mrf.mxu1 }
 0x3b9   :  { %v1853_v54 = vpop.permute.xlu2 %1852 }
 0x3ba   :  { %1827 = vrot.lane.b32.xlu0 %v6624_v23, %s6265_s4 }
 0x3bc   :  { %v1294_v45 = vpop.permute.xlu0 %1293 }
 0x3bd   :  { %5417 = vmatmul.msk.bf16.vlgmr.msrb.gmra.mxu0 %vm759_vm0, %v1294_v45 }
 0x3be   :  { %1873 = vrot.lane.b32.xlu2 %v6505_v33, %s6265_s4 }
 0x3bf   :  { %v1054_v5 = vpop.f32.mrf.mxu1 }
 0x3c2   :  { %1875 = vrot.lane.b32.xlu0 %v6463_v59, %s6265_s4 }
 0x3c4   :  { %v1807_v47 = vpop.permute.xlu0 %1806 }
 0x3c5   :  { %v1812_v2 = vsel %vm759_vm0, %v1807_v47, 0  ;;  %v1858_v47 = vsel %vm759_vm0, %v1853_v54, 0 }
 0x3c6   :  { %1921 = vrot.lane.b32.xlu2 %v6629_v39, %s6265_s4 }
 0x3c7   :  { %v6744_v27 = vpop.f32.mrf.mxu1 }
 0x3c9   :  { %v6746_v26 = vpop.f32.mrf.mxu0 }
 0x3ca   :  { %v1170_v3 = vpack.c.bf16 %v6732_v44, %v6746_v26  ;;  %1896 = vrot.lane.b32.xlu0 %v6683_v31, %s6265_s4 }
 0x3cc   :  { %v1830_v14 = vpop.permute.xlu0 %1829 }
 0x3ce   :  { %1919 = vrot.lane.b32.xlu2 %v6638_v29, %s6265_s4 }
 0x3cf   :  { %v1130_v55 = vpop.f32.mrf.mxu1 }
 0x3d1   :  { %v1035_v10 = vpop.f32.mrf.mxu0 }
 0x3d2   :  { %1944 = vrot.lane.b32.xlu0 %v6493_v51, %s6265_s4 }
 0x3d6   :  { %1965 = vrot.lane.b32.xlu2 %v6510_v40, %s6265_s4 }
 0x3d9   :  { %v6762_v48 = vpop.f32.mrf.mxu0  ;;  %v6764_v49 = vpop.f32.mrf.mxu1  ;;  %1476 = vadd.xlane.f32.xlu1 %v1475_v35 }
 0x3da   :  { %v1172_v6 = vpack.c.bf16 %v6744_v27, %v6762_v48  ;;  %1942 = vrot.lane.b32.xlu0 %v6501_v30, %s6265_s4  ;;  %v1409_v22 = vsel %vm912_vm1, %v6764_v49, -inf }
 0x3e1   :  { %v1111_v0 = vpop.f32.mrf.mxu0  ;;  %v1230_v4 = vpop.f32.mrf.mxu1 }
 0x3e9   :  { %v6770_v60 = vpop.f32.mrf.mxu0  ;;  %v6772_v41 = vpop.f32.mrf.mxu1 }
 0x3ea   :  { %v1421_v9 = vsel %vm912_vm1, %v6772_v41, -inf }
 0x3f1   :  { %v1201_v19 = vpop.f32.mrf.mxu0  ;;  %v1346_v36 = vpop.f32.mrf.mxu1 }
 0x3f2   :  { %1898 = vrot.lane.b32.xlu1 %v6667_v20, %s6265_s4 }
 0x3fa   :  { %1967 = vrot.lane.b32.xlu1 %v6515_v42, %s6265_s4 }
 0x3ff   :  { %1422 = vmax.xlane.f32.xlu2 %v1421_v9  ;;  %v1406_v9 = vsel %vm912_vm1, %v6770_v60, -inf }
 0x404   :  { %1410 = vmax.xlane.f32.xlu0 %v1409_v22 }
 0x409   :  { %v1462_v63 = vpop.xlane.xlu1 %1461 }
 0x40a   :  { %5883 = vrcp.f32 %v1462_v63 }
 0x410   :  { %v5884_v43 = vpop.eup %5883 }
 0x411   :  { %v1488_v38 = vmul.f32 %v5884_v43, %v6710_v8  ;;  %v1465_v5 = vpop.xlane.xlu2 %1464  ;;  %v1679_v8 = vsel %vm1020_vm2, %v1674_v62, 0 }
 0x412   :  { %5885 = vrcp.f32 %v1465_v5 }
 0x413   :  { %v1496_v45 = vpack.c.bf16 %v1488_v38, %v1488_v38 }
 0x415   :  { %5423 = vmatmul.msk.bf16.vlgmr.msrb.gmra.mxu2 %vm912_vm1, %v1496_v45 }
 0x416   :  { %1821 = vmatpush.bf16.xpose.msrb.mxu2 %v1812_v2 }
 0x418   :  { %v5886_v55 = vpop.eup %5885 }
 0x419   :  { %v1474_v53 = vpop.xlane.xlu0 %1473  ;;  %v1489_v35 = vmul.f32 %v5886_v55, %v6715_v12  ;;  %v1835_v12 = vsel %vm759_vm0, %v1830_v14, 0  ;;  %v1851_v14 = vpop.permute.xlu2 %1850 }
 0x41a   :  { %5887 = vrcp.f32 %v1474_v53 }
 0x41b   :  { %v1497_v22 = vpack.c.bf16 %v1489_v35, %v1489_v35 }
 0x420   :  { %v5888_v10 = vpop.eup %5887 }
 0x421   :  { %v1492_v0 = vmul.f32 %v5888_v10, %v6720_v13  ;;  %v1578_v4 = vpop.permute.xlu1 %1577  ;;  %v1527_v13 = vunpack.c.l.b16 %v6522_v57  ;;  %v1874_v57 = vpop.permute.xlu2 %1873 }
 0x422   :  { %v1583_v19 = vsel %vm1020_vm2, %v1578_v4, 0 }
 0x423   :  { %v1500_v36 = vpack.c.bf16 %v1492_v0, %v1492_v0  ;;  %1592 = vmatpush.bf16.msrb.mxu3 %v1583_v19  ;;  %v6801_v43 = vpack.c.b16 %v1527_v13, %v1527_v13 }
 0x424   :  { %1407 = vmax.xlane.f32.xlu1 %v1406_v9 }
 0x425   :  { %5427 = vmatmul.msk.bf16.vlgmr.msra.gmra.mxu2 %vm912_vm1, %v1500_v36 }
 0x426   :  { %1867 = vmatpush.bf16.xpose.msra.mxu2 %v1858_v47  ;;  %5424 = vmatmul.msk.bf16.vlgmr.msrb.gmra.mxu3 %vm912_vm1, %v1497_v22 }
 0x427   :  { %1688 = vmatpush.bf16.msra.mxu3 %v1679_v8 }
 0x429   :  { %v1922_v35 = vpop.permute.xlu2 %1921 }
 0x42a   :  { %v1927_v9 = vsel %vm759_vm0, %v1922_v35, 0 }
 0x42b   :  { %1844 = vmatpush.bf16.xpose.msrb.mxu3 %v1835_v12 }
 0x42c   :  { %v1828_v38 = vpop.permute.xlu0 %1827 }
 0x431   :  { %v1920_v19 = vpop.permute.xlu2 %1919 }
 0x435   :  { %5453 = vmatmul.msk.bf16.vlgmr.msrb.gmra.mxu2 %vm759_vm0, %v1805_v56  ;;  %v1876_v56 = vpop.permute.xlu0 %1875 }
 0x436   :  { %v1881_v55 = vsel %vm759_vm0, %v1876_v56, 0 }
 0x43a   :  { %v6797_v62 = vpop.f32.mrf.mxu0 }
 0x43b   :  { %v1418_v63 = vsel %vm912_vm1, %v6797_v62, -inf }
 0x43c   :  { %1419 = vmax.xlane.f32.xlu0 %v1418_v63 }
 0x43d   :  { %1529 = vrot.lane.b32.xlu1 %v6801_v43, %s6264_s2  ;;  %v1897_v10 = vpop.permute.xlu0 %1896 }
 0x442   :  { %v1317_v54 = vpop.f32.mrf.mxu0 }
 0x445   :  { %5455 = vmatmul.msk.bf16.vlgmr.msra.gmra.mxu2 %vm759_vm0, %v1851_v14  ;;  %v1945_v0 = vpop.permute.xlu0 %1944 }
 0x446   :  { %v1950_v36 = vsel %vm759_vm0, %v1945_v0, 0 }
 0x44c   :  { %v1477_v45 = vpop.xlane.xlu1 %1476 }
 0x44d   :  { %5889 = vrcp.f32 %v1477_v45  ;;  %v1943_v22 = vpop.permute.xlu0 %1942 }
 0x453   :  { %v5890_v5 = vpop.eup %5889 }
 0x454   :  { %v1493_v2 = vmul.f32 %v5890_v5, %v6756_v16  ;;  %v1966_v16 = vpop.permute.xlu2 %1965 }
 0x456   :  { %v1501_v53 = vpack.c.bf16 %v1493_v2, %v1493_v2 }
 0x458   :  { %5428 = vmatmul.msk.bf16.vlgmr.msra.gmra.mxu3 %vm912_vm1, %v1501_v53 }
 0x459   :  { %1890 = vmatpush.bf16.xpose.msra.mxu3 %v1881_v55 }
 0x464   :  { %v1899_v4 = vpop.permute.xlu1 %1898 }
 0x465   :  { %v1904_v8 = vsel %vm759_vm0, %v1899_v4, 0 }
 0x466   :  { %1913 = vmatpush.bf16.xpose.msrb.mxu2 %v1904_v8 }
 0x468   :  { %5454 = vmatmul.msk.bf16.vlgmr.msrb.gmra.mxu3 %vm759_vm0, %v1828_v38 }
 0x469   :  { %1936 = vmatpush.bf16.xpose.msrb.mxu3 %v1927_v9 }
 0x46c   :  { %v1968_v47 = vpop.permute.xlu1 %1967 }
 0x46d   :  { %5457 = vmatmul.msk.bf16.vlgmr.msrb.gmra.mxu2 %vm759_vm0, %v1897_v10  ;;  %v1973_v63 = vsel %vm759_vm0, %v1968_v47, 0  ;;  %v1623_v10 = vunpack.c.l.b16 %v6552_v50 }
 0x46e   :  { %1959 = vmatpush.bf16.xpose.msra.mxu2 %v1950_v36 }
 0x46f   :  { %v6835_v4 = vpack.c.b16 %v1623_v10, %v1623_v10 }
 0x472   :  { %v1423_v12 = vpop.xlane.xlu2 %1422 }
 0x473   :  { %v1435_v14 = vsub.f32 %v6772_v41, %v1423_v12 }
 0x475   :  { %v1448_v38 = vmul.f32 1.442695, %v1435_v14 }
 0x477   :  { %v1411_v13 = vpop.xlane.xlu0 %1410 }
 0x478   :  { %v1431_v54 = vsub.f32 %v6764_v49, %v1411_v13  ;;  %5456 = vmatmul.msk.bf16.vlgmr.msra.gmra.mxu3 %vm759_vm0, %v1874_v57 }
 0x479   :  { %1982 = vmatpush.bf16.xpose.msra.mxu3 %v1973_v63  ;;  %v1503_v63 = vunpack.c.l.b16 %v6520_v58 }
 0x47a   :  { %v1440_v45 = vmul.f32 1.442695, %v1431_v54 }
 0x47b   :  { %v6854_v54 = vpack.c.b16 %v1503_v63, %v1503_v63 }
 0x47c   :  { %5891 = vpow2.f32 %v1440_v45 }
 0x47d   :  { %5459 = vmatmul.msk.bf16.vlgmr.msra.gmra.mxu2 %vm759_vm0, %v1943_v22  ;;  %5893 = vpow2.f32 %v1448_v38 }
 0x482   :  { %v6819_v56 = vpop.eup %5891 }
 0x483   :  { %v1457_v5 = vsel %vm912_vm1, %v6819_v56, 0.0  ;;  %v6823_v2 = vpop.eup %5893 }
 0x484   :  { %1458 = vadd.xlane.f32.xlu2 %v1457_v5  ;;  %v1469_v49 = vsel %vm912_vm1, %v6823_v2, 0.0  ;;  %v1599_v5 = vunpack.c.l.b16 %v6550_v46 }
 0x488   :  { %5458 = vmatmul.msk.bf16.vlgmr.msrb.gmra.mxu3 %vm759_vm0, %v1920_v19 }
 0x48c   :  { %1470 = vadd.xlane.f32.xlu2 %v1469_v49 }
 0x497   :  { %v1408_v41 = vpop.xlane.xlu1 %1407 }
 0x498   :  { %v1430_v57 = vsub.f32 %v6770_v60, %v1408_v41  ;;  %v6829_v53 = vpop.f32.mrf.mxu2  ;;  %5460 = vmatmul.msk.bf16.vlgmr.msra.gmra.mxu3 %vm759_vm0, %v1966_v16  ;;  %v6875_v41 = vpack.c.b16 %v1599_v5, %v1599_v5  ;;  %v5739_v5 = vld [vmem:[#allocation8 + $0x2c] sm:$0xf0] }
 0x49a   :  { %v1438_v55 = vmul.f32 1.442695, %v1430_v57 }
 0x49c   :  { %5895 = vpow2.f32 %v1438_v55 }
 0x4a0   :  { %v1572_v35 = vpop.f32.mrf.mxu2 }
 0x4a2   :  { %v6833_v0 = vpop.eup %5895 }
 0x4a3   :  { %v1454_v19 = vsel %vm912_vm1, %v6833_v0, 0.0 }
 0x4a4   :  { %1455 = vadd.xlane.f32.xlu0 %v1454_v19  ;;  %1625 = vrot.lane.b32.xlu2 %v6835_v4, %s6264_s2 }
 0x4a8   :  { %v6841_v60 = vpop.f32.mrf.mxu2 }
 0x4a9   :  { %v6843_v8 = vpop.f32.mrf.mxu3 }
 0x4aa   :  { %v1695_v36 = vpack.c.bf16 %v6843_v8, %v6829_v53 }
 0x4ac   :  { %2105 = vrot.lane.b32.xlu2 %v6801_v43, %s6265_s4 }
 0x4af   :  { %v1530_v50 = vpop.permute.xlu1 %1529  ;;  %v1420_v9 = vpop.xlane.xlu0 %1419 }
 0x4b0   :  { %v1535_v16 = vsel %vm1020_vm2, %v1530_v50, 0  ;;  %v1434_v22 = vsub.f32 %v6797_v62, %v1420_v9  ;;  %v1668_v47 = vpop.f32.mrf.mxu2 }
 0x4b1   :  { %1544 = vmatpush.bf16.msra.mxu1 %v1535_v16  ;;  %v1596_v12 = vpop.f32.mrf.mxu3 }
 0x4b2   :  { %v1446_v13 = vmul.f32 1.442695, %v1434_v22 }
 0x4b4   :  { %5897 = vpow2.f32 %v1446_v13  ;;  %2189 = vrot.lane.b32.xlu2 %v6835_v4, %s6265_s4 }
 0x4b8   :  { %1505 = vrot.lane.b32.xlu0 %v6854_v54, %s6264_s2  ;;  %v6858_v14 = vpop.f32.mrf.mxu2 }
 0x4ba   :  { %v6860_v45 = vpop.eup %5897 }
 0x4bb   :  { %v1466_v62 = vsel %vm912_vm1, %v6860_v45, 0.0 }
 0x4bc   :  { %1467 = vadd.xlane.f32.xlu1 %v1466_v62  ;;  %2319 = vrot.lane.b32.xlu2 %v6561_v32, %s6266_s21 }
 0x4c0   :  { %2126 = vrot.lane.b32.xlu0 %v6577_v7, %s6265_s4  ;;  %v1825_v58 = vpop.f32.mrf.mxu2 }
 0x4c1   :  { %v5447_v58 = vld [vmem:[#allocation8 + $0x20] sm:$0xf] }
 0x4c8   :  { %2210 = vrot.lane.b32.xlu0 %v6672_v61, %s6265_s4  ;;  %v6870_v38 = vpop.f32.mrf.mxu2 }
 0x4c9   :  { %v1994_v55 = vsel %vm912_vm1, %v6870_v38, -inf }
 0x4d0   :  { %2231 = vrot.lane.b32.xlu0 %v6679_v25, %s6265_s4  ;;  %v1871_v49 = vpop.f32.mrf.mxu2 }
 0x4d1   :  { %v5448_v49 = vor.u32 %v5739_v5, %v5447_v58 }
 0x4d5   :  { %1601 = vrot.lane.b32.xlu1 %v6875_v41, %s6264_s2 }
 0x4d8   :  { %2342 = vrot.lane.b32.xlu0 %v6618_v17, %s6266_s21 }
 0x4db   :  { %v6881_v32 = vpop.f32.mrf.mxu3 }
 0x4dc   :  { %v1697_v57 = vpack.c.bf16 %v6881_v32, %v6841_v60 }
 0x4dd   :  { %2147 = vrot.lane.b32.xlu1 %v6725_v34, %s6265_s4 }
 0x4e3   :  { %v1692_v46 = vpop.f32.mrf.mxu3 }
 0x4e5   :  { %1995 = vmax.xlane.f32.xlu2 %v1994_v55  ;;  %v5443_v55 = vld [vmem:[#allocation8] sm:$0xf] }
 0x4eb   :  { %v6889_v10 = vpop.f32.mrf.mxu3 }
 0x4ec   :  { %v1991_v63 = vsel %vm912_vm1, %v6889_v10, -inf }
 0x4f0   :  { %v6891_v35 = vpop.f32.mrf.mxu2 }
 0x4f3   :  { %v1848_v19 = vpop.f32.mrf.mxu3 }
 0x4f4   :  { %v5735_v19 = vld [vmem:[#allocation8 + $0xc] sm:$0xf0] }
 0x4f7   :  { %v1459_v50 = vpop.xlane.xlu2 %1458 }
 0x4f8   :  { %5899 = vrcp.f32 %v1459_v50  ;;  %v1917_v17 = vpop.f32.mrf.mxu2 }
 0x4fb   :  { %v6893_v9 = vpop.f32.mrf.mxu3 }
 0x4fc   :  { %v1997_v17 = vsel %vm912_vm1, %v6893_v9, -inf }
 0x4fe   :  { %v5900_v16 = vpop.eup %5899 }
 0x4ff   :  { %v1487_v22 = vmul.f32 %v5900_v16, %v6819_v56  ;;  %v1471_v47 = vpop.xlane.xlu2 %1470 }
 0x500   :  { %v6896_v12 = vpop.f32.mrf.mxu2  ;;  %5901 = vrcp.f32 %v1471_v47 }
 0x501   :  { %v1495_v13 = vpack.c.bf16 %v1487_v22, %v1487_v22  ;;  %v5444_v22 = vor.u32 %v5735_v19, %v5443_v55  ;;  %v2006_v5 = vsel %vm912_vm1, %v6896_v12, -inf }
 0x502   :  { %1992 = vmax.xlane.f32.xlu0 %v1991_v63 }
 0x503   :  { %5422 = vmatmul.msk.bf16.vlgmr.msra.gmra.mxu1 %vm912_vm1, %v1495_v13  ;;  %v1894_v62 = vpop.f32.mrf.mxu3 }
 0x506   :  { %v5902_v16 = vpop.eup %5901 }
 0x507   :  { %v1626_v46 = vpop.permute.xlu2 %1625  ;;  %v1491_v63 = vmul.f32 %v5902_v16, %v6823_v2 }
 0x508   :  { %v1631_v56 = vsel %vm1020_vm2, %v1626_v46, 0  ;;  %v1963_v50 = vpop.f32.mrf.mxu2 }
 0x509   :  { %1640 = vmatpush.bf16.msrb.mxu1 %v1631_v56  ;;  %v1499_v58 = vpack.c.bf16 %v1491_v63, %v1491_v63 }
 0x50a   :  { %1998 = vmax.xlane.f32.xlu0 %v1997_v17 }
 0x50b   :  { %v6904_v13 = vpop.f32.mrf.mxu3 }
 0x50c   :  { %v2003_v47 = vsel %vm912_vm1, %v6904_v13, -inf }
 0x50d   :  { %1781 = vmatpush.bf16.msra.mxu1 %v5448_v49  ;;  %2004 = vmax.xlane.f32.xlu2 %v2003_v47 }
 0x50f   :  { %v2106_v62 = vpop.permute.xlu2 %2105 }
 0x510   :  { %v2111_v46 = vsel %vm1020_vm2, %v2106_v62, 0 }
 0x511   :  { %1782 = vmatpush.bf16.msra.mxu1 %v5444_v22 }
 0x512   :  { %2007 = vmax.xlane.f32.xlu0 %v2006_v5 }
 0x513   :  { %5426 = vmatmul.msk.bf16.vlgmr.msrb.gmra.mxu1 %vm912_vm1, %v1499_v58  ;;  %v1940_v49 = vpop.f32.mrf.mxu3 }
 0x515   :  { %2120 = vmatpush.bf16.msrb.mxu1 %v2111_v46 }
 0x517   :  { %v1456_v2 = vpop.xlane.xlu0 %1455  ;;  %v2190_v56 = vpop.permute.xlu2 %2189 }
 0x518   :  { %5903 = vrcp.f32 %v1456_v2  ;;  %v2195_v50 = vsel %vm1020_vm2, %v2190_v56, 0 }
 0x51b   :  { %v6913_v55 = vpop.f32.mrf.mxu3 }
 0x51c   :  { %v2009_v19 = vsel %vm912_vm1, %v6913_v55, -inf }
 0x51d   :  { %2010 = vmax.xlane.f32.xlu2 %v2009_v19 }
 0x51e   :  { %v5904_v16 = vpop.eup %5903 }
 0x51f   :  { %v1486_v22 = vmul.f32 %v5904_v16, %v6833_v0  ;;  %v6942_v49 = vpop.permute.xlu2 %2319 }
 0x521   :  { %v1494_v62 = vpack.c.bf16 %v1486_v22, %v1486_v22 }
 0x523   :  { %5449 = vmatmul.msk.bf16.vlgmr.msra.gmra.mxu1 %vm759_vm0, %v1170_v3  ;;  %v1986_v17 = vpop.f32.mrf.mxu3 }
 0x524   :  { %2204 = vmatpush.bf16.msra.mxu1 %v2195_v50 }
 0x526   :  { %2340 = vrot.lane.b32.xlu0 %v6624_v23, %s6266_s21 }
 0x52a   :  { %v1506_v47 = vpop.permute.xlu0 %1505 }
 0x52b   :  { %v1511_v63 = vsel %vm1020_vm2, %v1506_v47, 0 }
 0x52c   :  { %1520 = vmatpush.bf16.msra.mxu0 %v1511_v63 }
 0x52f   :  { %5421 = vmatmul.msk.bf16.vlgmr.msra.gmra.mxu0 %vm912_vm1, %v1494_v62  ;;  %v1468_v23 = vpop.xlane.xlu1 %1467 }
 0x530   :  { %5905 = vrcp.f32 %v1468_v23 }
 0x532   :  { %v2127_v58 = vpop.permute.xlu0 %2126 }
 0x533   :  { %v2132_v44 = vsel %vm1020_vm2, %v2127_v58, 0  ;;  %5450 = vmatmul.msk.bf16.gmra.mxu1 %vm759_vm0, %v1171_v52 }
 0x534   :  { %2141 = vmatpush.bf16.msrb.mxu2 %v2132_v44 }
 0x535   :  { %2317 = vrot.lane.b32.xlu2 %v6568_v1, %s6266_s21 }
 0x536   :  { %v5906_v0 = vpop.eup %5905 }
 0x537   :  { %v1490_v18 = vmul.f32 %v5906_v0, %v6860_v45 }
 0x539   :  { %v1498_v5 = vpack.c.bf16 %v1490_v18, %v1490_v18 }
 0x53a   :  { %v2211_v26 = vpop.permute.xlu0 %2210 }
 0x53b   :  { %v2216_v3 = vsel %vm1020_vm2, %v2211_v26, 0  ;;  %v5435_v26 = vld [vmem:[#allocation8 + $0x60] sm:$0xf] }
 0x53c   :  { %2225 = vmatpush.bf16.msra.mxu2 %v2216_v3  ;;  %v5747_v3 = vld [vmem:[#allocation8 + $0x6c] sm:$0xf0] }
 0x542   :  { %v2232_v1 = vpop.permute.xlu0 %2231 }
 0x543   :  { %5451 = vmatmul.msk.bf16.gmra.mxu1 %vm759_vm0, %v1172_v6  ;;  %v2237_v2 = vsel %vm1020_vm2, %v2232_v1, 0 }
 0x547   :  { %v1602_v24 = vpop.permute.xlu1 %1601 }
 0x548   :  { %v1607_v52 = vsel %vm1020_vm2, %v1602_v24, 0 }
 0x549   :  { %1616 = vmatpush.bf16.msrb.mxu0 %v1607_v52  ;;  %v5431_v52 = vld [vmem:[#allocation8 + $0x40] sm:$0xf] }
 0x54a   :  { %v6955_v50 = vpop.permute.xlu0 %2342 }
 0x54c   :  { %5425 = vmatmul.msk.bf16.vlgmr.msrb.gmra.mxu0 %vm912_vm1, %v1498_v5  ;;  %v5743_v5 = vld [vmem:[#allocation8 + $0x4c] sm:$0xf0] }
 0x54f   :  { %v2148_v46 = vpop.permute.xlu1 %2147 }
 0x550   :  { %v2153_v19 = vsel %vm1020_vm2, %v2148_v46, 0  ;;  %v5432_v46 = vor.u32 %v5743_v5, %v5431_v52 }
 0x551   :  { %2162 = vmatpush.bf16.msrb.mxu3 %v2153_v19 }
 0x553   :  { %5452 = vmatmul.msk.bf16.gmra.mxu1 %vm759_vm0, %v1173_v37 }
 0x555   :  { %2246 = vmatpush.bf16.msra.mxu3 %v2237_v2 }
 0x558   :  { %v1996_v27 = vpop.xlane.xlu2 %1995 }
 0x559   :  { %v2014_v48 = vsub.f32 %v6870_v38, %v1996_v27 }
 0x55b   :  { %v2024_v6 = vmul.f32 1.442695, %v2014_v48 }
 0x55d   :  { %5907 = vpow2.f32 %v2024_v6 }
 0x563   :  { %v6951_v45 = vpop.eup %5907 }
 0x564   :  { %v2042_v56 = vsel %vm912_vm1, %v6951_v45, 0.0 }
 0x565   :  { %2043 = vadd.xlane.f32.xlu1 %v2042_v56 }
 0x575   :  { %v1993_v17 = vpop.xlane.xlu0 %1992 }
 0x576   :  { %v2013_v16 = vsub.f32 %v6889_v10, %v1993_v17 }
 0x578   :  { %v2022_v22 = vmul.f32 1.442695, %v2013_v16 }
 0x57a   :  { %5909 = vpow2.f32 %v2022_v22  ;;  %v2348_v22 = vsel %vm759_vm0, %v6955_v50, 0 }
 0x57d   :  { %v1999_v28 = vpop.xlane.xlu0 %1998 }
 0x57e   :  { %v2015_v11 = vsub.f32 %v6893_v9, %v1999_v28  ;;  %v5436_v9 = vor.u32 %v5747_v3, %v5435_v26 }
 0x580   :  { %v6959_v37 = vpop.eup %5909  ;;  %v2026_v38 = vmul.f32 1.442695, %v2015_v11  ;;  %v1546_v47 = vpop.f32.mrf.mxu1  ;;  %1728 = vmatpush.bf16.msra.mxu0 %v5436_v9 }
 0x581   :  { %v2005_v63 = vpop.xlane.xlu2 %2004  ;;  %v2039_v58 = vsel %vm912_vm1, %v6959_v37, 0.0 }
 0x582   :  { %v2017_v62 = vsub.f32 %v6904_v13, %v2005_v63  ;;  %5911 = vpow2.f32 %v2026_v38  ;;  %2040 = vadd.xlane.f32.xlu0 %v2039_v58 }
 0x584   :  { %v2030_v44 = vmul.f32 1.442695, %v2017_v62  ;;  %1729 = vmatpush.bf16.msra.mxu0 %v5432_v46 }
 0x585   :  { %v2008_v10 = vpop.xlane.xlu0 %2007 }
 0x586   :  { %5913 = vpow2.f32 %v2030_v44  ;;  %v2018_v23 = vsub.f32 %v6896_v12, %v2008_v10 }
 0x588   :  { %v6965_v0 = vpop.eup %5911  ;;  %v2032_v18 = vmul.f32 1.442695, %v2018_v23  ;;  %v1548_v24 = vpop.f32.mrf.mxu1 }
 0x589   :  { %v2045_v13 = vsel %vm912_vm1, %v6965_v0, 0.0 }
 0x58a   :  { %5915 = vpow2.f32 %v2032_v18  ;;  %2046 = vadd.xlane.f32.xlu0 %v2045_v13 }
 0x58c   :  { %v6969_v1 = vpop.eup %5913 }
 0x58d   :  { %v2051_v12 = vsel %vm912_vm1, %v6969_v1, 0.0 }
 0x58e   :  { %2052 = vadd.xlane.f32.xlu2 %v2051_v12 }
 0x590   :  { %v6973_v19 = vpop.eup %5915  ;;  %v1642_v2 = vpop.f32.mrf.mxu1 }
 0x591   :  { %v2054_v27 = vsel %vm912_vm1, %v6973_v19, 0.0 }
 0x592   :  { %2055 = vadd.xlane.f32.xlu1 %v2054_v27 }
 0x598   :  { %v1644_v48 = vpop.f32.mrf.mxu1  ;;  %v2341_v28 = vpop.permute.xlu0 %2340 }
 0x59e   :  { %2388 = vrot.lane.b32.xlu0 %v6463_v59, %s6266_s21 }
 0x5a0   :  { %v7043_v52 = vpop.f32.mrf.mxu1 }
 0x5a6   :  { %2365 = vrot.lane.b32.xlu2 %v6484_v15, %s6266_s21  ;;  %2386 = vrot.lane.b32.xlu0 %v6505_v33, %s6266_s21 }
 0x5a8   :  { %v7047_v12 = vpop.f32.mrf.mxu1 }
 0x5ab   :  { %2363 = vrot.lane.b32.xlu1 %v6452_v21, %s6266_s21  ;;  %v2011_v21 = vpop.xlane.xlu2 %2010 }
 0x5ac   :  { %v1522_v6 = vpop.f32.mrf.mxu0  ;;  %v2019_v59 = vsub.f32 %v6913_v55, %v2011_v21 }
 0x5ad   :  { %v1694_v56 = vpack.c.bf16 %v1546_v47, %v1522_v6 }
 0x5ae   :  { %2411 = vrot.lane.b32.xlu0 %v6667_v20, %s6266_s21  ;;  %v2034_v15 = vmul.f32 1.442695, %v2019_v59 }
 0x5af   :  { %5437 = vmatmul.msk.bf16.vlgmr.msra.gmra.mxu0 %vm759_vm0, %v1694_v56 }
 0x5b0   :  { %5917 = vpow2.f32 %v2034_v15  ;;  %v7051_v6 = vpop.f32.mrf.mxu1 }
 0x5b3   :  { %v2318_v60 = vpop.permute.xlu2 %2317 }
 0x5b4   :  { %v1524_v17 = vpop.f32.mrf.mxu0 }
 0x5b6   :  { %2434 = vrot.lane.b32.xlu0 %v6629_v39, %s6266_s21  ;;  %v1988_v39 = vsel %vm912_vm1, %v6858_v14, -inf }
 0x5be   :  { %2432 = vrot.lane.b32.xlu0 %v6638_v29, %s6266_s21  ;;  %v7004_v29 = vpop.eup %5917 }
 0x5bf   :  { %5438 = vmatmul.msk.bf16.gmra.mxu0 %vm759_vm0, %v1695_v36  ;;  %v2057_v8 = vsel %vm912_vm1, %v7004_v29, 0.0 }
 0x5c6   :  { %2457 = vrot.lane.b32.xlu0 %v6493_v51, %s6266_s21  ;;  %v2000_v51 = vsel %vm912_vm1, %v6891_v35, -inf }
 0x5c9   :  { %v1618_v33 = vpop.f32.mrf.mxu0 }
 0x5ca   :  { %v1696_v20 = vpack.c.bf16 %v1642_v2, %v1618_v33 }
 0x5ce   :  { %2455 = vrot.lane.b32.xlu0 %v6501_v30, %s6266_s21 }
 0x5cf   :  { %1989 = vmax.xlane.f32.xlu2 %v1988_v39  ;;  %5439 = vmatmul.msk.bf16.gmra.mxu0 %vm759_vm0, %v1696_v20  ;;  %v7058_v39 = vpop.f32.mrf.mxu1 }
 0x5d1   :  { %v1620_v53 = vpop.f32.mrf.mxu0 }
 0x5d5   :  { %2058 = vadd.xlane.f32.xlu1 %v2057_v8 }
 0x5d7   :  { %2001 = vmax.xlane.f32.xlu2 %v2000_v51 }
 0x5d8   :  { %v2044_v36 = vpop.xlane.xlu1 %2043 }
 0x5d9   :  { %5919 = vrcp.f32 %v2044_v36 }
 0x5df   :  { %v5920_v55 = vpop.eup %5919  ;;  %5440 = vmatmul.msk.bf16.gmra.mxu0 %vm759_vm0, %v1697_v57 }
 0x5e0   :  { %v2070_v30 = vmul.f32 %v5920_v55, %v6951_v45 }
 0x5e2   :  { %v2078_v16 = vpack.c.bf16 %v2070_v30, %v2070_v30 }
 0x5e4   :  { %5463 = vmatmul.msk.bf16.vlgmr.msrb.gmra.mxu2 %vm912_vm1, %v2078_v16  ;;  %v7065_v16 = vpop.f32.mrf.mxu1 }
 0x5e5   :  { %2357 = vmatpush.bf16.xpose.msrb.mxu2 %v2348_v22 }
 0x5ee   :  { %2409 = vrot.lane.b32.xlu1 %v6683_v31, %s6266_s21  ;;  %v2325_v31 = vsel %vm759_vm0, %v6942_v49, 0 }
 0x5ef   :  { %2084 = vrot.lane.b32.xlu2 %v6854_v54, %s6265_s4 }
 0x5f5   :  { %v2041_v11 = vpop.xlane.xlu0 %2040 }
 0x5f6   :  { %5921 = vrcp.f32 %v2041_v11  ;;  %2480 = vrot.lane.b32.xlu1 %v6515_v42, %s6266_s21  ;;  %v7069_v11 = vpop.f32.mrf.mxu1 }
 0x5f7   :  { %2168 = vrot.lane.b32.xlu2 %v6875_v41, %s6265_s4 }
 0x5fc   :  { %v5922_v32 = vpop.eup %5921 }
 0x5fd   :  { %v2069_v57 = vmul.f32 %v5922_v32, %v6959_v37  ;;  %v2047_v45 = vpop.xlane.xlu0 %2046 }
 0x5fe   :  { %5923 = vrcp.f32 %v2047_v45  ;;  %2478 = vrot.lane.b32.xlu1 %v6510_v40, %s6266_s21  ;;  %v7075_v45 = vpop.f32.mrf.mxu1 }
 0x5ff   :  { %v2077_v50 = vpack.c.bf16 %v2069_v57, %v2069_v57 }
 0x601   :  { %v2053_v38 = vpop.xlane.xlu2 %2052  ;;  %5462 = vmatmul.msk.bf16.vlgmr.msrb.gmra.mxu1 %vm912_vm1, %v2077_v50 }
 0x602   :  { %5925 = vrcp.f32 %v2053_v38  ;;  %2334 = vmatpush.bf16.xpose.msrb.mxu1 %v2325_v31 }
 0x604   :  { %v5924_v47 = vpop.eup %5923 }
 0x605   :  { %v2071_v42 = vmul.f32 %v5924_v47, %v6965_v0  ;;  %v2056_v63 = vpop.xlane.xlu1 %2055 }
 0x606   :  { %5927 = vrcp.f32 %v2056_v63  ;;  %v7079_v31 = vpop.f32.mrf.mxu1 }
 0x607   :  { %v2079_v37 = vpack.c.bf16 %v2071_v42, %v2071_v42 }
 0x608   :  { %v5926_v62 = vpop.eup %5925 }
 0x609   :  { %v2366_v58 = vpop.permute.xlu2 %2365  ;;  %5464 = vmatmul.msk.bf16.vlgmr.msrb.gmra.mxu3 %vm912_vm1, %v2079_v37  ;;  %v2073_v40 = vmul.f32 %v5926_v62, %v6969_v1 }
 0x60a   :  { %v2371_v44 = vsel %vm759_vm0, %v2366_v58, 0 }
 0x60b   :  { %2380 = vmatpush.bf16.xpose.msrb.mxu3 %v2371_v44  ;;  %v2081_v23 = vpack.c.bf16 %v2073_v40, %v2073_v40 }
 0x60c   :  { %v5928_v49 = vpop.eup %5927 }
 0x60d   :  { %v2074_v10 = vmul.f32 %v5928_v49, %v6973_v19 }
 0x60f   :  { %v2082_v26 = vpack.c.bf16 %v2074_v10, %v2074_v10 }
 0x610   :  { %v2389_v3 = vpop.permute.xlu0 %2388 }
 0x611   :  { %v2394_v9 = vsel %vm759_vm0, %v2389_v3, 0  ;;  %5466 = vmatmul.msk.bf16.vlgmr.msra.gmra.mxu1 %vm912_vm1, %v2081_v23  ;;  %5467 = vmatmul.msk.bf16.vlgmr.msra.gmra.mxu2 %vm912_vm1, %v2082_v26 }
 0x612   :  { %2403 = vmatpush.bf16.xpose.msra.mxu1 %v2394_v9 }
 0x618   :  { %v2387_v0 = vpop.permute.xlu0 %2386 }
 0x61d   :  { %v2364_v19 = vpop.permute.xlu1 %2363 }
 0x620   :  { %v2412_v18 = vpop.permute.xlu0 %2411 }
 0x621   :  { %v2417_v24 = vsel %vm759_vm0, %v2412_v18, 0  ;;  %5481 = vmatmul.msk.bf16.vlgmr.msrb.gmra.mxu1 %vm759_vm0, %v2318_v60  ;;  %5482 = vmatmul.msk.bf16.vlgmr.msrb.gmra.mxu2 %vm759_vm0, %v2341_v28 }
 0x622   :  { %2426 = vmatpush.bf16.xpose.msra.mxu2 %v2417_v24 }
 0x628   :  { %v2435_v13 = vpop.permute.xlu0 %2434 }
 0x630   :  { %v2433_v5 = vpop.permute.xlu0 %2432 }
 0x631   :  { %5484 = vmatmul.msk.bf16.vlgmr.msra.gmra.mxu1 %vm759_vm0, %v2387_v0 }
 0x638   :  { %v2458_v1 = vpop.permute.xlu0 %2457 }
 0x639   :  { %v2463_v46 = vsel %vm759_vm0, %v2458_v1, 0 }
 0x63a   :  { %2472 = vmatpush.bf16.xpose.msrb.mxu1 %v2463_v46 }
 0x640   :  { %v2456_v2 = vpop.permute.xlu0 %2455 }
 0x641   :  { %5487 = vmatmul.msk.bf16.vlgmr.msrb.gmra.mxu1 %vm759_vm0, %v2456_v2 }
 0x642   :  { %v1990_v27 = vpop.xlane.xlu2 %1989 }
 0x643   :  { %v2012_v48 = vsub.f32 %v6858_v14, %v1990_v27 }
 0x645   :  { %v2020_v56 = vmul.f32 1.442695, %v2012_v48 }
 0x647   :  { %5929 = vpow2.f32 %v2020_v56 }
 0x648   :  { %v2059_v17 = vpop.xlane.xlu1 %2058 }
 0x649   :  { %5931 = vrcp.f32 %v2059_v17 }
 0x64a   :  { %v2002_v21 = vpop.xlane.xlu2 %2001 }
 0x64b   :  { %v2016_v59 = vsub.f32 %v6891_v35, %v2002_v21  ;;  %v2440_v35 = vsel %vm759_vm0, %v2435_v13, 0 }
 0x64d   :  { %v7054_v15 = vpop.eup %5929  ;;  %v2028_v33 = vmul.f32 1.442695, %v2016_v59 }
 0x64e   :  { %v2036_v20 = vsel %vm912_vm1, %v7054_v15, 0.0 }
 0x64f   :  { %5933 = vpow2.f32 %v2028_v33  ;;  %2037 = vadd.xlane.f32.xlu1 %v2036_v20  ;;  %v5932_v14 = vpop.eup %5931 }
 0x650   :  { %v2075_v53 = vmul.f32 %v5932_v14, %v7004_v29 }
 0x652   :  { %v2085_v8 = vpop.permute.xlu2 %2084  ;;  %v2083_v51 = vpack.c.bf16 %v2075_v53, %v2075_v53 }
 0x653   :  { %v2090_v36 = vsel %vm1020_vm2, %v2085_v8, 0 }
 0x654   :  { %2099 = vmatpush.bf16.msrb.mxu0 %v2090_v36  ;;  %5468 = vmatmul.msk.bf16.vlgmr.msra.gmra.mxu3 %vm912_vm1, %v2083_v51 }
 0x655   :  { %v5934_v55 = vpop.eup %5933  ;;  %2449 = vmatpush.bf16.xpose.msra.mxu3 %v2440_v35 }
 0x656   :  { %v2048_v30 = vsel %vm912_vm1, %v5934_v55, 0.0 }
 0x657   :  { %2049 = vadd.xlane.f32.xlu0 %v2048_v30  ;;  %v7132_v30 = vpop.f32.mrf.mxu0 }
 0x65a   :  { %v2169_v22 = vpop.permute.xlu2 %2168 }
 0x65b   :  { %v2174_v28 = vsel %vm1020_vm2, %v2169_v22, 0 }
 0x65c   :  { %2183 = vmatpush.bf16.msra.mxu0 %v2174_v28  ;;  %v5475_v28 = vld [vmem:[#allocation8 + $0xa0] sm:$0xf] }
 0x660   :  { %v2410_v29 = vpop.permute.xlu1 %2409 }
 0x661   :  { %5485 = vmatmul.msk.bf16.vlgmr.msra.gmra.mxu2 %vm759_vm0, %v2410_v29  ;;  %v5755_v29 = vld [vmem:[#allocation8 + $0xac] sm:$0xf0] }
 0x664   :  { %5483 = vmatmul.msk.bf16.vlgmr.msrb.gmra.mxu3 %vm759_vm0, %v2364_v19 }
 0x667   :  { %v7072_v60 = vpop.f32.mrf.mxu2 }
 0x668   :  { %v2481_v32 = vpop.permute.xlu1 %2480 }
 0x669   :  { %v2486_v57 = vsel %vm759_vm0, %v2481_v32, 0 }
 0x66a   :  { %2495 = vmatpush.bf16.xpose.msrb.mxu2 %v2486_v57  ;;  %v5476_v57 = vor.u32 %v5755_v29, %v5475_v28 }
 0x66f   :  { %v2145_v50 = vpop.f32.mrf.mxu2 }
 0x670   :  { %v2479_v38 = vpop.permute.xlu1 %2478 }
 0x671   :  { %5488 = vmatmul.msk.bf16.vlgmr.msrb.gmra.mxu2 %vm759_vm0, %v2479_v38  ;;  %v5471_v38 = vld [vmem:[#allocation8 + $0x80] sm:$0xf] }
 0x674   :  { %5486 = vmatmul.msk.bf16.vlgmr.msra.gmra.mxu3 %vm759_vm0, %v2433_v5 }
 0x67e   :  { %v7081_v47 = vpop.f32.mrf.mxu1 }
 0x686   :  { %v2124_v42 = vpop.f32.mrf.mxu1 }
 0x687   :  { %v5751_v42 = vld [vmem:[#allocation8 + $0x8c] sm:$0xf0] }
 0x68c   :  { %v7083_v63 = vpop.f32.mrf.mxu3 }
 0x68d   :  { %v2253_v37 = vpack.c.bf16 %v7083_v63, %v7072_v60 }
 0x68e   :  { %v7087_v62 = vpop.f32.mrf.mxu1 }
 0x694   :  { %v2166_v58 = vpop.f32.mrf.mxu3  ;;  %v7089_v44 = vpop.f32.mrf.mxu2 }
 0x695   :  { %v5472_v58 = vor.u32 %v5751_v42, %v5471_v38 }
 0x696   :  { %v2208_v40 = vpop.f32.mrf.mxu1 }
 0x697   :  { %v7136_v40 = vpop.f32.mrf.mxu0 }
 0x69c   :  { %v2229_v49 = vpop.f32.mrf.mxu2 }
 0x69e   :  { %v7091_v10 = vpop.f32.mrf.mxu1 }
 0x69f   :  { %v2501_v23 = vsel %vm912_vm1, %v7091_v10, -inf  ;;  %v7140_v49 = vpop.f32.mrf.mxu0 }
 0x6a0   :  { %2502 = vmax.xlane.f32.xlu2 %v2501_v23 }
 0x6a4   :  { %v7095_v26 = vpop.f32.mrf.mxu2 }
 0x6a5   :  { %v2504_v3 = vsel %vm912_vm1, %v7095_v26, -inf }
 0x6a6   :  { %v2338_v9 = vpop.f32.mrf.mxu1  ;;  %2505 = vmax.xlane.f32.xlu1 %v2504_v3 }
 0x6a7   :  { %v7142_v9 = vpop.f32.mrf.mxu0 }
 0x6ac   :  { %v2361_v0 = vpop.f32.mrf.mxu2 }
 0x6ae   :  { %v7099_v18 = vpop.f32.mrf.mxu1 }
 0x6af   :  { %v2510_v24 = vsel %vm912_vm1, %v7099_v18, -inf }
 0x6b0   :  { %2511 = vmax.xlane.f32.xlu1 %v2510_v24 }
 0x6b6   :  { %v2407_v13 = vpop.f32.mrf.mxu1 }
 0x6b8   :  { %2639 = vrot.lane.b32.xlu2 %v6577_v7, %s6266_s21 }
 0x6be   :  { %v7105_v5 = vpop.f32.mrf.mxu1 }
 0x6bf   :  { %v2519_v35 = vsel %vm912_vm1, %v7105_v5, -inf }
 0x6c0   :  { %2681 = vrot.lane.b32.xlu2 %v6875_v41, %s6266_s21 }
 0x6c2   :  { %v2038_v1 = vpop.xlane.xlu1 %2037 }
 0x6c3   :  { %5935 = vrcp.f32 %v2038_v1 }
 0x6c6   :  { %v2476_v46 = vpop.f32.mrf.mxu1 }
 0x6c9   :  { %v5936_v19 = vpop.eup %5935 }
 0x6ca   :  { %v2068_v2 = vmul.f32 %v5936_v19, %v7054_v15  ;;  %v2050_v48 = vpop.xlane.xlu0 %2049 }
 0x6cb   :  { %5937 = vrcp.f32 %v2050_v48 }
 0x6cc   :  { %v2076_v27 = vpack.c.bf16 %v2068_v2, %v2068_v2  ;;  %v7150_v2 = vpop.f32.mrf.mxu0 }
 0x6ce   :  { %5461 = vmatmul.msk.bf16.vlgmr.msrb.gmra.mxu0 %vm912_vm1, %v2076_v27 }
 0x6cf   :  { %2286 = vmatpush.bf16.msrb.mxu0 %v5476_v57 }
 0x6d1   :  { %v5938_v56 = vpop.eup %5937 }
 0x6d2   :  { %v2072_v17 = vmul.f32 %v5938_v56, %v5934_v55 }
 0x6d3   :  { %2287 = vmatpush.bf16.msrb.mxu0 %v5472_v58 }
 0x6d4   :  { %v2080_v59 = vpack.c.bf16 %v2072_v17, %v2072_v17 }
 0x6d7   :  { %v7111_v21 = vpop.f32.mrf.mxu3 }
 0x6d8   :  { %v2255_v7 = vpack.c.bf16 %v7111_v21, %v7089_v44 }
 0x6de   :  { %5465 = vmatmul.msk.bf16.vlgmr.msra.gmra.mxu0 %vm912_vm1, %v2080_v59 }
 0x6df   :  { %v2250_v41 = vpop.f32.mrf.mxu3 }
 0x6e0   :  { %v7159_v41 = vpop.f32.mrf.mxu0 }
 0x6e4   :  { %v7116_v33 = vpop.f32.mrf.mxu2 }
 0x6e5   :  { %v2513_v8 = vsel %vm912_vm1, %v7116_v33, -inf }
 0x6e7   :  { %v7118_v20 = vpop.f32.mrf.mxu3 }
 0x6e8   :  { %v2507_v15 = vsel %vm912_vm1, %v7118_v20, -inf }
 0x6e9   :  { %2508 = vmax.xlane.f32.xlu0 %v2507_v15 }
 0x6ec   :  { %v2430_v14 = vpop.f32.mrf.mxu2 }
 0x6ed   :  { %v7167_v14 = vpop.f32.mrf.mxu0 }
 0x6ef   :  { %v2384_v53 = vpop.f32.mrf.mxu3 }
 0x6f1   :  { %2514 = vmax.xlane.f32.xlu0 %v2513_v8 }
 0x6f4   :  { %v7124_v51 = vpop.f32.mrf.mxu2 }
 0x6f5   :  { %v2522_v50 = vsel %vm912_vm1, %v7124_v51, -inf  ;;  %v7169_v53 = vpop.f32.mrf.mxu0 }
 0x6f7   :  { %v7126_v36 = vpop.f32.mrf.mxu3 }
 0x6f8   :  { %v2516_v55 = vsel %vm912_vm1, %v7126_v36, -inf }
 0x6f9   :  { %2517 = vmax.xlane.f32.xlu1 %v2516_v55  ;;  %2520 = vmax.xlane.f32.xlu0 %v2519_v35 }
 0x6fc   :  { %v2499_v22 = vpop.f32.mrf.mxu2 }
 0x6ff   :  { %v2453_v32 = vpop.f32.mrf.mxu3 }
 0x701   :  { %2523 = vmax.xlane.f32.xlu1 %v2522_v50 }
 0x70d   :  { %2618 = vrot.lane.b32.xlu0 %v6801_v43, %s6266_s21 }
 0x713   :  { %v2503_v23 = vpop.xlane.xlu2 %2502 }
 0x719   :  { %v2506_v3 = vpop.xlane.xlu1 %2505 }
 0x71a   :  { %v2526_v0 = vsub.f32 %v7095_v26, %v2506_v3  ;;  %2597 = vrot.lane.b32.xlu1 %v6854_v54, %s6266_s21  ;;  %v2525_v26 = vsub.f32 %v7091_v10, %v2503_v23 }
 0x71b   :  { %v2640_v24 = vpop.permute.xlu2 %2639 }
 0x71c   :  { %v2535_v13 = vmul.f32 1.442695, %v2526_v0  ;;  %v2645_v1 = vsel %vm1020_vm2, %v2640_v24, 0  ;;  %v2533_v17 = vmul.f32 1.442695, %v2525_v26 }
 0x71d   :  { %2654 = vmatpush.bf16.msra.mxu2 %v2645_v1 }
 0x71e   :  { %5939 = vpow2.f32 %v2535_v13 }
 0x723   :  { %v2682_v46 = vpop.permute.xlu2 %2681  ;;  %v2512_v19 = vpop.xlane.xlu1 %2511 }
 0x724   :  { %v7148_v43 = vpop.eup %5939  ;;  %v2687_v27 = vsel %vm1020_vm2, %v2682_v46, 0  ;;  %v2528_v48 = vsub.f32 %v7099_v18, %v2512_v19 }
 0x725   :  { %2696 = vmatpush.bf16.msra.mxu0 %v2687_v27  ;;  %v2552_v54 = vsel %vm912_vm1, %v7148_v43, 0.0 }
 0x726   :  { %v2539_v56 = vmul.f32 1.442695, %v2528_v48  ;;  %2553 = vadd.xlane.f32.xlu2 %v2552_v54 }
 0x728   :  { %5941 = vpow2.f32 %v2539_v56 }
 0x729   :  { %5943 = vpow2.f32 %v2533_v17 }
 0x72e   :  { %v7157_v59 = vpop.eup %5941 }
 0x72f   :  { %v2558_v15 = vsel %vm912_vm1, %v7157_v59, 0.0  ;;  %v7163_v18 = vpop.eup %5943 }
 0x730   :  { %2559 = vadd.xlane.f32.xlu2 %v2558_v15  ;;  %v2549_v10 = vsel %vm912_vm1, %v7163_v18, 0.0 }
 0x737   :  { %2550 = vadd.xlane.f32.xlu0 %v2549_v10 }
 0x74b   :  { %v2101_v8 = vpop.f32.mrf.mxu0  ;;  %2660 = vrot.lane.b32.xlu0 %v6725_v34, %s6266_s21 }
 0x74c   :  { %v2252_v55 = vpack.c.bf16 %v7081_v47, %v2101_v8 }
 0x74e   :  { %5477 = vmatmul.msk.bf16.vlgmr.msrb.gmra.mxu0 %vm759_vm0, %v2252_v55 }
 0x753   :  { %v2103_v35 = vpop.f32.mrf.mxu0 }
 0x75b   :  { %v2185_v22 = vpop.f32.mrf.mxu0 }
 0x75c   :  { %v2509_v28 = vpop.xlane.xlu0 %2508 }
 0x75d   :  { %v2527_v29 = vsub.f32 %v7118_v20, %v2509_v28  ;;  %v2254_v20 = vpack.c.bf16 %v7087_v62, %v2185_v22  ;;  %v1785_v22 = vadd.f32 %v7043_v52, %v7132_v30 }
 0x75e   :  { %5478 = vmatmul.msk.bf16.gmra.mxu0 %vm759_vm0, %v2253_v37 }
 0x75f   :  { %v2537_v32 = vmul.f32 1.442695, %v2527_v29 }
 0x761   :  { %5945 = vpow2.f32 %v2537_v32  ;;  %v1790_v32 = vadd.f32 %v7051_v6, %v7140_v49  ;;  %v1795_v6 = vadd.f32 %v7065_v16, %v7150_v2  ;;  %v1800_v16 = vadd.f32 %v7075_v45, %v7167_v14  ;;  %v5499_v14 = vld [vmem:[#allocation8 + $0xc0] sm:$0xf] }
 0x763   :  { %v2187_v57 = vpop.f32.mrf.mxu0 }
 0x764   :  { %v2515_v50 = vpop.xlane.xlu0 %2514 }
 0x765   :  { %v2529_v47 = vsub.f32 %v7116_v33, %v2515_v50 }
 0x767   :  { %v7181_v38 = vpop.eup %5945  ;;  %v2541_v34 = vmul.f32 1.442695, %v2529_v47 }
 0x768   :  { %v2555_v42 = vsel %vm912_vm1, %v7181_v38, 0.0 }
 0x769   :  { %5947 = vpow2.f32 %v2541_v34  ;;  %2556 = vadd.xlane.f32.xlu2 %v2555_v42 }
 0x76c   :  { %v2518_v58 = vpop.xlane.xlu1 %2517  ;;  %v2521_v24 = vpop.xlane.xlu0 %2520 }
 0x76d   :  { %v2530_v60 = vsub.f32 %v7126_v36, %v2518_v58  ;;  %v2531_v44 = vsub.f32 %v7105_v5, %v2521_v24 }
 0x76e   :  { %5479 = vmatmul.msk.bf16.gmra.mxu0 %vm759_vm0, %v2254_v20 }
 0x76f   :  { %v7188_v63 = vpop.eup %5947  ;;  %v2543_v37 = vmul.f32 1.442695, %v2530_v60 }
 0x770   :  { %v2561_v33 = vsel %vm912_vm1, %v7188_v63, 0.0 }
 0x771   :  { %5949 = vpow2.f32 %v2543_v37  ;;  %2562 = vadd.xlane.f32.xlu1 %v2561_v33 }
 0x774   :  { %v2524_v23 = vpop.xlane.xlu1 %2523 }
 0x775   :  { %v2532_v3 = vsub.f32 %v7124_v51, %v2524_v23 }
 0x777   :  { %v7193_v0 = vpop.eup %5949  ;;  %v2547_v62 = vmul.f32 1.442695, %v2532_v3 }
 0x778   :  { %v2564_v36 = vsel %vm912_vm1, %v7193_v0, 0.0 }
 0x779   :  { %5951 = vpow2.f32 %v2547_v62  ;;  %2565 = vadd.xlane.f32.xlu0 %v2564_v36 }
 0x77e   :  { %5480 = vmatmul.msk.bf16.gmra.mxu0 %vm759_vm0, %v2255_v7  ;;  %v2545_v7 = vmul.f32 1.442695, %v2531_v44  ;;  %v5763_v44 = vld [vmem:[#allocation8 + $0xec] sm:$0xf0] }
 0x77f   :  { %v7201_v13 = vpop.eup %5951  ;;  %v2619_v1 = vpop.permute.xlu0 %2618 }
 0x780   :  { %v2624_v46 = vsel %vm1020_vm2, %v2619_v1, 0  ;;  %v2570_v51 = vsel %vm912_vm1, %v7201_v13, 0.0 }
 0x781   :  { %2702 = vrot.lane.b32.xlu2 %v6835_v4, %s6266_s21  ;;  %2633 = vmatpush.bf16.msra.mxu1 %v2624_v46 }
 0x782   :  { %2571 = vadd.xlane.f32.xlu1 %v2570_v51 }
 0x78c   :  { %v2598_v19 = vpop.permute.xlu1 %2597 }
 0x78d   :  { %v2603_v27 = vsel %vm1020_vm2, %v2598_v19, 0  ;;  %2723 = vrot.lane.b32.xlu0 %v6672_v61, %s6266_s21 }
 0x78e   :  { %2612 = vmatpush.bf16.msrb.mxu3 %v2603_v27  ;;  %v5503_v27 = vld [vmem:[#allocation8 + $0xe0] sm:$0xf] }
 0x799   :  { %v2554_v21 = vpop.xlane.xlu2 %2553 }
 0x79a   :  { %5953 = vrcp.f32 %v2554_v21  ;;  %v5504_v21 = vor.u32 %v5763_v44, %v5503_v27  ;;  %v5752_v27 = vld [vmem:[#allocation8 + $0x94] sm:$0xf0]  ;;  %v5750_v44 = vld [vmem:[#allocation8 + $0x8c] sm:$0xf] }
 0x79b   :  { %2744 = vrot.lane.b32.xlu1 %v6679_v25, %s6266_s21  ;;  %5955 = vpow2.f32 %v2545_v7 }
 0x79c   :  { %2799 = vmatpush.bf16.msrb.mxu0 %v5504_v21 }
 0x7a0   :  { %v5954_v48 = vpop.eup %5953 }
 0x7a1   :  { %v2582_v4 = vmul.f32 %v5954_v48, %v7148_v43  ;;  %v7216_v54 = vpop.eup %5955 }
 0x7a2   :  { %v2567_v61 = vsel %vm912_vm1, %v7216_v54, 0.0 }
 0x7a3   :  { %v2590_v26 = vpack.c.bf16 %v2582_v4, %v2582_v4  ;;  %v2560_v25 = vpop.xlane.xlu2 %2559  ;;  %v5759_v4 = vld [vmem:[#allocation8 + $0xcc] sm:$0xf0] }
 0x7a5   :  { %5490 = vmatmul.msk.bf16.vlgmr.msra.gmra.mxu1 %vm912_vm1, %v2590_v26  ;;  %v5500_v26 = vor.u32 %v5759_v4, %v5499_v14  ;;  %v5748_v14 = vld [vmem:[#allocation8 + $0x74] sm:$0xf0]  ;;  %v5746_v4 = vld [vmem:[#allocation8 + $0x6c] sm:$0xf] }
 0x7a7   :  { %2800 = vmatpush.bf16.msrb.mxu0 %v5500_v26 }
 0x7aa   :  { %2568 = vadd.xlane.f32.xlu2 %v2567_v61  ;;  %v2551_v5 = vpop.xlane.xlu0 %2550 }
 0x7ab   :  { %5957 = vrcp.f32 %v2551_v5 }
 0x7ac   :  { %5959 = vrcp.f32 %v2560_v25 }
 0x7b1   :  { %v5958_v56 = vpop.eup %5957 }
 0x7b2   :  { %v2581_v17 = vmul.f32 %v5958_v56, %v7163_v18  ;;  %v5960_v43 = vpop.eup %5959 }
 0x7b3   :  { %v2584_v55 = vmul.f32 %v5960_v43, %v7157_v59 }
 0x7b4   :  { %v2589_v15 = vpack.c.bf16 %v2581_v17, %v2581_v17 }
 0x7b5   :  { %v2592_v35 = vpack.c.bf16 %v2584_v55, %v2584_v55 }
 0x7b6   :  { %5489 = vmatmul.msk.bf16.vlgmr.msrb.gmra.mxu3 %vm912_vm1, %v2589_v15 }
 0x7bd   :  { %v2661_v10 = vpop.permute.xlu0 %2660 }
 0x7be   :  { %v2666_v8 = vsel %vm1020_vm2, %v2661_v10, 0 }
 0x7bf   :  { %2675 = vmatpush.bf16.msra.mxu3 %v2666_v8 }
 0x7c6   :  { %5492 = vmatmul.msk.bf16.vlgmr.msra.gmra.mxu3 %vm912_vm1, %v2592_v35 }
 0x7cb   :  { %v2289_v28 = vpop.f32.mrf.mxu0 }
 0x7cc   :  { %v7227_v18 = vadd.f32 %v2289_v28, %v1785_v22 }
 0x7d3   :  { %v7229_v29 = vpop.f32.mrf.mxu0 }
 0x7db   :  { %v2294_v57 = vpop.f32.mrf.mxu0 }
 0x7dc   :  { %v7233_v50 = vadd.f32 %v2294_v57, %v1790_v32  ;;  %v2557_v47 = vpop.xlane.xlu2 %2556 }
 0x7dd   :  { %5961 = vrcp.f32 %v2557_v47 }
 0x7e3   :  { %v7235_v59 = vpop.f32.mrf.mxu0  ;;  %v5962_v34 = vpop.eup %5961 }
 0x7e4   :  { %v2583_v42 = vmul.f32 %v5962_v34, %v7181_v38  ;;  %v2703_v20 = vpop.permute.xlu2 %2702  ;;  %v2563_v52 = vpop.xlane.xlu1 %2562 }
 0x7e5   :  { %v2708_v30 = vsel %vm1020_vm2, %v2703_v20, 0  ;;  %5963 = vrcp.f32 %v2563_v52  ;;  %v5567_v20 = vld [vmem:[#allocation8 + $0xe8] sm:$0xf]  ;;  %v5764_v52 = vld [vmem:[#allocation8 + $0xf4] sm:$0xf0] }
 0x7e6   :  { %v2591_v58 = vpack.c.bf16 %v2583_v42, %v2583_v42  ;;  %2717 = vmatpush.bf16.msrb.mxu1 %v2708_v30  ;;  %v5762_v30 = vld [vmem:[#allocation8 + $0xec] sm:$0xf] }
 0x7e8   :  { %5491 = vmatmul.msk.bf16.vlgmr.msra.gmra.mxu2 %vm912_vm1, %v2591_v58  ;;  %v5568_v58 = vor.u32 %v5764_v52, %v5567_v20  ;;  %v5513_v20 = vld [vmem:[#allocation8 + $0x18] sm:$0xf0] }
 0x7ea   :  { %2923 = vmatpush.bf16.msra.mxu1 %v5568_v58 }
 0x7eb   :  { %v2299_v49 = vpop.f32.mrf.mxu0  ;;  %v5964_v60 = vpop.eup %5963 }
 0x7ec   :  { %v7242_v37 = vadd.f32 %v2299_v49, %v1795_v6  ;;  %v2585_v33 = vmul.f32 %v5964_v60, %v7188_v63  ;;  %v2566_v23 = vpop.xlane.xlu0 %2565  ;;  %v5569_v6 = vld [vmem:[#allocation8 + $0xf8] sm:$0xf0]  ;;  %v5559_v60 = vld [vmem:[#allocation8 + $0xc8] sm:$0xf] }
 0x7ed   :  { %5965 = vrcp.f32 %v2566_v23  ;;  %v5572_v49 = vor.u32 %v5762_v30, %v5569_v6  ;;  %v5758_v23 = vld [vmem:[#allocation8 + $0xcc] sm:$0xf] }
 0x7ee   :  { %v2593_v38 = vpack.c.bf16 %v2585_v33, %v2585_v33  ;;  %v5760_v33 = vld [vmem:[#allocation8 + $0xd4] sm:$0xf0] }
 0x7f0   :  { %5493 = vmatmul.msk.bf16.vlgmr.msra.gmra.mxu0 %vm912_vm1, %v2593_v38  ;;  %v5560_v38 = vor.u32 %v5760_v33, %v5559_v60  ;;  %v1787_v60 = vadd.f32 %v7047_v12, %v7136_v40 }
 0x7f2   :  { %2924 = vmatpush.bf16.msra.mxu1 %v5560_v38 }
 0x7f3   :  { %v7246_v3 = vpop.f32.mrf.mxu0  ;;  %v5966_v24 = vpop.eup %5965 }
 0x7f4   :  { %v2586_v62 = vmul.f32 %v5966_v24, %v7193_v0  ;;  %v5561_v24 = vld [vmem:[#allocation8 + $0xd8] sm:$0xf0] }
 0x7f5   :  { %v2572_v46 = vpop.xlane.xlu1 %2571 }
 0x7f6   :  { %v2594_v36 = vpack.c.bf16 %v2586_v62, %v2586_v62  ;;  %5967 = vrcp.f32 %v2572_v46  ;;  %v5564_v62 = vor.u32 %v5758_v23, %v5561_v24  ;;  %v5553_v46 = vld [vmem:[#allocation8 + $0xb8] sm:$0xf0]  ;;  %v7269_v23 = vld [vmem:[#allocation10] sm:$0xff]  ;;  %v2310_v24 = vadd.f32 %v7229_v29, %v1787_v60 }
 0x7f7   :  { %v7272_v38 = vperm.slane %v7269_v23, 3 }
 0x7f8   :  { %5494 = vmatmul.msk.bf16.vlgmr.msrb.gmra.mxu1 %vm912_vm1, %v2594_v36  ;;  %v5551_v36 = vld [vmem:[#allocation8 + $0xa8] sm:$0xf] }
 0x7fb   :  { %v2304_v2 = vpop.f32.mrf.mxu0 }
 0x7fc   :  { %v7252_v1 = vadd.f32 %v2304_v2, %v1800_v16  ;;  %v5968_v19 = vpop.eup %5967  ;;  %v5756_v16 = vld [vmem:[#allocation8 + $0xb4] sm:$0xf0]  ;;  %v5754_v2 = vld [vmem:[#allocation8 + $0xac] sm:$0xf] }
 0x7fd   :  { %v2588_v0 = vmul.f32 %v5968_v19, %v7201_v13  ;;  %v5543_v19 = vld [vmem:[#allocation8 + $0x88] sm:$0xf] }
 0x7fe   :  { %v5544_v21 = vor.u32 %v5752_v27, %v5543_v19 }
 0x7ff   :  { %v2724_v63 = vpop.permute.xlu0 %2723  ;;  %v2596_v45 = vpack.c.bf16 %v2588_v0, %v2588_v0  ;;  %v5545_v0 = vld [vmem:[#allocation8 + $0x98] sm:$0xf0] }
 0x800   :  { %v2729_v51 = vsel %vm1020_vm2, %v2724_v63, 0  ;;  %v5552_v63 = vor.u32 %v5756_v16, %v5551_v36 }
 0x801   :  { %2738 = vmatpush.bf16.msrb.mxu2 %v2729_v51  ;;  %v5556_v51 = vor.u32 %v5754_v2, %v5553_v46 }
 0x802   :  { %2925 = vmatpush.bf16.msra.mxu1 %v5552_v63 }
 0x803   :  { %v7261_v35 = vpop.f32.mrf.mxu0 }
 0x805   :  { %2952 = vmatpush.bf16.msra.mxu2 %v5572_v49 }
 0x806   :  { %2926 = vmatpush.bf16.msra.mxu1 %v5544_v21  ;;  %v5761_v21 = vld [vmem:[#allocation8 + $0xe4] sm:$0xf] }
 0x809   :  { %2953 = vmatpush.bf16.msra.mxu2 %v5564_v62 }
 0x80d   :  { %v2745_v7 = vpop.permute.xlu1 %2744  ;;  %2954 = vmatpush.bf16.msra.mxu2 %v5556_v51 }
 0x80e   :  { %v2750_v48 = vsel %vm1020_vm2, %v2745_v7, 0 }
 0x80f   :  { %2759 = vmatpush.bf16.msrb.mxu3 %v2750_v48  ;;  %v5548_v48 = vor.u32 %v5750_v44, %v5545_v0  ;;  %v5601_v0 = vld [vmem:[#allocation8 + $0xf0] sm:$0xf0] }
 0x811   :  { %2955 = vmatpush.bf16.msra.mxu2 %v5548_v48  ;;  %v5604_v48 = vor.u32 %v5761_v21, %v5601_v0 }
 0x812   :  { %5496 = vmatmul.msk.bf16.vlgmr.msrb.gmra.mxu3 %vm912_vm1, %v2596_v45  ;;  %v5535_v45 = vld [vmem:[#allocation8 + $0x68] sm:$0xf] }
 0x813   :  { %v5536_v26 = vor.u32 %v5748_v14, %v5535_v45  ;;  %v5597_v45 = vld [vmem:[#allocation8 + $0xd0] sm:$0xf0]  ;;  %v1792_v14 = vadd.f32 %v7058_v39, %v7142_v9  ;;  %3079 = vmatpush.bf16.msra.mxu3 %v5604_v48 }
 0x815   :  { %2927 = vmatpush.bf16.msra.mxu1 %v5536_v26 }
 0x81d   :  { %v2569_v61 = vpop.xlane.xlu2 %2568 }
 0x81e   :  { %5969 = vrcp.f32 %v2569_v61  ;;  %v5537_v61 = vld [vmem:[#allocation8 + $0x78] sm:$0xf0] }
 0x822   :  { %v2635_v5 = vpop.f32.mrf.mxu1 }
 0x824   :  { %v5970_v56 = vpop.eup %5969 }
 0x825   :  { %v2587_v17 = vmul.f32 %v5970_v56, %v7216_v54  ;;  %v5527_v56 = vld [vmem:[#allocation8 + $0x48] sm:$0xf] }
 0x827   :  { %v2595_v25 = vpack.c.bf16 %v2587_v17, %v2587_v17  ;;  %v5744_v17 = vld [vmem:[#allocation8 + $0x54] sm:$0xf0] }
 0x829   :  { %5495 = vmatmul.msk.bf16.vlgmr.msrb.gmra.mxu2 %vm912_vm1, %v2595_v25  ;;  %v5742_v25 = vld [vmem:[#allocation8 + $0x4c] sm:$0xf] }
 0x82a   :  { %v2637_v13 = vpop.f32.mrf.mxu1 }
 0x82b   :  { %v5528_v13 = vor.u32 %v5744_v17, %v5527_v56  ;;  %v5753_v56 = vld [vmem:[#allocation8 + $0xa4] sm:$0xf]  ;;  %v5593_v17 = vld [vmem:[#allocation8 + $0xb0] sm:$0xf0] }
 0x82d   :  { %2928 = vmatpush.bf16.msra.mxu1 %v5528_v13 }
 0x839   :  { %v2614_v15 = vpop.f32.mrf.mxu3 }
 0x83a   :  { %v2765_v43 = vpack.c.bf16 %v2635_v5, %v2614_v15  ;;  %v5540_v5 = vor.u32 %v5746_v4, %v5537_v61  ;;  %v5529_v15 = vld [vmem:[#allocation8 + $0x58] sm:$0xf0]  ;;  %v2312_v61 = vadd.f32 %v7235_v59, %v1792_v14 }
 0x83c   :  { %5505 = vmatmul.msk.bf16.vlgmr.msrb.gmra.mxu0 %vm759_vm0, %v2765_v43  ;;  %2956 = vmatpush.bf16.msra.mxu2 %v5540_v5 }
 0x841   :  { %v2616_v10 = vpop.f32.mrf.mxu3 }
 0x842   :  { %v5532_v10 = vor.u32 %v5742_v25, %v5529_v15  ;;  %v5596_v15 = vor.u32 %v5753_v56, %v5593_v17  ;;  %v7303_v17 = vperm.slane %v7269_v23, 5 }
 0x844   :  { %2957 = vmatpush.bf16.msra.mxu2 %v5532_v10 }
 0x849   :  { %v2677_v8 = vpop.f32.mrf.mxu3 }
 0x851   :  { %v2679_v55 = vpop.f32.mrf.mxu3 }
 0x852   :  { %v5740_v55 = vld [vmem:[#allocation8 + $0x34] sm:$0xf0] }
 0x86b   :  { %v2656_v22 = vpop.f32.mrf.mxu2 }
 0x86c   :  { %v2766_v28 = vpack.c.bf16 %v2677_v8, %v2656_v22  ;;  %v5519_v8 = vld [vmem:[#allocation8 + $0x28] sm:$0xf]  ;;  %v5738_v22 = vld [vmem:[#allocation8 + $0x2c] sm:$0xf] }
 0x86d   :  { %v2698_v32 = vpop.f32.mrf.mxu0 }
 0x86e   :  { %5506 = vmatmul.msk.bf16.gmra.mxu0 %vm759_vm0, %v2766_v28  ;;  %v5520_v28 = vor.u32 %v5740_v55, %v5519_v8 }
 0x870   :  { %2929 = vmatpush.bf16.msra.mxu1 %v5520_v28  ;;  %v1797_v28 = vadd.f32 %v7069_v11, %v7159_v41  ;;  %v5749_v11 = vld [vmem:[#allocation8 + $0x84] sm:$0xf]  ;;  %v5589_v41 = vld [vmem:[#allocation8 + $0x90] sm:$0xf0] }
 0x873   :  { %v2658_v57 = vpop.f32.mrf.mxu2 }
 0x875   :  { %v2700_v54 = vpop.f32.mrf.mxu0  ;;  %v2719_v47 = vpop.f32.mrf.mxu1 }
 0x876   :  { %v2767_v34 = vpack.c.bf16 %v2719_v47, %v2698_v32  ;;  %v5521_v32 = vld [vmem:[#allocation8 + $0x38] sm:$0xf0]  ;;  %v5511_v54 = vld [vmem:[#allocation8 + $0x8] sm:$0xf]  ;;  %v5736_v47 = vld [vmem:[#allocation8 + $0x14] sm:$0xf0] }
 0x877   :  { %v5524_v57 = vor.u32 %v5738_v22, %v5521_v32 }
 0x879   :  { %2958 = vmatpush.bf16.msra.mxu2 %v5524_v57 }
 0x87d   :  { %v2721_v42 = vpop.f32.mrf.mxu1 }
 0x87e   :  { %5507 = vmatmul.msk.bf16.gmra.mxu0 %vm759_vm0, %v2767_v34  ;;  %v5734_v34 = vld [vmem:[#allocation8 + $0xc] sm:$0xf]  ;;  %v5512_v42 = vor.u32 %v5736_v47, %v5511_v54  ;;  %v2314_v54 = vadd.f32 %v7246_v3, %v1797_v28  ;;  %v5745_v3 = vld [vmem:[#allocation8 + $0x64] sm:$0xf] }
 0x87f   :  { %v5516_v52 = vor.u32 %v5734_v34, %v5513_v20 }
 0x880   :  { %2930 = vmatpush.bf16.msra.mxu1 %v5512_v42 }
 0x881   :  { %2959 = vmatpush.bf16.msra.mxu2 %v5516_v52 }
 0x895   :  { %v2761_v7 = vpop.f32.mrf.mxu3 }
 0x89d   :  { %v2763_v43 = vpop.f32.mrf.mxu3 }
 0x8ac   :  { %v2740_v30 = vpop.f32.mrf.mxu2 }
 0x8ad   :  { %v2768_v58 = vpack.c.bf16 %v2761_v7, %v2740_v30  ;;  %v5757_v7 = vld [vmem:[#allocation8 + $0xc4] sm:$0xf] }
 0x8ae   :  { %v5600_v26 = vor.u32 %v5757_v7, %v5597_v45 }
 0x8af   :  { %5508 = vmatmul.msk.bf16.gmra.mxu0 %vm759_vm0, %v2768_v58 }
 0x8b0   :  { %3080 = vmatpush.bf16.msra.mxu3 %v5600_v26 }
 0x8b4   :  { %v2742_v6 = vpop.f32.mrf.mxu2  ;;  %3081 = vmatpush.bf16.msra.mxu3 %v5596_v15 }
 0x8b5   :  { %v5592_v6 = vor.u32 %v5749_v11, %v5589_v41 }
 0x8b8   :  { %3082 = vmatpush.bf16.msra.mxu3 %v5592_v6 }
 0x8b9   :  { %v2802_v49 = vpop.f32.mrf.mxu0 }
 0x8ba   :  { %v2822_v33 = vadd.f32 %v2802_v49, %v7227_v18  ;;  %v5585_v49 = vld [vmem:[#allocation8 + $0x70] sm:$0xf0] }
 0x8bb   :  { %v5588_v60 = vor.u32 %v5745_v3, %v5585_v49 }
 0x8bc   :  { %v2831_v36 = vadd.f32 %v7272_v38, %v2822_v33  ;;  %v5741_v33 = vld [vmem:[#allocation8 + $0x44] sm:$0xf] }
 0x8bd   :  { %3083 = vmatpush.bf16.msra.mxu3 %v5588_v60 }
 0x8be   :  { %v2999_v63 = vpack.c.bf16 %v2831_v36, %v2831_v36 }
 0x8c0   :  { %v3016_v12 = vunpack.c.l.b16 %v2999_v63  ;;  %v5733_v63 = vld [vmem:[#allocation8 + $0x4] sm:$0xf] }
 0x8c1   :  { %v2804_v62 = vpop.f32.mrf.mxu0 }
 0x8c2   :  { %v2823_v16 = vadd.f32 %v2804_v62, %v2310_v24  ;;  %v5581_v24 = vld [vmem:[#allocation8 + $0x50] sm:$0xf0] }
 0x8c3   :  { %v5584_v62 = vor.u32 %v5741_v33, %v5581_v24 }
 0x8c4   :  { %v2832_v2 = vadd.f32 %v7272_v38, %v2823_v16  ;;  %v5577_v16 = vld [vmem:[#allocation8 + $0x30] sm:$0xf0] }
 0x8c5   :  { %3084 = vmatpush.bf16.msra.mxu3 %v5584_v62 }
 0x8c6   :  { %v2839_v46 = vpack.c.bf16 %v2832_v2, %v2831_v36  ;;  %v3000_v51 = vpack.c.bf16 %v2832_v2, %v2832_v2  ;;  %v5737_v36 = vld [vmem:[#allocation8 + $0x24] sm:$0xf] }
 0x8c7   :  { %v5580_v2 = vor.u32 %v5737_v36, %v5577_v16 }
 0x8c8   :  { %v3017_v19 = vunpack.c.l.b16 %v3000_v51  ;;  %2931 = vmatmul.bf16.vlgmr.msra.gmra.mxu1 %v2839_v46  ;;  %2960 = vmatmul.bf16.vlgmr.msra.gmra.mxu2 %v2839_v46  ;;  %v5573_v46 = vld [vmem:[#allocation8 + $0x10] sm:$0xf0] }
 0x8c9   :  { %3085 = vmatpush.bf16.msra.mxu3 %v5580_v2  ;;  %v5576_v51 = vor.u32 %v5733_v63, %v5573_v46 }
 0x8ca   :  { %v3024_v40 = vrot.slane %v3017_v19, 7 }
 0x8cc   :  { %v3026_v18 = vsel %vm3025_vm3, %v3024_v40, %v3016_v12 }
 0x8cd   :  { %3086 = vmatpush.bf16.msra.mxu3 %v5576_v51 }
 0x8eb   :  { %v2807_v27 = vpop.f32.mrf.mxu0 }
 0x8ec   :  { %v2824_v29 = vadd.f32 %v2807_v27, %v7233_v50 }
 0x8ee   :  { %v2833_v44 = vadd.f32 %v7272_v38, %v2824_v29  ;;  %v1802_v29 = vadd.f32 %v7079_v31, %v7169_v53 }
 0x8f0   :  { %v3001_v4 = vpack.c.bf16 %v2833_v44, %v2833_v44  ;;  %v2316_v0 = vadd.f32 %v7261_v35, %v1802_v29 }
 0x8f2   :  { %v3018_v5 = vunpack.c.l.b16 %v3001_v4 }
 0x8f3   :  { %v2809_v50 = vpop.f32.mrf.mxu0 }
 0x8f4   :  { %v3027_v25 = vrot.slane %v3018_v5, 6  ;;  %v2825_v13 = vadd.f32 %v2809_v50, %v2312_v61 }
 0x8f6   :  { %v3029_v43 = vsel %vm3028_vm4, %v3027_v25, %v3026_v18  ;;  %v2834_v10 = vadd.f32 %v7272_v38, %v2825_v13 }
 0x8f8   :  { %v2840_v8 = vpack.c.bf16 %v2834_v10, %v2833_v44  ;;  %v3002_v39 = vpack.c.bf16 %v2834_v10, %v2834_v10 }
 0x8fa   :  { %2936 = vmatmul.bf16.gmra.mxu1 %v2840_v8  ;;  %2965 = vmatmul.bf16.gmra.mxu2 %v2840_v8  ;;  %v3019_v55 = vunpack.c.l.b16 %v3002_v39 }
 0x8fb   :  { %v2812_v9 = vpop.f32.mrf.mxu0 }
 0x8fc   :  { %v2826_v59 = vadd.f32 %v2812_v9, %v7242_v37  ;;  %v3030_v57 = vrot.slane %v3019_v55, 5 }
 0x8fe   :  { %v2835_v22 = vadd.f32 %v7272_v38, %v2826_v59  ;;  %v3032_v52 = vsel %vm3031_vm5, %v3030_v57, %v3029_v43 }
 0x900   :  { %v3003_v32 = vpack.c.bf16 %v2835_v22, %v2835_v22 }
 0x902   :  { %v3020_v47 = vunpack.c.l.b16 %v3003_v32 }
 0x903   :  { %v2814_v34 = vpop.f32.mrf.mxu0 }
 0x904   :  { %v3033_v42 = vrot.slane %v3020_v47, 4  ;;  %v2827_v20 = vadd.f32 %v2814_v34, %v2314_v54 }
 0x906   :  { %v3035_v37 = vsel %vm3034_vm6, %v3033_v42, %v3032_v52  ;;  %v2836_v30 = vadd.f32 %v7272_v38, %v2827_v20  ;;  %v7325_v20 = vperm.slane %v7269_v23, 6 }
 0x908   :  { %v2841_v58 = vpack.c.bf16 %v2836_v30, %v2835_v22  ;;  %v3004_v19 = vpack.c.bf16 %v2836_v30, %v2836_v30 }
 0x90a   :  { %2941 = vmatmul.bf16.gmra.mxu1 %v2841_v58  ;;  %2970 = vmatmul.bf16.gmra.mxu2 %v2841_v58  ;;  %v3021_v18 = vunpack.c.l.b16 %v3004_v19 }
 0x90c   :  { %v3036_v21 = vrot.slane %v3021_v18, 3 }
 0x90e   :  { %v3038_v4 = vsel %vm3037_vm7, %v3036_v21, %v3035_v37 }
 0x92c   :  { %v2817_v12 = vpop.f32.mrf.mxu0 }
 0x92d   :  { %v2828_v40 = vadd.f32 %v2817_v12, %v7252_v1 }
 0x92f   :  { %v2837_v27 = vadd.f32 %v7272_v38, %v2828_v40  ;;  %v3007_v40 = vperm.slane %v7269_v23, 4 }
 0x931   :  { %v3005_v44 = vpack.c.bf16 %v2837_v27, %v2837_v27 }
 0x933   :  { %v3022_v7 = vunpack.c.l.b16 %v3005_v44 }
 0x934   :  { %v2819_v48 = vpop.f32.mrf.mxu0 }
 0x935   :  { %v3039_v45 = vrot.slane %v3022_v7, 2  ;;  %v2829_v14 = vadd.f32 %v2819_v48, %v2316_v0 }
 0x937   :  { %v3041_v1 = vsel %vm3040_vm8, %v3039_v45, %v3038_v4  ;;  %v2838_v26 = vadd.f32 %v7272_v38, %v2829_v14 }
 0x939   :  { %v3006_v61 = vpack.c.bf16 %v2838_v26, %v2838_v26  ;;  %v2842_v5 = vpack.c.bf16 %v2838_v26, %v2837_v27 }
 0x93b   :  { %v3023_v56 = vunpack.c.l.b16 %v3006_v61  ;;  %2946 = vmatmul.bf16.gmra.mxu1 %v2842_v5  ;;  %2975 = vmatmul.bf16.gmra.mxu2 %v2842_v5 }
 0x93d   :  { %v3042_v31 = vrot.slane %v3023_v56, 1 }
 0x93f   :  { %v3044_v53 = vsel %vm3043_vm9, %v3042_v31, %v3041_v1 }
 0x940   :  { %v3045_v35 = vpack.c.b16 %v3044_v53, %v3044_v53 }
 0x942   :  { %3087 = vmatmul.bf16.vlgmr.msra.gmra.mxu3 %v3045_v35 }
 0x945   :  { %v2932_v50 = vpop.f32.mrf.mxu1 }
 0x946   :  { %v2982_v25 = vadd.f32 %v7303_v17, %v2932_v50 }
 0x948   :  { %v7306_v13 = vpack.c.bf16 %v2982_v25, %v2982_v25 }
 0x94a   :  { %v3127_v38 = vsel %vm759_vm0, %v7306_v13, 0 }
 0x94b   :  { %3136 = vmatpush.bf16.xpose.msrb.mxu3 %v3127_v38  ;;  %v2961_v57 = vpop.f32.mrf.mxu2 }
 0x94c   :  { %v2991_v18 = vadd.f32 %v7325_v20, %v2961_v57 }
 0x94d   :  { %v2934_v15 = vpop.f32.mrf.mxu1 }
 0x94e   :  { %v2983_v43 = vadd.f32 %v7303_v17, %v2934_v15  ;;  %v7356_v7 = vpack.c.bf16 %v2991_v18, %v2991_v18 }
 0x950   :  { %v7311_v10 = vpack.c.bf16 %v2983_v43, %v2983_v43  ;;  %v3384_v31 = vsel %vm1020_vm2, %v7356_v7, 0 }
 0x952   :  { %v3146_v8 = vsel %vm759_vm0, %v7311_v10, 0 }
 0x953   :  { %3155 = vmatpush.bf16.xpose.msra.mxu3 %v3146_v8  ;;  %v2963_v34 = vpop.f32.mrf.mxu2 }
 0x954   :  { %v2992_v37 = vadd.f32 %v7325_v20, %v2963_v34 }
 0x956   :  { %v7331_v11 = vpack.c.bf16 %v2992_v37, %v2992_v37 }
 0x958   :  { %v3403_v3 = vsel %vm1020_vm2, %v7331_v11, 0 }
 0x977   :  { %v2937_v39 = vpop.f32.mrf.mxu1 }
 0x978   :  { %v2984_v9 = vadd.f32 %v7303_v17, %v2937_v39 }
 0x97a   :  { %v3117_v59 = vpack.c.bf16 %v2984_v9, %v2984_v9 }
 0x97c   :  { %v3165_v55 = vsel %vm759_vm0, %v3117_v59, 0  ;;  %v3596_v22 = vunpack.c.l.b16 %v3117_v59 }
 0x97d   :  { %3174 = vmatpush.bf16.xpose.msra.mxu0 %v3165_v55  ;;  %v2966_v49 = vpop.f32.mrf.mxu2 }
 0x97e   :  { %v7317_v28 = vpack.c.b16 %v3596_v22, %v3596_v22  ;;  %v2993_v24 = vadd.f32 %v7325_v20, %v2966_v49 }
 0x97f   :  { %v2939_v32 = vpop.f32.mrf.mxu1 }
 0x980   :  { %3598 = vrot.lane.b32.xlu1 %v7317_v28, %s6264_s2  ;;  %v7341_v16 = vpack.c.bf16 %v2993_v24, %v2993_v24  ;;  %v2985_v19 = vadd.f32 %v7303_v17, %v2939_v32 }
 0x982   :  { %v3422_v51 = vsel %vm1020_vm2, %v7341_v16, 0  ;;  %v7354_v21 = vpack.c.bf16 %v2985_v19, %v2985_v19 }
 0x984   :  { %v3184_v26 = vsel %vm759_vm0, %v7354_v21, 0 }
 0x985   :  { %v2968_v60 = vpop.f32.mrf.mxu2 }
 0x986   :  { %v2994_v32 = vadd.f32 %v7325_v20, %v2968_v60 }
 0x987   :  { %v2942_v54 = vpop.f32.mrf.mxu1 }
 0x988   :  { %v2986_v47 = vadd.f32 %v7303_v17, %v2942_v54  ;;  %v7405_v54 = vpack.c.bf16 %v2994_v32, %v2994_v32 }
 0x98a   :  { %v7322_v42 = vpack.c.bf16 %v2986_v47, %v2986_v47  ;;  %v3441_v34 = vsel %vm1020_vm2, %v7405_v54, 0 }
 0x98c   :  { %v3203_v52 = vsel %vm759_vm0, %v7322_v42, 0 }
 0x98d   :  { %3212 = vmatpush.bf16.xpose.msrb.mxu0 %v3203_v52  ;;  %v2971_v33 = vpop.f32.mrf.mxu2 }
 0x98e   :  { %v2995_v15 = vadd.f32 %v7325_v20, %v2971_v33 }
 0x98f   :  { %v2944_v30 = vpop.f32.mrf.mxu1 }
 0x990   :  { %v2987_v58 = vadd.f32 %v7303_v17, %v2944_v30  ;;  %v7390_v9 = vpack.c.bf16 %v2995_v15, %v2995_v15 }
 0x992   :  { %v7333_v41 = vpack.c.bf16 %v2987_v58, %v2987_v58 }
 0x994   :  { %v3222_v6 = vsel %vm759_vm0, %v7333_v41, 0 }
 0x995   :  { %3231 = vmatpush.bf16.xpose.msrb.mxu1 %v3222_v6  ;;  %v2973_v2 = vpop.f32.mrf.mxu2 }
 0x996   :  { %v2996_v27 = vadd.f32 %v7325_v20, %v2973_v2 }
 0x998   :  { %v7360_v1 = vpack.c.bf16 %v2996_v27, %v2996_v27 }
 0x99a   :  { %v3479_v35 = vsel %vm1020_vm2, %v7360_v1, 0 }
 0x99d   :  { %3412 = vmatpush.bf16.msra.mxu1 %v3403_v3 }
 0x9b8   :  { %v2947_v62 = vpop.f32.mrf.mxu1 }
 0x9b9   :  { %v2988_v36 = vadd.f32 %v7303_v17, %v2947_v62 }
 0x9bb   :  { %v7343_v63 = vpack.c.bf16 %v2988_v36, %v2988_v36 }
 0x9bd   :  { %v3241_v46 = vsel %vm759_vm0, %v7343_v63, 0 }
 0x9be   :  { %3250 = vmatpush.bf16.xpose.msrb.mxu2 %v3241_v46  ;;  %v2976_v12 = vpop.f32.mrf.mxu2 }
 0x9bf   :  { %v2997_v29 = vadd.f32 %v7325_v20, %v2976_v12  ;;  %v3625_v12 = vunpack.c.l.b16 %v7354_v21 }
 0x9c0   :  { %v2949_v25 = vpop.f32.mrf.mxu1 }
 0x9c1   :  { %v7362_v23 = vpack.c.bf16 %v2997_v29, %v2997_v29  ;;  %v2989_v38 = vadd.f32 %v7303_v17, %v2949_v25  ;;  %v3460_v17 = vsel %vm1020_vm2, %v7390_v9, 0  ;;  %v7429_v27 = vpack.c.b16 %v3625_v12, %v3625_v12 }
 0x9c3   :  { %v3498_v53 = vsel %vm1020_vm2, %v7362_v23, 0  ;;  %v7388_v8 = vpack.c.bf16 %v2989_v38, %v2989_v38 }
 0x9c5   :  { %v3088_v44 = vpop.f32.mrf.mxu3  ;;  %v3260_v55 = vsel %vm759_vm0, %v7388_v8, 0 }
 0x9c6   :  { %3431 = vmatpush.bf16.msra.mxu2 %v3422_v51  ;;  %v3089_v0 = vadd.f32 %v3088_v44, %v3007_v40  ;;  %v2978_v52 = vpop.f32.mrf.mxu2 }
 0x9c7   :  { %v2998_v37 = vadd.f32 %v7325_v20, %v2978_v52 }
 0x9c8   :  { %v7358_v48 = vpack.c.bf16 %v3089_v0, %v3089_v0  ;;  %v3094_v45 = vrot.slane %v3089_v0, 2  ;;  %v3097_v14 = vrot.slane %v3089_v0, 5  ;;  %v3098_v4 = vrot.slane %v3089_v0, 6 }
 0x9c9   :  { %v3093_v43 = vrot.slane %v3089_v0, 1  ;;  %v3096_v39 = vrot.slane %v3089_v0, 4  ;;  %v3095_v57 = vrot.slane %v3089_v0, 3  ;;  %v3099_v30 = vrot.slane %v3089_v0, 7 }
 0x9ca   :  { %5605 = vmatmul.msk.bf16.vlgmr.msrb.gmra.mxu3 %vm759_vm0, %v7358_v48  ;;  %v7368_v61 = vpack.c.bf16 %v3094_v45, %v3094_v45  ;;  %v7370_v5 = vpack.c.bf16 %v3097_v14, %v3097_v14  ;;  %v7372_v56 = vpack.c.bf16 %v3098_v4, %v3098_v4  ;;  %v7414_v58 = vpack.c.bf16 %v2998_v37, %v2998_v37 }
 0x9cb   :  { %3193 = vmatpush.bf16.xpose.msrb.mxu3 %v3184_v26  ;;  %v7392_v59 = vpack.c.bf16 %v3093_v43, %v3093_v43  ;;  %v7398_v22 = vpack.c.bf16 %v3096_v39, %v3096_v39  ;;  %v7407_v47 = vpack.c.bf16 %v3095_v57, %v3095_v57  ;;  %v7416_v6 = vpack.c.bf16 %v3099_v30, %v3099_v30 }
 0x9cc   :  { %5607 = vmatmul.msk.bf16.vlgmr.msra.gmra.mxu0 %vm759_vm0, %v7368_v61  ;;  %5610 = vmatmul.msk.bf16.vlgmr.msrb.gmra.mxu1 %vm759_vm0, %v7370_v5  ;;  %v3517_v3 = vsel %vm1020_vm2, %v7414_v58, 0 }
 0x9cd   :  { %5611 = vmatmul.msk.bf16.vlgmr.msrb.gmra.mxu2 %vm759_vm0, %v7372_v56  ;;  %3393 = vmatpush.bf16.msra.mxu0 %v3384_v31  ;;  %v3090_v50 = vpop.f32.mrf.mxu3 }
 0x9ce   :  { %3488 = vmatpush.bf16.msrb.mxu1 %v3479_v35  ;;  %3507 = vmatpush.bf16.msrb.mxu2 %v3498_v53  ;;  %v3591_v50 = vunpack.c.l.b16 %v7368_v61 }
 0x9d0   :  { %v7445_v25 = vpack.c.b16 %v3591_v50, %v3591_v50 }
 0x9da   :  { %5606 = vmatmul.msk.bf16.vlgmr.msra.gmra.mxu3 %vm759_vm0, %v7392_v59 }
 0x9db   :  { %3269 = vmatpush.bf16.xpose.msra.mxu3 %v3260_v55 }
 0x9dc   :  { %5609 = vmatmul.msk.bf16.vlgmr.msrb.gmra.mxu0 %vm759_vm0, %v7398_v22 }
 0x9dd   :  { %3469 = vmatpush.bf16.msrb.mxu0 %v3460_v17 }
 0x9ea   :  { %5608 = vmatmul.msk.bf16.vlgmr.msrb.gmra.mxu3 %vm759_vm0, %v7407_v47 }
 0x9eb   :  { %3450 = vmatpush.bf16.msrb.mxu3 %v3441_v34 }
 0x9fa   :  { %5612 = vmatmul.msk.bf16.vlgmr.msra.gmra.mxu3 %vm759_vm0, %v7416_v6 }
 0x9fb   :  { %3526 = vmatpush.bf16.msra.mxu3 %v3517_v3 }
 0xa49   :  { %v3176_v49 = vpop.f32.mrf.mxu0  ;;  %v3233_v60 = vpop.f32.mrf.mxu1 }
 0xa4a   :  { %v3282_v33 = vsel %vm3275_vm10, %v3176_v49, -inf  ;;  %v3291_v24 = vsel %vm3275_vm10, %v3233_v60, -inf }
 0xa4b   :  { %3283 = vmax.xlane.f32.xlu0 %v3282_v33  ;;  %3292 = vmax.xlane.f32.xlu2 %v3291_v24 }
 0xa4d   :  { %v3138_v20 = vpop.f32.mrf.mxu3 }
 0xa4e   :  { %v3276_v46 = vsel %vm3275_vm10, %v3138_v20, -inf }
 0xa50   :  { %v3252_v62 = vpop.f32.mrf.mxu2 }
 0xa51   :  { %v3178_v36 = vpop.f32.mrf.mxu0  ;;  %v3235_v2 = vpop.f32.mrf.mxu1  ;;  %v3294_v18 = vsel %vm3275_vm10, %v3252_v62, -inf }
 0xa52   :  { %v7463_v36 = vpop.permute.xlu1 %3598 }
 0xa53   :  { %3277 = vmax.xlane.f32.xlu2 %v3276_v46  ;;  %v3712_v46 = vunpack.c.l.b16 %v7343_v63 }
 0xa55   :  { %v3140_v51 = vpop.f32.mrf.mxu3 }
 0xa56   :  { %v7468_v51 = vpack.c.b16 %v3712_v46, %v3712_v46 }
 0xa58   :  { %v3254_v19 = vpop.f32.mrf.mxu2 }
 0xa59   :  { %v7426_v40 = vpop.f32.mrf.mxu0 }
 0xa5a   :  { %v3288_v35 = vsel %vm3275_vm10, %v7426_v40, -inf }
 0xa5b   :  { %3295 = vmax.xlane.f32.xlu2 %v3294_v18  ;;  %v3538_v18 = vunpack.c.l.b16 %v7306_v13  ;;  %v3620_v13 = vunpack.c.l.b16 %v7407_v47 }
 0xa5d   :  { %v7431_v29 = vpop.f32.mrf.mxu3  ;;  %v7486_v50 = vpack.c.b16 %v3620_v13, %v3620_v13 }
 0xa5e   :  { %v3279_v0 = vsel %vm3275_vm10, %v7431_v29, -inf }
 0xa5f   :  { %3627 = vrot.lane.b32.xlu0 %v7429_v27, %s6264_s2 }
 0xa61   :  { %v3216_v44 = vpop.f32.mrf.mxu0 }
 0xa62   :  { %v7473_v44 = vpack.c.b16 %v3538_v18, %v3538_v18 }
 0xa63   :  { %3280 = vmax.xlane.f32.xlu2 %v3279_v0 }
 0xa65   :  { %v3159_v45 = vpop.f32.mrf.mxu3 }
 0xa6d   :  { %v3195_v14 = vpop.f32.mrf.mxu3 }
 0xa6e   :  { %v3285_v21 = vsel %vm3275_vm10, %v3195_v14, -inf }
 0xa6f   :  { %3286 = vmax.xlane.f32.xlu1 %v3285_v21 }
 0xa75   :  { %v3197_v4 = vpop.f32.mrf.mxu3 }
 0xa7d   :  { %v7438_v26 = vpop.f32.mrf.mxu3 }
 0xa7e   :  { %v3297_v31 = vsel %vm3275_vm10, %v7438_v26, -inf }
 0xa7f   :  { %3298 = vmax.xlane.f32.xlu2 %v3297_v31 }
 0xa85   :  { %v3273_v53 = vpop.f32.mrf.mxu3 }
 0xa89   :  { %3289 = vmax.xlane.f32.xlu0 %v3288_v35 }
 0xa97   :  { %3593 = vrot.lane.b32.xlu2 %v7445_v25, %s6264_s2 }
 0xabe   :  { %v3284_v38 = vpop.xlane.xlu0 %3283  ;;  %v3293_v15 = vpop.xlane.xlu2 %3292 }
 0xabf   :  { %v3302_v43 = vsub.f32 %v3176_v49, %v3284_v38  ;;  %v3305_v39 = vsub.f32 %v3233_v60, %v3293_v15 }
 0xac1   :  { %v3312_v55 = vmul.f32 1.442695, %v3302_v43  ;;  %v3318_v17 = vmul.f32 1.442695, %v3305_v39  ;;  %v3741_v43 = vunpack.c.l.b16 %v7388_v8 }
 0xac3   :  { %5971 = vpow2.f32 %v3312_v55 }
 0xac4   :  { %5973 = vpow2.f32 %v3318_v17 }
 0xac6   :  { %v3278_v32 = vpop.xlane.xlu2 %3277 }
 0xac7   :  { %v3300_v57 = vsub.f32 %v3138_v20, %v3278_v32 }
 0xac9   :  { %v7449_v34 = vpop.eup %5971  ;;  %v3308_v52 = vmul.f32 1.442695, %v3300_v57 }
 0xaca   :  { %v7451_v37 = vpop.eup %5973  ;;  %v3330_v61 = vsel %vm3275_vm10, %v7449_v34, 0.0 }
 0xacb   :  { %5975 = vpow2.f32 %v3308_v52  ;;  %3331 = vadd.xlane.f32.xlu1 %v3330_v61  ;;  %v3339_v30 = vsel %vm3275_vm10, %v7451_v37, 0.0  ;;  %v3533_v52 = vunpack.c.l.b16 %v7358_v48 }
 0xacc   :  { %3340 = vadd.xlane.f32.xlu2 %v3339_v30 }
 0xacd   :  { %v7514_v61 = vpack.c.b16 %v3533_v52, %v3533_v52 }
 0xace   :  { %v3296_v3 = vpop.xlane.xlu2 %3295 }
 0xacf   :  { %v3306_v49 = vsub.f32 %v3252_v62, %v3296_v3  ;;  %v3736_v3 = vunpack.c.l.b16 %v7416_v6  ;;  %v3678_v6 = vunpack.c.l.b16 %v7370_v5  ;;  %v3909_v5 = vunpack.c.l.b16 %v7341_v16 }
 0xad0   :  { %v3604_v16 = vsel %vm759_vm0, %v7463_v36, 0 }
 0xad1   :  { %v7457_v60 = vpop.eup %5975  ;;  %v3320_v33 = vmul.f32 1.442695, %v3306_v49  ;;  %v7481_v45 = vpop.permute.xlu0 %3627  ;;  %v4005_v49 = vunpack.c.l.b16 %v7362_v23  ;;  %v3562_v23 = vunpack.c.l.b16 %v7392_v59 }
 0xad2   :  { %v3324_v24 = vsel %vm3275_vm10, %v7457_v60, 0.0 }
 0xad3   :  { %5977 = vpow2.f32 %v3320_v33  ;;  %3325 = vadd.xlane.f32.xlu0 %v3324_v24  ;;  %v7525_v33 = vpack.c.b16 %v3736_v3, %v3736_v3  ;;  %v7527_v48 = vpack.c.b16 %v4005_v49, %v4005_v49  ;;  %v3707_v24 = vunpack.c.l.b16 %v7372_v56 }
 0xad4   :  { %v7545_v56 = vpack.c.b16 %v3562_v23, %v3562_v23  ;;  %v3633_v3 = vsel %vm759_vm0, %v7481_v45, 0 }
 0xad9   :  { %v7461_v20 = vpop.eup %5977 }
 0xada   :  { %v3342_v2 = vsel %vm3275_vm10, %v7461_v20, 0.0 }
 0xadb   :  { %3343 = vadd.xlane.f32.xlu2 %v3342_v2  ;;  %v7535_v2 = vpack.c.b16 %v3707_v24, %v3707_v24 }
 0xae2   :  { %v3287_v62 = vpop.xlane.xlu1 %3286 }
 0xae3   :  { %v3303_v19 = vsub.f32 %v3195_v14, %v3287_v62  ;;  %v3281_v14 = vpop.xlane.xlu2 %3280  ;;  %v3649_v62 = vunpack.c.l.b16 %v7398_v22 }
 0xae4   :  { %3714 = vrot.lane.b32.xlu1 %v7468_v51, %s6264_s2  ;;  %v3301_v31 = vsub.f32 %v7431_v29, %v3281_v14  ;;  %v7496_v29 = vpack.c.b16 %v3741_v43, %v3741_v43  ;;  %v3885_v43 = vunpack.c.l.b16 %v7331_v11 }
 0xae5   :  { %v3314_v12 = vmul.f32 1.442695, %v3303_v19  ;;  %v3933_v19 = vunpack.c.l.b16 %v7405_v54 }
 0xae6   :  { %v3310_v38 = vmul.f32 1.442695, %v3301_v31  ;;  %v3861_v31 = vunpack.c.l.b16 %v7356_v7  ;;  %v7580_v36 = vpack.c.b16 %v3885_v43, %v3885_v43 }
 0xae7   :  { %5979 = vpow2.f32 %v3314_v12  ;;  %v7555_v12 = vpack.c.b16 %v3649_v62, %v3649_v62 }
 0xaec   :  { %3540 = vrot.lane.b32.xlu1 %v7473_v44, %s6264_s2 }
 0xaed   :  { %v7477_v0 = vpop.eup %5979 }
 0xaee   :  { %v3333_v63 = vsel %vm3275_vm10, %v7477_v0, 0.0 }
 0xaef   :  { %3334 = vadd.xlane.f32.xlu0 %v3333_v63  ;;  %v7557_v63 = vpack.c.b16 %v3933_v19, %v3933_v19 }
 0xaf2   :  { %v3299_v35 = vpop.xlane.xlu2 %3298 }
 0xaf3   :  { %v3307_v15 = vsub.f32 %v7438_v26, %v3299_v35  ;;  %v3567_v26 = vunpack.c.l.b16 %v7311_v10  ;;  %v3683_v10 = vunpack.c.l.b16 %v7333_v41  ;;  %v3654_v41 = vunpack.c.l.b16 %v7322_v42 }
 0xaf4   :  { %v7549_v42 = vpack.c.b16 %v3678_v6, %v3678_v6  ;;  %v7573_v35 = vpack.c.b16 %v3861_v31, %v3861_v31 }
 0xaf5   :  { %v7505_v17 = vpack.c.b16 %v3567_v26, %v3567_v26  ;;  %v7519_v30 = vpack.c.b16 %v3683_v10, %v3683_v10  ;;  %v7537_v46 = vpack.c.b16 %v3654_v41, %v3654_v41 }
 0xafa   :  { %v3594_v18 = vpop.permute.xlu2 %3593 }
 0xafc   :  { %v3290_v21 = vpop.xlane.xlu0 %3289 }
 0xafd   :  { %v3304_v4 = vsub.f32 %v7426_v40, %v3290_v21  ;;  %v3322_v40 = vmul.f32 1.442695, %v3307_v15  ;;  %v7564_v21 = vpack.c.b16 %v3909_v5, %v3909_v5 }
 0xaff   :  { %v3316_v53 = vmul.f32 1.442695, %v3304_v4 }
 0xb01   :  { %5981 = vpow2.f32 %v3316_v53 }
 0xb02   :  { %5983 = vpow2.f32 %v3310_v38 }
 0xb03   :  { %3622 = vrot.lane.b32.xlu0 %v7486_v50, %s6264_s2  ;;  %5985 = vpow2.f32 %v3322_v40 }
 0xb07   :  { %v7492_v39 = vpop.eup %5981 }
 0xb08   :  { %v3336_v47 = vsel %vm3275_vm10, %v7492_v39, 0.0  ;;  %v7500_v55 = vpop.eup %5983 }
 0xb09   :  { %3337 = vadd.xlane.f32.xlu2 %v3336_v47  ;;  %v3327_v8 = vsel %vm3275_vm10, %v7500_v55, 0.0  ;;  %v7507_v32 = vpop.eup %5985 }
 0xb0a   :  { %v3345_v57 = vsel %vm3275_vm10, %v7507_v32, 0.0 }
 0xb0b   :  { %3743 = vrot.lane.b32.xlu0 %v7496_v29, %s6264_s2 }
 0xb11   :  { %3328 = vadd.xlane.f32.xlu2 %v3327_v8 }
 0xb13   :  { %3569 = vrot.lane.b32.xlu0 %v7505_v17, %s6264_s2 }
 0xb16   :  { %3346 = vadd.xlane.f32.xlu1 %v3345_v57 }
 0xb1b   :  { %3535 = vrot.lane.b32.xlu0 %v7514_v61, %s6264_s2 }
 0xb23   :  { %3685 = vrot.lane.b32.xlu0 %v7519_v30, %s6264_s2 }
 0xb29   :  { %3738 = vrot.lane.b32.xlu2 %v7525_v33, %s6264_s2 }
 0xb2b   :  { %4007 = vrot.lane.b32.xlu0 %v7527_v48, %s6264_s2 }
 0xb2f   :  { %3709 = vrot.lane.b32.xlu1 %v7535_v2, %s6264_s2 }
 0xb31   :  { %3656 = vrot.lane.b32.xlu2 %v7537_v46, %s6264_s2 }
 0xb37   :  { %3564 = vrot.lane.b32.xlu1 %v7545_v56, %s6264_s2 }
 0xb39   :  { %3680 = vrot.lane.b32.xlu2 %v7549_v42, %s6264_s2 }
 0xb3e   :  { %v3332_v59 = vpop.xlane.xlu1 %3331 }
 0xb3f   :  { %5987 = vrcp.f32 %v3332_v59  ;;  %3651 = vrot.lane.b32.xlu1 %v7555_v12, %s6264_s2  ;;  %v3341_v54 = vpop.xlane.xlu2 %3340 }
 0xb41   :  { %3935 = vrot.lane.b32.xlu2 %v7557_v63, %s6264_s2 }
 0xb45   :  { %v5988_v14 = vpop.eup %5987 }
 0xb46   :  { %v3358_v22 = vmul.f32 %v5988_v14, %v7449_v34  ;;  %v3326_v4 = vpop.xlane.xlu0 %3325 }
 0xb47   :  { %5989 = vrcp.f32 %v3326_v4  ;;  %3911 = vrot.lane.b32.xlu1 %v7564_v21, %s6264_s2 }
 0xb48   :  { %v3366_v13 = vpack.c.bf16 %v3358_v22, %v3358_v22 }
 0xb4a   :  { %5615 = vmatmul.msk.bf16.vlgmr.msra.gmra.mxu2 %vm912_vm1, %v3366_v13 }
 0xb4b   :  { %3613 = vmatpush.bf16.xpose.msra.mxu2 %v3604_v16 }
 0xb4d   :  { %v5990_v53 = vpop.eup %5989 }
 0xb4e   :  { %v3356_v34 = vmul.f32 %v5990_v53, %v7457_v60  ;;  %v3344_v38 = vpop.xlane.xlu2 %3343 }
 0xb4f   :  { %5991 = vrcp.f32 %v3344_v38  ;;  %3863 = vrot.lane.b32.xlu1 %v7573_v35, %s6264_s2 }
 0xb50   :  { %v3364_v15 = vpack.c.bf16 %v3356_v34, %v3356_v34 }
 0xb52   :  { %5613 = vmatmul.msk.bf16.vlgmr.msra.gmra.mxu0 %vm912_vm1, %v3364_v15 }
 0xb55   :  { %v5992_v7 = vpop.eup %5991 }
 0xb56   :  { %v3362_v40 = vmul.f32 %v5992_v7, %v7461_v20  ;;  %v3715_v47 = vpop.permute.xlu1 %3714 }
 0xb57   :  { %3887 = vrot.lane.b32.xlu1 %v7580_v36, %s6264_s2  ;;  %v3720_v26 = vsel %vm759_vm0, %v3715_v47, 0 }
 0xb58   :  { %v3370_v60 = vpack.c.bf16 %v3362_v40, %v3362_v40 }
 0xb5a   :  { %5619 = vmatmul.msk.bf16.vlgmr.msrb.gmra.mxu2 %vm912_vm1, %v3370_v60 }
 0xb5b   :  { %3729 = vmatpush.bf16.xpose.msrb.mxu2 %v3720_v26 }
 0xb5e   :  { %v3541_v8 = vpop.permute.xlu1 %3540 }
 0xb5f   :  { %v3546_v11 = vsel %vm759_vm0, %v3541_v8, 0 }
 0xb60   :  { %3555 = vmatpush.bf16.xpose.msra.mxu0 %v3546_v11 }
 0xb62   :  { %v3335_v57 = vpop.xlane.xlu0 %3334 }
 0xb63   :  { %5993 = vrcp.f32 %v3335_v57 }
 0xb69   :  { %v5994_v52 = vpop.eup %5993 }
 0xb6a   :  { %v3359_v10 = vmul.f32 %v5994_v52, %v7477_v0  ;;  %5623 = vmatmul.msk.bf16.vlgmr.msra.gmra.mxu2 %vm759_vm0, %v3594_v18 }
 0xb6c   :  { %v3367_v20 = vpack.c.bf16 %v3359_v10, %v3359_v10 }
 0xb6e   :  { %5616 = vmatmul.msk.bf16.vlgmr.msrb.gmra.mxu3 %vm912_vm1, %v3367_v20 }
 0xb6f   :  { %3642 = vmatpush.bf16.xpose.msrb.mxu3 %v3633_v3 }
 0xb75   :  { %v3623_v49 = vpop.permute.xlu0 %3622 }
 0xb7c   :  { %v3338_v24 = vpop.xlane.xlu2 %3337 }
 0xb7d   :  { %5995 = vrcp.f32 %v3338_v24  ;;  %v3744_v41 = vpop.permute.xlu0 %3743 }
 0xb7e   :  { %v3749_v53 = vsel %vm759_vm0, %v3744_v41, 0 }
 0xb83   :  { %v5996_v23 = vpop.eup %5995 }
 0xb84   :  { %v3360_v6 = vmul.f32 %v5996_v23, %v7492_v39  ;;  %v3329_v62 = vpop.xlane.xlu2 %3328 }
 0xb85   :  { %5997 = vrcp.f32 %v3329_v62  ;;  %v3570_v0 = vpop.permute.xlu0 %3569 }
 0xb86   :  { %v3368_v19 = vpack.c.bf16 %v3360_v6, %v3360_v6  ;;  %v3575_v4 = vsel %vm759_vm0, %v3570_v0, 0 }
 0xb88   :  { %5617 = vmatmul.msk.bf16.vlgmr.msrb.gmra.mxu0 %vm912_vm1, %v3368_v19 }
 0xb89   :  { %v3347_v18 = vpop.xlane.xlu1 %3346 }
 0xb8a   :  { %5999 = vrcp.f32 %v3347_v18 }
 0xb8b   :  { %v5998_v59 = vpop.eup %5997  ;;  %6001 = vrcp.f32 %v3341_v54 }
 0xb8c   :  { %v3357_v45 = vmul.f32 %v5998_v59, %v7500_v55  ;;  %v3739_v5 = vpop.permute.xlu2 %3738 }
 0xb8d   :  { %v3536_v31 = vpop.permute.xlu0 %3535 }
 0xb8e   :  { %v3365_v14 = vpack.c.bf16 %v3357_v45, %v3357_v45 }
 0xb90   :  { %v6000_v22 = vpop.eup %5999  ;;  %5614 = vmatmul.msk.bf16.vlgmr.msra.gmra.mxu1 %vm912_vm1, %v3365_v14 }
 0xb91   :  { %v3363_v39 = vmul.f32 %v6000_v22, %v7507_v32  ;;  %3584 = vmatpush.bf16.xpose.msra.mxu1 %v3575_v4  ;;  %v6002_v55 = vpop.eup %6001 }
 0xb92   :  { %v3361_v38 = vmul.f32 %v6002_v55, %v7451_v37 }
 0xb93   :  { %v3371_v13 = vpack.c.bf16 %v3363_v39, %v3363_v39 }
 0xb94   :  { %v3657_v16 = vpop.permute.xlu2 %3656  ;;  %v3369_v32 = vpack.c.bf16 %v3361_v38, %v3361_v38 }
 0xb95   :  { %v3662_v34 = vsel %vm759_vm0, %v3657_v16, 0  ;;  %5620 = vmatmul.msk.bf16.vlgmr.msra.gmra.mxu3 %vm912_vm1, %v3371_v13  ;;  %v3686_v15 = vpop.permute.xlu0 %3685 }
 0xb96   :  { %3758 = vmatpush.bf16.xpose.msra.mxu3 %v3749_v53  ;;  %3671 = vmatpush.bf16.xpose.msrb.mxu0 %v3662_v34  ;;  %v3691_v43 = vsel %vm759_vm0, %v3686_v15, 0 }
 0xb98   :  { %5621 = vmatmul.msk.bf16.vlgmr.msra.gmra.mxu0 %vm759_vm0, %v3536_v31 }
 0xb9c   :  { %v3681_v54 = vpop.permute.xlu2 %3680 }
 0xb9d   :  { %v4008_v26 = vpop.permute.xlu0 %4007 }
 0xb9e   :  { %v4013_v57 = vsel %vm1020_vm2, %v4008_v26, 0 }
 0xba0   :  { %5618 = vmatmul.msk.bf16.vlgmr.msrb.gmra.mxu1 %vm912_vm1, %v3369_v32 }
 0xba1   :  { %3700 = vmatpush.bf16.xpose.msrb.mxu1 %v3691_v43  ;;  %v3710_v7 = vpop.permute.xlu1 %3709 }
 0xba2   :  { %5627 = vmatmul.msk.bf16.vlgmr.msrb.gmra.mxu2 %vm759_vm0, %v3710_v7 }
 0xba4   :  { %v3936_v40 = vpop.permute.xlu2 %3935 }
 0xba5   :  { %v3941_v47 = vsel %vm1020_vm2, %v3936_v40, 0  ;;  %5624 = vmatmul.msk.bf16.vlgmr.msrb.gmra.mxu3 %vm759_vm0, %v3623_v49 }
 0xba6   :  { %3950 = vmatpush.bf16.msrb.mxu3 %v3941_v47 }
 0xba9   :  { %v3565_v60 = vpop.permute.xlu1 %3564 }
 0xbb0   :  { %5622 = vmatmul.msk.bf16.vlgmr.msra.gmra.mxu1 %vm759_vm0, %v3565_v60 }
 0xbb1   :  { %v3652_v37 = vpop.permute.xlu1 %3651 }
 0xbb2   :  { %5625 = vmatmul.msk.bf16.vlgmr.msrb.gmra.mxu0 %vm759_vm0, %v3652_v37 }
 0xbb5   :  { %5628 = vmatmul.msk.bf16.vlgmr.msra.gmra.mxu3 %vm759_vm0, %v3739_v5 }
 0xbb9   :  { %v3912_v8 = vpop.permute.xlu1 %3911 }
 0xbba   :  { %v3917_v11 = vsel %vm1020_vm2, %v3912_v8, 0 }
 0xbbb   :  { %3926 = vmatpush.bf16.msra.mxu2 %v3917_v11 }
 0xbbf   :  { %4022 = vmatpush.bf16.msrb.mxu2 %v4013_v57 }
 0xbc0   :  { %5626 = vmatmul.msk.bf16.vlgmr.msrb.gmra.mxu1 %vm759_vm0, %v3681_v54 }
 0xbc1   :  { %v3864_v52 = vpop.permute.xlu1 %3863 }
 0xbc2   :  { %v3869_v10 = vsel %vm1020_vm2, %v3864_v52, 0 }
 0xbc3   :  { %3878 = vmatpush.bf16.msra.mxu0 %v3869_v10 }
 0xbc9   :  { %v3888_v20 = vpop.permute.xlu1 %3887 }
 0xbca   :  { %v3893_v3 = vsel %vm1020_vm2, %v3888_v20, 0 }
 0xbcb   :  { %3902 = vmatpush.bf16.msra.mxu1 %v3893_v3  ;;  %v4029_v3 = vunpack.c.l.b16 %v7414_v58 }
 0xbcd   :  { %v7617_v49 = vpop.f32.mrf.mxu2 }
 0xbcf   :  { %v7619_v24 = vpop.f32.mrf.mxu0 }
 0xbd5   :  { %v3435_v41 = vpop.f32.mrf.mxu2 }
 0xbd6   :  { %v7650_v41 = vpack.c.b16 %v4029_v3, %v4029_v3 }
 0xbd7   :  { %v3397_v23 = vpop.f32.mrf.mxu0 }
 0xbdd   :  { %v7621_v6 = vpop.f32.mrf.mxu2 }
 0xbe5   :  { %v3511_v62 = vpop.f32.mrf.mxu2 }
 0xbed   :  { %v3615_v19 = vpop.f32.mrf.mxu2 }
 0xbee   :  { %v3770_v0 = vsel %vm3275_vm10, %v3615_v19, -inf }
 0xbef   :  { %3771 = vmax.xlane.f32.xlu0 %v3770_v0 }
 0xbf1   :  { %v7624_v18 = vpop.f32.mrf.mxu3 }
 0xbf5   :  { %v3617_v59 = vpop.f32.mrf.mxu2 }
 0xbf9   :  { %v3454_v45 = vpop.f32.mrf.mxu3 }
 0xc05   :  { %v7626_v5 = vpop.f32.mrf.mxu0 }
 0xc0d   :  { %v7628_v14 = vpop.f32.mrf.mxu1  ;;  %v3473_v22 = vpop.f32.mrf.mxu0 }
 0xc15   :  { %v3416_v4 = vpop.f32.mrf.mxu1  ;;  %v3557_v39 = vpop.f32.mrf.mxu0 }
 0xc16   :  { %v3764_v13 = vsel %vm3275_vm10, %v3557_v39, -inf }
 0xc17   :  { %3765 = vmax.xlane.f32.xlu2 %v3764_v13 }
 0xc18   :  { %v7631_v31 = vpop.f32.mrf.mxu3 }
 0xc1d   :  { %v7633_v16 = vpop.f32.mrf.mxu1  ;;  %v3559_v53 = vpop.f32.mrf.mxu0 }
 0xc20   :  { %v3530_v34 = vpop.f32.mrf.mxu3 }
 0xc25   :  { %v3492_v55 = vpop.f32.mrf.mxu1  ;;  %v3731_v38 = vpop.f32.mrf.mxu2 }
 0xc26   :  { %v3782_v8 = vsel %vm3275_vm10, %v3731_v38, -inf }
 0xc28   :  { %v7635_v54 = vpop.f32.mrf.mxu3 }
 0xc29   :  { %v3773_v20 = vsel %vm3275_vm10, %v7635_v54, -inf }
 0xc2d   :  { %v3586_v15 = vpop.f32.mrf.mxu1  ;;  %v3733_v32 = vpop.f32.mrf.mxu2 }
 0xc2e   :  { %v3767_v43 = vsel %vm3275_vm10, %v3586_v15, -inf }
 0xc2f   :  { %4100 = vrot.lane.b32.xlu2 %v7317_v28, %s6265_s4  ;;  %3768 = vmax.xlane.f32.xlu1 %v3767_v43  ;;  %v3673_v7 = vpop.f32.mrf.mxu0 }
 0xc30   :  { %v3646_v40 = vpop.f32.mrf.mxu3  ;;  %v3776_v47 = vsel %vm3275_vm10, %v3673_v7, -inf }
 0xc31   :  { %3777 = vmax.xlane.f32.xlu0 %v3776_v47 }
 0xc35   :  { %v3588_v60 = vpop.f32.mrf.mxu1 }
 0xc37   :  { %4123 = vrot.lane.b32.xlu2 %v7429_v27, %s6265_s4  ;;  %v3675_v37 = vpop.f32.mrf.mxu0 }
 0xc38   :  { %v7643_v26 = vpop.f32.mrf.mxu3 }
 0xc39   :  { %3783 = vmax.xlane.f32.xlu0 %v3782_v8  ;;  %v3785_v23 = vsel %vm3275_vm10, %v7643_v26, -inf }
 0xc3d   :  { %v3702_v11 = vpop.f32.mrf.mxu1 }
 0xc3e   :  { %v3779_v57 = vsel %vm3275_vm10, %v3702_v11, -inf }
 0xc3f   :  { %3780 = vmax.xlane.f32.xlu1 %v3779_v57 }
 0xc40   :  { %v3762_v52 = vpop.f32.mrf.mxu3 }
 0xc45   :  { %v3704_v10 = vpop.f32.mrf.mxu1 }
 0xc47   :  { %3774 = vmax.xlane.f32.xlu1 %v3773_v20 }
 0xc60   :  { %4031 = vrot.lane.b32.xlu1 %v7650_v41, %s6264_s2  ;;  %3786 = vmax.xlane.f32.xlu2 %v3785_v23 }
 0xc62   :  { %v3772_v62 = vpop.xlane.xlu0 %3771 }
 0xc63   :  { %v3790_v0 = vsub.f32 %v3615_v19, %v3772_v62 }
 0xc65   :  { %v3800_v59 = vmul.f32 1.442695, %v3790_v0 }
 0xc67   :  { %6003 = vpow2.f32 %v3800_v59 }
 0xc6d   :  { %v7656_v45 = vpop.eup %6003 }
 0xc6e   :  { %v3818_v22 = vsel %vm3275_vm10, %v7656_v45, 0.0 }
 0xc6f   :  { %3819 = vadd.xlane.f32.xlu2 %v3818_v22 }
 0xc87   :  { %4098 = vrot.lane.b32.xlu2 %v7445_v25, %s6265_s4 }
 0xc8a   :  { %v3766_v58 = vpop.xlane.xlu2 %3765 }
 0xc8b   :  { %v3788_v4 = vsub.f32 %v3557_v39, %v3766_v58 }
 0xc8d   :  { %v3796_v13 = vmul.f32 1.442695, %v3788_v4 }
 0xc8f   :  { %6005 = vpow2.f32 %v3796_v13  ;;  %4121 = vrot.lane.b32.xlu2 %v7486_v50, %s6265_s4  ;;  %v3981_v13 = vunpack.c.l.b16 %v7360_v1 }
 0xc92   :  { %v4101_v22 = vpop.permute.xlu2 %4100 }
 0xc95   :  { %v7664_v53 = vpop.eup %6005 }
 0xc96   :  { %v3812_v19 = vsel %vm3275_vm10, %v7664_v53, 0.0 }
 0xc97   :  { %3813 = vadd.xlane.f32.xlu0 %v3812_v19  ;;  %4192 = vrot.lane.b32.xlu2 %v7468_v51, %s6265_s4 }
 0xca2   :  { %v3769_v34 = vpop.xlane.xlu1 %3768 }
 0xca3   :  { %v3789_v55 = vsub.f32 %v3586_v15, %v3769_v34 }
 0xca4   :  { %v3778_v32 = vpop.xlane.xlu0 %3777 }
 0xca5   :  { %v3798_v43 = vmul.f32 1.442695, %v3789_v55  ;;  %v3792_v40 = vsub.f32 %v3673_v7, %v3778_v32 }
 0xca7   :  { %6007 = vpow2.f32 %v3798_v43  ;;  %v3804_v39 = vmul.f32 1.442695, %v3792_v40  ;;  %v3957_v43 = vunpack.c.l.b16 %v7390_v9  ;;  %v7697_v40 = vpack.c.b16 %v3981_v13, %v3981_v13 }
 0xca9   :  { %6009 = vpow2.f32 %v3804_v39 }
 0xcac   :  { %v3784_v47 = vpop.xlane.xlu0 %3783 }
 0xcad   :  { %v7670_v60 = vpop.eup %6007  ;;  %v3794_v37 = vsub.f32 %v3731_v38, %v3784_v47  ;;  %v7701_v47 = vpack.c.b16 %v3957_v43, %v3957_v43 }
 0xcae   :  { %v3815_v8 = vsel %vm3275_vm10, %v7670_v60, 0.0 }
 0xcaf   :  { %3816 = vadd.xlane.f32.xlu0 %v3815_v8  ;;  %v3808_v57 = vmul.f32 1.442695, %v3794_v37  ;;  %v7674_v10 = vpop.eup %6009 }
 0xcb0   :  { %v3824_v7 = vsel %vm3275_vm10, %v7674_v10, 0.0 }
 0xcb1   :  { %6011 = vpow2.f32 %v3808_v57 }
 0xcb2   :  { %v3781_v52 = vpop.xlane.xlu1 %3780 }
 0xcb3   :  { %v3793_v20 = vsub.f32 %v3702_v11, %v3781_v52  ;;  %v4106_v52 = vsel %vm759_vm0, %v4101_v22, 0 }
 0xcb5   :  { %v3806_v15 = vmul.f32 1.442695, %v3793_v20 }
 0xcb7   :  { %6013 = vpow2.f32 %v3806_v15  ;;  %3825 = vadd.xlane.f32.xlu0 %v3824_v7  ;;  %v7678_v23 = vpop.eup %6011 }
 0xcb8   :  { %v3830_v59 = vsel %vm3275_vm10, %v7678_v23, 0.0 }
 0xcba   :  { %v3775_v3 = vpop.xlane.xlu1 %3774 }
 0xcbb   :  { %v3791_v38 = vsub.f32 %v7635_v54, %v3775_v3  ;;  %v7691_v54 = vpop.permute.xlu2 %4123 }
 0xcbd   :  { %v7681_v62 = vpop.eup %6013  ;;  %v3802_v0 = vmul.f32 1.442695, %v3791_v38 }
 0xcbe   :  { %v3827_v11 = vsel %vm3275_vm10, %v7681_v62, 0.0 }
 0xcbf   :  { %6015 = vpow2.f32 %v3802_v0  ;;  %3831 = vadd.xlane.f32.xlu0 %v3830_v59  ;;  %3828 = vadd.xlane.f32.xlu1 %v3827_v11 }
 0xcc5   :  { %v7687_v58 = vpop.eup %6015 }
 0xcc6   :  { %v3821_v4 = vsel %vm3275_vm10, %v7687_v58, 0.0 }
 0xcc7   :  { %3822 = vadd.xlane.f32.xlu0 %v3821_v4 }
 0xcd2   :  { %v4032_v19 = vpop.permute.xlu1 %4031 }
 0xcd3   :  { %v4037_v34 = vsel %vm1020_vm2, %v4032_v19, 0  ;;  %v3787_v55 = vpop.xlane.xlu2 %3786 }
 0xcd4   :  { %v3795_v32 = vsub.f32 %v7643_v26, %v3787_v55  ;;  %4046 = vmatpush.bf16.msra.mxu3 %v4037_v34 }
 0xcd6   :  { %v3810_v39 = vmul.f32 1.442695, %v3795_v32 }
 0xcd8   :  { %6017 = vpow2.f32 %v3810_v39  ;;  %3983 = vrot.lane.b32.xlu1 %v7697_v40, %s6264_s2 }
 0xcdb   :  { %3959 = vrot.lane.b32.xlu0 %v7701_v47, %s6264_s2 }
 0xcde   :  { %v7705_v1 = vpop.eup %6017 }
 0xcdf   :  { %v3833_v26 = vsel %vm3275_vm10, %v7705_v1, 0.0 }
 0xce0   :  { %4077 = vrot.lane.b32.xlu1 %v7505_v17, %s6265_s4  ;;  %3834 = vadd.xlane.f32.xlu2 %v3833_v26 }
 0xce2   :  { %v3820_v9 = vpop.xlane.xlu2 %3819 }
 0xce3   :  { %6019 = vrcp.f32 %v3820_v9  ;;  %4054 = vrot.lane.b32.xlu0 %v7473_v44, %s6265_s4 }
 0xce8   :  { %4190 = vrot.lane.b32.xlu1 %v7535_v2, %s6265_s4 }
 0xce9   :  { %v6020_v37 = vpop.eup %6019 }
 0xcea   :  { %v3846_v8 = vmul.f32 %v6020_v37, %v7656_v45  ;;  %v4099_v3 = vpop.permute.xlu2 %4098 }
 0xceb   :  { %4215 = vrot.lane.b32.xlu0 %v7496_v29, %s6265_s4 }
 0xcec   :  { %v3854_v57 = vpack.c.bf16 %v3846_v8, %v3846_v8 }
 0xcee   :  { %5631 = vmatmul.msk.bf16.vlgmr.msra.gmra.mxu2 %vm912_vm1, %v3854_v57 }
 0xcef   :  { %4115 = vmatpush.bf16.xpose.msra.mxu2 %v4106_v52 }
 0xcf0   :  { %4146 = vrot.lane.b32.xlu1 %v7537_v46, %s6265_s4 }
 0xcf2   :  { %v7756_v11 = vpop.permute.xlu2 %4121 }
 0xcf3   :  { %4075 = vrot.lane.b32.xlu0 %v7545_v56, %s6265_s4 }
 0xcf8   :  { %4167 = vrot.lane.b32.xlu1 %v7549_v42, %s6265_s4  ;;  %4052 = vrot.lane.b32.xlu2 %v7514_v61, %s6265_s4 }
 0xcfa   :  { %v4193_v34 = vpop.permute.xlu2 %4192 }
 0xcfb   :  { %4169 = vrot.lane.b32.xlu0 %v7519_v30, %s6265_s4  ;;  %v4198_v43 = vsel %vm759_vm0, %v4193_v34, 0 }
 0xd00   :  { %4395 = vrot.lane.b32.xlu1 %v7557_v63, %s6265_s4  ;;  %4213 = vrot.lane.b32.xlu2 %v7525_v33, %s6265_s4 }
 0xd03   :  { %4353 = vrot.lane.b32.xlu0 %v7580_v36, %s6265_s4 }
 0xd08   :  { %4332 = vrot.lane.b32.xlu1 %v7573_v35, %s6265_s4  ;;  %4144 = vrot.lane.b32.xlu2 %v7555_v12, %s6265_s4 }
 0xd0a   :  { %v3814_v45 = vpop.xlane.xlu0 %3813 }
 0xd0b   :  { %6021 = vrcp.f32 %v3814_v45  ;;  %4548 = vrot.lane.b32.xlu0 %v7317_v28, %s6266_s21 }
 0xd10   :  { %4458 = vrot.lane.b32.xlu1 %v7527_v48, %s6265_s4  ;;  %4374 = vrot.lane.b32.xlu2 %v7564_v21, %s6265_s4 }
 0xd11   :  { %v6022_v20 = vpop.eup %6021 }
 0xd12   :  { %v3844_v15 = vmul.f32 %v6022_v20, %v7664_v53 }
 0xd14   :  { %v3852_v7 = vpack.c.bf16 %v3844_v15, %v3844_v15 }
 0xd16   :  { %5629 = vmatmul.msk.bf16.vlgmr.msra.gmra.mxu0 %vm912_vm1, %v3852_v7 }
 0xd18   :  { %4479 = vrot.lane.b32.xlu1 %v7650_v41, %s6265_s4  ;;  %4416 = vrot.lane.b32.xlu2 %v7701_v47, %s6265_s4 }
 0xd20   :  { %4437 = vrot.lane.b32.xlu2 %v7697_v40, %s6265_s4 }
 0xd22   :  { %v3817_v28 = vpop.xlane.xlu0 %3816 }
 0xd23   :  { %6023 = vrcp.f32 %v3817_v28 }
 0xd29   :  { %v6024_v38 = vpop.eup %6023 }
 0xd2a   :  { %v3845_v0 = vmul.f32 %v6024_v38, %v7670_v60  ;;  %v3826_v59 = vpop.xlane.xlu0 %3825 }
 0xd2c   :  { %v3853_v53 = vpack.c.bf16 %v3845_v0, %v3845_v0 }
 0xd2e   :  { %5630 = vmatmul.msk.bf16.vlgmr.msra.gmra.mxu1 %vm912_vm1, %v3853_v53 }
 0xd32   :  { %v3832_v22 = vpop.xlane.xlu0 %3831  ;;  %v3829_v32 = vpop.xlane.xlu1 %3828 }
 0xd33   :  { %6025 = vrcp.f32 %v3832_v22 }
 0xd39   :  { %v6026_v4 = vpop.eup %6025 }
 0xd3a   :  { %v3850_v13 = vmul.f32 %v6026_v4, %v7678_v23  ;;  %v3823_v19 = vpop.xlane.xlu0 %3822  ;;  %v4129_v23 = vsel %vm759_vm0, %v7691_v54, 0 }
 0xd3b   :  { %6027 = vrcp.f32 %v3823_v19 }
 0xd3c   :  { %v3858_v55 = vpack.c.bf16 %v3850_v13, %v3850_v13  ;;  %6029 = vrcp.f32 %v3829_v32 }
 0xd3d   :  { %6031 = vrcp.f32 %v3826_v59 }
 0xd3e   :  { %5635 = vmatmul.msk.bf16.vlgmr.msrb.gmra.mxu2 %vm912_vm1, %v3858_v55 }
 0xd3f   :  { %4207 = vmatpush.bf16.xpose.msrb.mxu2 %v4198_v43 }
 0xd41   :  { %v6028_v60 = vpop.eup %6027 }
 0xd42   :  { %v3847_v39 = vmul.f32 %v6028_v60, %v7687_v58  ;;  %v6030_v9 = vpop.eup %6029 }
 0xd43   :  { %v6032_v37 = vpop.eup %6031  ;;  %v3849_v8 = vmul.f32 %v6030_v9, %v7681_v62 }
 0xd44   :  { %v3855_v26 = vpack.c.bf16 %v3847_v39, %v3847_v39  ;;  %v3848_v45 = vmul.f32 %v6032_v37, %v7674_v10 }
 0xd45   :  { %v3857_v20 = vpack.c.bf16 %v3849_v8, %v3849_v8 }
 0xd46   :  { %5632 = vmatmul.msk.bf16.vlgmr.msrb.gmra.mxu3 %vm912_vm1, %v3855_v26  ;;  %v3856_v54 = vpack.c.bf16 %v3848_v45, %v3848_v45 }
 0xd47   :  { %4138 = vmatpush.bf16.xpose.msrb.mxu3 %v4129_v23 }
 0xd4a   :  { %v3984_v57 = vpop.permute.xlu1 %3983 }
 0xd4b   :  { %v3989_v52 = vsel %vm1020_vm2, %v3984_v57, 0 }
 0xd4c   :  { %3998 = vmatpush.bf16.msrb.mxu1 %v3989_v52 }
 0xd4d   :  { %v3960_v58 = vpop.permute.xlu0 %3959 }
 0xd4e   :  { %v3965_v15 = vsel %vm1020_vm2, %v3960_v58, 0  ;;  %5639 = vmatmul.msk.bf16.vlgmr.msra.gmra.mxu2 %vm759_vm0, %v4099_v3 }
 0xd4f   :  { %3974 = vmatpush.bf16.msrb.mxu0 %v3965_v15  ;;  %5634 = vmatmul.msk.bf16.vlgmr.msrb.gmra.mxu1 %vm912_vm1, %v3857_v20 }
 0xd52   :  { %5633 = vmatmul.msk.bf16.vlgmr.msrb.gmra.mxu0 %vm912_vm1, %v3856_v54  ;;  %v4078_v7 = vpop.permute.xlu1 %4077 }
 0xd53   :  { %v4083_v62 = vsel %vm759_vm0, %v4078_v7, 0  ;;  %v3835_v28 = vpop.xlane.xlu2 %3834 }
 0xd54   :  { %6033 = vrcp.f32 %v3835_v28  ;;  %4092 = vmatpush.bf16.xpose.msra.mxu1 %v4083_v62 }
 0xd55   :  { %v4055_v10 = vpop.permute.xlu0 %4054 }
 0xd56   :  { %v4060_v38 = vsel %vm759_vm0, %v4055_v10, 0 }
 0xd57   :  { %4069 = vmatpush.bf16.xpose.msra.mxu0 %v4060_v38 }
 0xd5a   :  { %v6034_v0 = vpop.eup %6033  ;;  %v4191_v59 = vpop.permute.xlu1 %4190 }
 0xd5b   :  { %v3851_v3 = vmul.f32 %v6034_v0, %v7705_v1  ;;  %v4053_v53 = vpop.permute.xlu2 %4052 }
 0xd5d   :  { %v3859_v22 = vpack.c.bf16 %v3851_v3, %v3851_v3  ;;  %v4216_v4 = vpop.permute.xlu0 %4215 }
 0xd5e   :  { %v4221_v13 = vsel %vm759_vm0, %v4216_v4, 0  ;;  %5643 = vmatmul.msk.bf16.vlgmr.msrb.gmra.mxu2 %vm759_vm0, %v4191_v59 }
 0xd5f   :  { %5636 = vmatmul.msk.bf16.vlgmr.msra.gmra.mxu3 %vm912_vm1, %v3859_v22 }
 0xd60   :  { %4230 = vmatpush.bf16.xpose.msra.mxu3 %v4221_v13 }
 0xd62   :  { %v4147_v19 = vpop.permute.xlu1 %4146  ;;  %5637 = vmatmul.msk.bf16.vlgmr.msra.gmra.mxu0 %vm759_vm0, %v4053_v53 }
 0xd63   :  { %v4152_v34 = vsel %vm759_vm0, %v4147_v19, 0  ;;  %v4214_v55 = vpop.permute.xlu2 %4213 }
 0xd64   :  { %4161 = vmatpush.bf16.xpose.msrb.mxu0 %v4152_v34 }
 0xd65   :  { %v4076_v32 = vpop.permute.xlu0 %4075 }
 0xd66   :  { %5638 = vmatmul.msk.bf16.vlgmr.msra.gmra.mxu1 %vm759_vm0, %v4076_v32 }
 0xd6a   :  { %v4168_v1 = vpop.permute.xlu1 %4167 }
 0xd6b   :  { %v4145_v43 = vpop.permute.xlu2 %4144 }
 0xd6d   :  { %v4170_v60 = vpop.permute.xlu0 %4169 }
 0xd6e   :  { %v4175_v39 = vsel %vm759_vm0, %v4170_v60, 0 }
 0xd6f   :  { %5640 = vmatmul.msk.bf16.vlgmr.msrb.gmra.mxu3 %vm759_vm0, %v7756_v11  ;;  %4184 = vmatpush.bf16.xpose.msrb.mxu1 %v4175_v39 }
 0xd71   :  { %v7784_v26 = vpop.f32.mrf.mxu2 }
 0xd72   :  { %v4396_v9 = vpop.permute.xlu1 %4395  ;;  %5641 = vmatmul.msk.bf16.vlgmr.msrb.gmra.mxu0 %vm759_vm0, %v4145_v43 }
 0xd73   :  { %v4401_v23 = vsel %vm1020_vm2, %v4396_v9, 0  ;;  %v4375_v37 = vpop.permute.xlu2 %4374 }
 0xd74   :  { %v4380_v8 = vsel %vm1020_vm2, %v4375_v37, 0  ;;  %4410 = vmatpush.bf16.msrb.mxu3 %v4401_v23 }
 0xd75   :  { %v4354_v57 = vpop.permute.xlu0 %4353  ;;  %4389 = vmatpush.bf16.msra.mxu2 %v4380_v8 }
 0xd76   :  { %v4359_v52 = vsel %vm1020_vm2, %v4354_v57, 0  ;;  %5642 = vmatmul.msk.bf16.vlgmr.msrb.gmra.mxu1 %vm759_vm0, %v4168_v1 }
 0xd77   :  { %4368 = vmatpush.bf16.msra.mxu1 %v4359_v52 }
 0xd79   :  { %v3930_v11 = vpop.f32.mrf.mxu2 }
 0xd7a   :  { %v4333_v45 = vpop.permute.xlu1 %4332 }
 0xd7b   :  { %v4338_v20 = vsel %vm1020_vm2, %v4333_v45, 0  ;;  %v4417_v58 = vpop.permute.xlu2 %4416 }
 0xd7c   :  { %v4422_v15 = vsel %vm1020_vm2, %v4417_v58, 0  ;;  %4347 = vmatpush.bf16.msra.mxu0 %v4338_v20 }
 0xd7f   :  { %5644 = vmatmul.msk.bf16.vlgmr.msra.gmra.mxu3 %vm759_vm0, %v4214_v55 }
 0xd80   :  { %4431 = vmatpush.bf16.msrb.mxu0 %v4422_v15 }
 0xd82   :  { %v4459_v54 = vpop.permute.xlu1 %4458 }
 0xd83   :  { %v4464_v7 = vsel %vm1020_vm2, %v4459_v54, 0  ;;  %v4438_v62 = vpop.permute.xlu2 %4437 }
 0xd84   :  { %v4443_v28 = vsel %vm1020_vm2, %v4438_v62, 0  ;;  %4473 = vmatpush.bf16.msrb.mxu2 %v4464_v7 }
 0xd85   :  { %4452 = vmatpush.bf16.msrb.mxu1 %v4443_v28 }
 0xd8a   :  { %v4480_v10 = vpop.permute.xlu1 %4479 }
 0xd8b   :  { %v4485_v38 = vsel %vm1020_vm2, %v4480_v10, 0 }
 0xd8c   :  { %4494 = vmatpush.bf16.msra.mxu3 %v4485_v38 }
 0xd93   :  { %v7797_v0 = vpop.f32.mrf.mxu0 }
 0xd9b   :  { %v3882_v59 = vpop.f32.mrf.mxu0 }
 0xdab   :  { %v7799_v3 = vpop.f32.mrf.mxu1 }
 0xdac   :  { %v5781_v53 = vpack.i.bf16 %v7784_v26, %v7799_v3 }
 0xdb3   :  { %v3906_v22 = vpop.f32.mrf.mxu1 }
 0xdc1   :  { %v7803_v4 = vpop.f32.mrf.mxu2 }
 0xdc9   :  { %v7805_v13 = vpop.f32.mrf.mxu3  ;;  %v4026_v19 = vpop.f32.mrf.mxu2 }
 0xdca   :  { %v5791_v34 = vpack.i.bf16 %v7805_v13, %v7797_v0 }
 0xdcc   :  { %v7809_v55 = vpop.f32.mrf.mxu1 }
 0xdcf   :  { %v7811_v32 = vpop.f32.mrf.mxu0 }
 0xdd0   :  { %v5796_v1 = vpack.i.bf16 %v7809_v55, %v7811_v32 }
 0xdd1   :  { %v3954_v43 = vpop.f32.mrf.mxu3  ;;  %v4117_v60 = vpop.f32.mrf.mxu2 }
 0xdd2   :  { %v4242_v39 = vsel %vm3275_vm10, %v4117_v60, -inf }
 0xdd3   :  { %4243 = vmax.xlane.f32.xlu0 %v4242_v39 }
 0xdd4   :  { %v4002_v9 = vpop.f32.mrf.mxu1 }
 0xdd7   :  { %v3978_v23 = vpop.f32.mrf.mxu0 }
 0xdd9   :  { %v4119_v37 = vpop.f32.mrf.mxu2 }
 0xddf   :  { %v4071_v8 = vpop.f32.mrf.mxu0 }
 0xde0   :  { %v4236_v57 = vsel %vm3275_vm10, %v4071_v8, -inf }
 0xde1   :  { %v7817_v52 = vpop.f32.mrf.mxu2  ;;  %4237 = vmax.xlane.f32.xlu1 %v4236_v57 }
 0xde2   :  { %v7819_v11 = vpop.f32.mrf.mxu3  ;;  %v4254_v45 = vsel %vm3275_vm10, %v7817_v52, -inf }
 0xde3   :  { %v5811_v20 = vpack.i.bf16 %v7819_v11, %v7803_v4  ;;  %v4094_v58 = vpop.f32.mrf.mxu1  ;;  %4255 = vmax.xlane.f32.xlu2 %v4254_v45 }
 0xde4   :  { %v4239_v15 = vsel %vm3275_vm10, %v4094_v58, -inf }
 0xde5   :  { %4240 = vmax.xlane.f32.xlu0 %v4239_v15  ;;  %v7838_v15 = vpop.permute.xlu0 %4548 }
 0xde7   :  { %v4073_v54 = vpop.f32.mrf.mxu0 }
 0xde9   :  { %v4211_v7 = vpop.f32.mrf.mxu2 }
 0xdea   :  { %v4050_v62 = vpop.f32.mrf.mxu3 }
 0xdeb   :  { %v4096_v28 = vpop.f32.mrf.mxu1 }
 0xdef   :  { %v4163_v10 = vpop.f32.mrf.mxu0 }
 0xdf0   :  { %v4248_v38 = vsel %vm3275_vm10, %v4163_v10, -inf }
 0xdf1   :  { %4249 = vmax.xlane.f32.xlu0 %v4248_v38 }
 0xdf2   :  { %v4140_v59 = vpop.f32.mrf.mxu3 }
 0xdf3   :  { %v4186_v22 = vpop.f32.mrf.mxu1  ;;  %v4245_v23 = vsel %vm3275_vm10, %v4140_v59, -inf }
 0xdf4   :  { %v4251_v19 = vsel %vm3275_vm10, %v4186_v22, -inf }
 0xdf5   :  { %4252 = vmax.xlane.f32.xlu2 %v4251_v19 }
 0xdf7   :  { %v4165_v43 = vpop.f32.mrf.mxu0 }
 0xdfa   :  { %v4142_v39 = vpop.f32.mrf.mxu3 }
 0xdfb   :  { %v4188_v9 = vpop.f32.mrf.mxu1 }
 0xdfd   :  { %4246 = vmax.xlane.f32.xlu2 %v4245_v23 }
 0xe02   :  { %v4232_v37 = vpop.f32.mrf.mxu3 }
 0xe03   :  { %v4257_v57 = vsel %vm3275_vm10, %v4232_v37, -inf }
 0xe04   :  { %4258 = vmax.xlane.f32.xlu1 %v4257_v57 }
 0xe0a   :  { %v4234_v45 = vpop.f32.mrf.mxu3 }
 0xe15   :  { %4546 = vrot.lane.b32.xlu2 %v7445_v25, %s6266_s21 }
 0xe1d   :  { %4569 = vrot.lane.b32.xlu2 %v7486_v50, %s6266_s21  ;;  %4571 = vrot.lane.b32.xlu1 %v7429_v27, %s6266_s21 }
 0xe25   :  { %4525 = vrot.lane.b32.xlu2 %v7505_v17, %s6266_s21 }
 0xe46   :  { %v4244_v54 = vpop.xlane.xlu0 %4243 }
 0xe47   :  { %v4262_v7 = vsub.f32 %v4117_v60, %v4244_v54 }
 0xe49   :  { %v4272_v62 = vmul.f32 1.442695, %v4262_v7 }
 0xe4b   :  { %6035 = vpow2.f32 %v4272_v62 }
 0xe51   :  { %v7840_v28 = vpop.eup %6035 }
 0xe52   :  { %v4290_v25 = vsel %vm3275_vm10, %v7840_v28, 0.0 }
 0xe53   :  { %4291 = vadd.xlane.f32.xlu1 %v4290_v25 }
 0xe54   :  { %v4238_v38 = vpop.xlane.xlu1 %4237 }
 0xe55   :  { %v4260_v50 = vsub.f32 %v4071_v8, %v4238_v38 }
 0xe56   :  { %v4256_v9 = vpop.xlane.xlu2 %4255 }
 0xe57   :  { %v4268_v19 = vmul.f32 1.442695, %v4260_v50  ;;  %v4266_v54 = vsub.f32 %v7817_v52, %v4256_v9 }
 0xe58   :  { %v4241_v43 = vpop.xlane.xlu0 %4240 }
 0xe59   :  { %6037 = vpow2.f32 %v4268_v19  ;;  %v4261_v27 = vsub.f32 %v4094_v58, %v4241_v43  ;;  %v4280_v25 = vmul.f32 1.442695, %v4266_v54 }
 0xe5b   :  { %v4270_v39 = vmul.f32 1.442695, %v4261_v27 }
 0xe5d   :  { %6039 = vpow2.f32 %v4270_v39 }
 0xe5f   :  { %v7844_v17 = vpop.eup %6037 }
 0xe60   :  { %v4284_v60 = vsel %vm3275_vm10, %v7844_v17, 0.0 }
 0xe61   :  { %4285 = vadd.xlane.f32.xlu0 %v4284_v60 }
 0xe63   :  { %v7848_v57 = vpop.eup %6039 }
 0xe64   :  { %v4250_v23 = vpop.xlane.xlu0 %4249  ;;  %v4287_v58 = vsel %vm3275_vm10, %v7848_v57, 0.0 }
 0xe65   :  { %v4264_v45 = vsub.f32 %v4163_v10, %v4250_v23 }
 0xe67   :  { %v4276_v8 = vmul.f32 1.442695, %v4264_v45 }
 0xe68   :  { %v4253_v7 = vpop.xlane.xlu2 %4252 }
 0xe69   :  { %6041 = vpow2.f32 %v4276_v8  ;;  %v4265_v62 = vsub.f32 %v4186_v22, %v4253_v7  ;;  %4288 = vadd.xlane.f32.xlu0 %v4287_v58 }
 0xe6b   :  { %v4278_v38 = vmul.f32 1.442695, %v4265_v62 }
 0xe6d   :  { %6043 = vpow2.f32 %v4278_v38 }
 0xe6e   :  { %6045 = vpow2.f32 %v4280_v25 }
 0xe6f   :  { %v7853_v50 = vpop.eup %6041 }
 0xe70   :  { %v4247_v19 = vpop.xlane.xlu2 %4246  ;;  %v4296_v10 = vsel %vm3275_vm10, %v7853_v50, 0.0 }
 0xe71   :  { %v4263_v43 = vsub.f32 %v4140_v59, %v4247_v19  ;;  %4297 = vadd.xlane.f32.xlu0 %v4296_v10 }
 0xe73   :  { %v7857_v52 = vpop.eup %6043  ;;  %v4274_v27 = vmul.f32 1.442695, %v4263_v43 }
 0xe74   :  { %v4299_v39 = vsel %vm3275_vm10, %v7857_v52, 0.0  ;;  %v7861_v22 = vpop.eup %6045 }
 0xe75   :  { %4300 = vadd.xlane.f32.xlu1 %v4299_v39  ;;  %6047 = vpow2.f32 %v4274_v27  ;;  %v4302_v23 = vsel %vm3275_vm10, %v7861_v22, 0.0 }
 0xe77   :  { %v4259_v9 = vpop.xlane.xlu1 %4258 }
 0xe78   :  { %v4267_v60 = vsub.f32 %v4232_v37, %v4259_v9 }
 0xe79   :  { %4303 = vadd.xlane.f32.xlu0 %v4302_v23 }
 0xe7a   :  { %v4282_v45 = vmul.f32 1.442695, %v4267_v60 }
 0xe7b   :  { %v7865_v59 = vpop.eup %6047 }
 0xe7c   :  { %6049 = vpow2.f32 %v4282_v45  ;;  %v4293_v54 = vsel %vm3275_vm10, %v7865_v59, 0.0 }
 0xe81   :  { %4294 = vadd.xlane.f32.xlu0 %v4293_v54 }
 0xe82   :  { %v7869_v8 = vpop.eup %6049 }
 0xe83   :  { %v4305_v7 = vsel %vm3275_vm10, %v7869_v8, 0.0 }
 0xe84   :  { %4306 = vadd.xlane.f32.xlu2 %v4305_v7 }
 0xe8e   :  { %4640 = vrot.lane.b32.xlu1 %v7468_v51, %s6266_s21 }
 0xe8f   :  { %v4572_v51 = vpop.permute.xlu1 %4571 }
 0xe95   :  { %4502 = vrot.lane.b32.xlu0 %v7473_v44, %s6266_s21 }
 0xe96   :  { %4523 = vrot.lane.b32.xlu1 %v7545_v56, %s6266_s21 }
 0xe9c   :  { %4500 = vrot.lane.b32.xlu2 %v7514_v61, %s6266_s21 }
 0xe9d   :  { %4663 = vrot.lane.b32.xlu0 %v7496_v29, %s6266_s21 }
 0xe9e   :  { %4594 = vrot.lane.b32.xlu1 %v7537_v46, %s6266_s21 }
 0xea4   :  { %4661 = vrot.lane.b32.xlu2 %v7525_v33, %s6266_s21  ;;  %v4547_v33 = vpop.permute.xlu2 %4546 }
 0xea5   :  { %4638 = vrot.lane.b32.xlu0 %v7535_v2, %s6266_s21  ;;  %v4554_v2 = vsel %vm759_vm0, %v7838_v15, 0 }
 0xea6   :  { %4615 = vrot.lane.b32.xlu1 %v7549_v42, %s6266_s21 }
 0xeac   :  { %4592 = vrot.lane.b32.xlu2 %v7555_v12, %s6266_s21  ;;  %v7899_v12 = vpop.permute.xlu2 %4569 }
 0xead   :  { %4617 = vrot.lane.b32.xlu0 %v7519_v30, %s6266_s21 }
 0xeb4   :  { %v4526_v15 = vpop.permute.xlu2 %4525 }
 0xeb5   :  { %v4531_v19 = vsel %vm759_vm0, %v4526_v15, 0 }
 0xec6   :  { %v4292_v44 = vpop.xlane.xlu1 %4291 }
 0xec7   :  { %6051 = vrcp.f32 %v4292_v44 }
 0xecd   :  { %v6052_v29 = vpop.eup %6051 }
 0xece   :  { %v4318_v61 = vmul.f32 %v6052_v29, %v7840_v28 }
 0xed0   :  { %v4326_v46 = vpack.c.bf16 %v4318_v61, %v4318_v61 }
 0xed2   :  { %5647 = vmatmul.msk.bf16.vlgmr.msra.gmra.mxu2 %vm912_vm1, %v4326_v46  ;;  %v4577_v46 = vsel %vm759_vm0, %v4572_v51, 0 }
 0xed3   :  { %4563 = vmatpush.bf16.xpose.msra.mxu2 %v4554_v2 }
 0xed4   :  { %v4286_v56 = vpop.xlane.xlu0 %4285 }
 0xed5   :  { %6053 = vrcp.f32 %v4286_v56 }
 0xedb   :  { %v6054_v42 = vpop.eup %6053 }
 0xedc   :  { %v4316_v30 = vmul.f32 %v6054_v42, %v7844_v17  ;;  %v4289_v37 = vpop.xlane.xlu0 %4288 }
 0xedd   :  { %6055 = vrcp.f32 %v4289_v37 }
 0xede   :  { %v4324_v58 = vpack.c.bf16 %v4316_v30, %v4316_v30 }
 0xee0   :  { %5645 = vmatmul.msk.bf16.vlgmr.msra.gmra.mxu0 %vm912_vm1, %v4324_v58 }
 0xee3   :  { %v6056_v28 = vpop.eup %6055 }
 0xee4   :  { %v4317_v62 = vmul.f32 %v6056_v28, %v7848_v57  ;;  %v4298_v25 = vpop.xlane.xlu0 %4297 }
 0xee5   :  { %6057 = vrcp.f32 %v4298_v25 }
 0xee6   :  { %v4325_v38 = vpack.c.bf16 %v4317_v62, %v4317_v62 }
 0xee8   :  { %5646 = vmatmul.msk.bf16.vlgmr.msra.gmra.mxu1 %vm912_vm1, %v4325_v38  ;;  %v4301_v10 = vpop.xlane.xlu1 %4300 }
 0xee9   :  { %4540 = vmatpush.bf16.xpose.msra.mxu1 %v4531_v19  ;;  %6059 = vrcp.f32 %v4301_v10 }
 0xeeb   :  { %v6058_v17 = vpop.eup %6057 }
 0xeec   :  { %v4320_v43 = vmul.f32 %v6058_v17, %v7853_v50  ;;  %v4304_v27 = vpop.xlane.xlu0 %4303 }
 0xeed   :  { %6061 = vrcp.f32 %v4304_v27 }
 0xeee   :  { %v4328_v39 = vpack.c.bf16 %v4320_v43, %v4320_v43 }
 0xeef   :  { %v6060_v9 = vpop.eup %6059 }
 0xef0   :  { %5649 = vmatmul.msk.bf16.vlgmr.msrb.gmra.mxu0 %vm912_vm1, %v4328_v39  ;;  %v4321_v57 = vmul.f32 %v6060_v9, %v7857_v52 }
 0xef2   :  { %v4329_v54 = vpack.c.bf16 %v4321_v57, %v4321_v57 }
 0xef3   :  { %v6062_v60 = vpop.eup %6061 }
 0xef4   :  { %v4322_v23 = vmul.f32 %v6062_v60, %v7861_v22  ;;  %v4295_v45 = vpop.xlane.xlu0 %4294 }
 0xef5   :  { %6063 = vrcp.f32 %v4295_v45 }
 0xef6   :  { %v4330_v7 = vpack.c.bf16 %v4322_v23, %v4322_v23 }
 0xef7   :  { %v4307_v61 = vpop.xlane.xlu2 %4306 }
 0xef8   :  { %5650 = vmatmul.msk.bf16.vlgmr.msrb.gmra.mxu1 %vm912_vm1, %v4329_v54  ;;  %5651 = vmatmul.msk.bf16.vlgmr.msrb.gmra.mxu2 %vm912_vm1, %v4330_v7  ;;  %6065 = vrcp.f32 %v4307_v61 }
 0xefb   :  { %v6064_v50 = vpop.eup %6063 }
 0xefc   :  { %v4319_v44 = vmul.f32 %v6064_v50, %v7865_v59 }
 0xefe   :  { %v4327_v29 = vpack.c.bf16 %v4319_v44, %v4319_v44  ;;  %v6066_v2 = vpop.eup %6065 }
 0xeff   :  { %v4323_v59 = vmul.f32 %v6066_v2, %v7869_v8  ;;  %v4501_v51 = vpop.permute.xlu2 %4500 }
 0xf00   :  { %5648 = vmatmul.msk.bf16.vlgmr.msrb.gmra.mxu3 %vm912_vm1, %v4327_v29  ;;  %v4641_v52 = vpop.permute.xlu1 %4640 }
 0xf01   :  { %4586 = vmatpush.bf16.xpose.msrb.mxu3 %v4577_v46  ;;  %v4646_v22 = vsel %vm759_vm0, %v4641_v52, 0  ;;  %v4331_v37 = vpack.c.bf16 %v4323_v59, %v4323_v59 }
 0xf02   :  { %4655 = vmatpush.bf16.xpose.msrb.mxu2 %v4646_v22 }
 0xf07   :  { %v4503_v56 = vpop.permute.xlu0 %4502 }
 0xf08   :  { %v4508_v42 = vsel %vm759_vm0, %v4503_v56, 0  ;;  %5655 = vmatmul.msk.bf16.vlgmr.msra.gmra.mxu2 %vm759_vm0, %v4547_v33  ;;  %v4524_v30 = vpop.permute.xlu1 %4523  ;;  %v4662_v33 = vpop.permute.xlu2 %4661 }
 0xf09   :  { %4517 = vmatpush.bf16.xpose.msra.mxu0 %v4508_v42  ;;  %5654 = vmatmul.msk.bf16.vlgmr.msra.gmra.mxu1 %vm759_vm0, %v4524_v30 }
 0xf0f   :  { %v4664_v58 = vpop.permute.xlu0 %4663 }
 0xf10   :  { %v4669_v28 = vsel %vm759_vm0, %v4664_v58, 0  ;;  %5652 = vmatmul.msk.bf16.vlgmr.msra.gmra.mxu3 %vm912_vm1, %v4331_v37  ;;  %5653 = vmatmul.msk.bf16.vlgmr.msra.gmra.mxu0 %vm759_vm0, %v4501_v51  ;;  %v4595_v62 = vpop.permute.xlu1 %4594  ;;  %v4593_v38 = vpop.permute.xlu2 %4592 }
 0xf11   :  { %v4600_v25 = vsel %vm759_vm0, %v4595_v62, 0  ;;  %4678 = vmatpush.bf16.xpose.msra.mxu3 %v4669_v28 }
 0xf12   :  { %4609 = vmatpush.bf16.xpose.msrb.mxu0 %v4600_v25 }
 0xf17   :  { %v4639_v15 = vpop.permute.xlu0 %4638 }
 0xf18   :  { %5659 = vmatmul.msk.bf16.vlgmr.msrb.gmra.mxu2 %vm759_vm0, %v4639_v15  ;;  %v4616_v10 = vpop.permute.xlu1 %4615 }
 0xf1f   :  { %v4618_v8 = vpop.permute.xlu0 %4617 }
 0xf20   :  { %v4623_v19 = vsel %vm759_vm0, %v4618_v8, 0  ;;  %5656 = vmatmul.msk.bf16.vlgmr.msrb.gmra.mxu3 %vm759_vm0, %v7899_v12  ;;  %5657 = vmatmul.msk.bf16.vlgmr.msrb.gmra.mxu0 %vm759_vm0, %v4593_v38 }
 0xf21   :  { %4632 = vmatpush.bf16.xpose.msrb.mxu1 %v4623_v19 }
 0xf28   :  { %5658 = vmatmul.msk.bf16.vlgmr.msrb.gmra.mxu1 %vm759_vm0, %v4616_v10 }
 0xf30   :  { %5660 = vmatmul.msk.bf16.vlgmr.msra.gmra.mxu3 %vm759_vm0, %v4662_v33 }
 0xf55   :  { %v7931_v17 = vpop.f32.mrf.mxu2 }
 0xf5d   :  { %v7933_v43 = vpop.f32.mrf.mxu0  ;;  %v4393_v27 = vpop.f32.mrf.mxu2 }
 0xf65   :  { %v4351_v39 = vpop.f32.mrf.mxu0  ;;  %v7935_v9 = vpop.f32.mrf.mxu1 }
 0xf66   :  { %v5786_v57 = vpack.i.bf16 %v7931_v17, %v7935_v9 }
 0xf6d   :  { %v4372_v12 = vpop.f32.mrf.mxu1  ;;  %v7939_v60 = vpop.f32.mrf.mxu0 }
 0xf75   :  { %v4435_v23 = vpop.f32.mrf.mxu0  ;;  %v7941_v45 = vpop.f32.mrf.mxu1 }
 0xf76   :  { %v5806_v54 = vpack.i.bf16 %v7941_v45, %v7939_v60 }
 0xf7b   :  { %v7945_v7 = vpop.f32.mrf.mxu2 }
 0xf7d   :  { %v4456_v50 = vpop.f32.mrf.mxu1 }
 0xf83   :  { %v7947_v44 = vpop.f32.mrf.mxu3  ;;  %v4477_v29 = vpop.f32.mrf.mxu2 }
 0xf84   :  { %v5801_v61 = vpack.i.bf16 %v7947_v44, %v7933_v43 }
 0xf86   :  { %v4542_v46 = vpop.f32.mrf.mxu1 }
 0xf87   :  { %v4687_v52 = vsel %vm3275_vm10, %v4542_v46, -inf }
 0xf88   :  { %4688 = vmax.xlane.f32.xlu2 %v4687_v52 }
 0xf8b   :  { %v4414_v22 = vpop.f32.mrf.mxu3  ;;  %v4565_v2 = vpop.f32.mrf.mxu2 }
 0xf8c   :  { %v4690_v56 = vsel %vm3275_vm10, %v4565_v2, -inf }
 0xf8d   :  { %v4519_v42 = vpop.f32.mrf.mxu0  ;;  %4691 = vmax.xlane.f32.xlu0 %v4690_v56 }
 0xf8e   :  { %v4544_v30 = vpop.f32.mrf.mxu1  ;;  %v4684_v59 = vsel %vm3275_vm10, %v4519_v42, -inf }
 0xf8f   :  { %4685 = vmax.xlane.f32.xlu1 %v4684_v59 }
 0xf93   :  { %v7954_v51 = vpop.f32.mrf.mxu3  ;;  %v4567_v37 = vpop.f32.mrf.mxu2 }
 0xf94   :  { %v5831_v58 = vpack.i.bf16 %v7954_v51, %v7945_v7 }
 0xf95   :  { %v4521_v28 = vpop.f32.mrf.mxu0 }
 0xf9b   :  { %v4498_v62 = vpop.f32.mrf.mxu3  ;;  %v4657_v25 = vpop.f32.mrf.mxu2 }
 0xf9c   :  { %v4702_v33 = vsel %vm3275_vm10, %v4657_v25, -inf }
 0xf9d   :  { %4703 = vmax.xlane.f32.xlu0 %v4702_v33  ;;  %v4611_v15 = vpop.f32.mrf.mxu0 }
 0xf9e   :  { %v4696_v38 = vsel %vm3275_vm10, %v4611_v15, -inf }
 0xf9f   :  { %4697 = vmax.xlane.f32.xlu2 %v4696_v38 }
 0xfa3   :  { %v7960_v8 = vpop.f32.mrf.mxu3  ;;  %v4659_v19 = vpop.f32.mrf.mxu2 }
 0xfa4   :  { %v4693_v12 = vsel %vm3275_vm10, %v7960_v8, -inf }
 0xfa5   :  { %v4613_v10 = vpop.f32.mrf.mxu0  ;;  %v4634_v27 = vpop.f32.mrf.mxu1 }
 0xfa6   :  { %v4699_v39 = vsel %vm3275_vm10, %v4634_v27, -inf }
 0xfa7   :  { %4700 = vmax.xlane.f32.xlu0 %v4699_v39  ;;  %4694 = vmax.xlane.f32.xlu2 %v4693_v12 }
 0xfa8   :  { %4780 = vrot.lane.b32.xlu1 %v7573_v35, %s6266_s21 }
 0xfab   :  { %v4590_v23 = vpop.f32.mrf.mxu3 }
 0xfad   :  { %v4636_v50 = vpop.f32.mrf.mxu1 }
 0xfb3   :  { %v7967_v29 = vpop.f32.mrf.mxu3 }
 0xfb4   :  { %v4705_v35 = vsel %vm3275_vm10, %v7967_v29, -inf }
 0xfbb   :  { %4843 = vrot.lane.b32.xlu0 %v7557_v63, %s6266_s21  ;;  %v4682_v52 = vpop.f32.mrf.mxu3 }
 0xfbf   :  { %4822 = vrot.lane.b32.xlu2 %v7564_v21, %s6266_s21 }
 0xfc3   :  { %4801 = vrot.lane.b32.xlu0 %v7580_v36, %s6266_s21 }
 0xfcb   :  { %4906 = vrot.lane.b32.xlu0 %v7527_v48, %s6266_s21 }
 0xfd2   :  { %4706 = vmax.xlane.f32.xlu1 %v4705_v35 }
 0xffb   :  { %v4689_v22 = vpop.xlane.xlu2 %4688 }
 0xffc   :  { %v4709_v37 = vsub.f32 %v4542_v46, %v4689_v22 }
 0xffe   :  { %v4718_v21 = vmul.f32 1.442695, %v4709_v37 }
0x1000   :  { %v4692_v56 = vpop.xlane.xlu0 %4691 }
0x1001   :  { %v4710_v30 = vsub.f32 %v4565_v2, %v4692_v56 }
0x1002   :  { %v4686_v59 = vpop.xlane.xlu1 %4685 }
0x1003   :  { %v4720_v63 = vmul.f32 1.442695, %v4710_v30  ;;  %v4708_v28 = vsub.f32 %v4519_v42, %v4686_v59 }
0x1005   :  { %6067 = vpow2.f32 %v4720_v63  ;;  %v4716_v62 = vmul.f32 1.442695, %v4708_v28 }
0x1007   :  { %6069 = vpow2.f32 %v4716_v62 }
0x1008   :  { %6071 = vpow2.f32 %v4718_v21 }
0x100b   :  { %v7979_v33 = vpop.eup %6067 }
0x100c   :  { %v4738_v48 = vsel %vm3275_vm10, %v7979_v33, 0.0 }
0x100d   :  { %v7983_v36 = vpop.eup %6069  ;;  %4739 = vadd.xlane.f32.xlu1 %v4738_v48 }
0x100e   :  { %v4732_v2 = vsel %vm3275_vm10, %v7983_v36, 0.0  ;;  %v7987_v38 = vpop.eup %6071 }
0x100f   :  { %4733 = vadd.xlane.f32.xlu0 %v4732_v2  ;;  %v4735_v12 = vsel %vm3275_vm10, %v7987_v38, 0.0 }
0x1010   :  { %v4704_v46 = vpop.xlane.xlu0 %4703 }
0x1011   :  { %v4714_v42 = vsub.f32 %v4657_v25, %v4704_v46 }
0x1012   :  { %v4698_v19 = vpop.xlane.xlu2 %4697 }
0x1013   :  { %v4728_v10 = vmul.f32 1.442695, %v4714_v42  ;;  %v4712_v39 = vsub.f32 %v4611_v15, %v4698_v19 }
0x1015   :  { %6073 = vpow2.f32 %v4728_v10  ;;  %v4724_v23 = vmul.f32 1.442695, %v4712_v39  ;;  %4736 = vadd.xlane.f32.xlu1 %v4735_v12 }
0x1017   :  { %6075 = vpow2.f32 %v4724_v23 }
0x101a   :  { %v4701_v50 = vpop.xlane.xlu0 %4700  ;;  %v4781_v52 = vpop.permute.xlu1 %4780 }
0x101b   :  { %v7991_v35 = vpop.eup %6073  ;;  %v4713_v22 = vsub.f32 %v4634_v27, %v4701_v50  ;;  %v4786_v56 = vsel %vm1020_vm2, %v4781_v52, 0  ;;  %v4695_v30 = vpop.xlane.xlu2 %4694 }
0x101c   :  { %4795 = vmatpush.bf16.msra.mxu0 %v4786_v56  ;;  %v4750_v25 = vsel %vm3275_vm10, %v7991_v35, 0.0  ;;  %v4711_v37 = vsub.f32 %v7960_v8, %v4695_v30 }
0x101d   :  { %v7996_v15 = vpop.eup %6075  ;;  %v4726_v59 = vmul.f32 1.442695, %v4713_v22  ;;  %4751 = vadd.xlane.f32.xlu2 %v4750_v25 }
0x101e   :  { %v4744_v63 = vsel %vm3275_vm10, %v7996_v15, 0.0  ;;  %v4722_v28 = vmul.f32 1.442695, %v4711_v37 }
0x101f   :  { %6077 = vpow2.f32 %v4726_v59  ;;  %4745 = vadd.xlane.f32.xlu1 %v4744_v63 }
0x1020   :  { %6079 = vpow2.f32 %v4722_v28 }
0x1023   :  { %v4823_v27 = vpop.permute.xlu2 %4822 }
0x1024   :  { %v4828_v62 = vsel %vm1020_vm2, %v4823_v27, 0 }
0x1025   :  { %v8002_v21 = vpop.eup %6077  ;;  %4837 = vmatpush.bf16.msra.mxu2 %v4828_v62 }
0x1026   :  { %v4747_v48 = vsel %vm3275_vm10, %v8002_v21, 0.0  ;;  %v6080_v2 = vpop.eup %6079 }
0x1027   :  { %4748 = vadd.xlane.f32.xlu2 %v4747_v48  ;;  %v4741_v42 = vsel %vm3275_vm10, %v6080_v2, 0.0 }
0x102d   :  { %v4844_v8 = vpop.permute.xlu0 %4843 }
0x102e   :  { %v4849_v46 = vsel %vm1020_vm2, %v4844_v8, 0 }
0x102f   :  { %4858 = vmatpush.bf16.msrb.mxu3 %v4849_v46  ;;  %4742 = vadd.xlane.f32.xlu2 %v4741_v42 }
0x1035   :  { %v4802_v19 = vpop.permute.xlu0 %4801 }
0x1036   :  { %v4807_v10 = vsel %vm1020_vm2, %v4802_v19, 0 }
0x1037   :  { %4816 = vmatpush.bf16.msra.mxu1 %v4807_v10 }
0x1038   :  { %4864 = vrot.lane.b32.xlu1 %v7701_v47, %s6266_s21 }
0x103d   :  { %v4907_v39 = vpop.permute.xlu0 %4906 }
0x103e   :  { %v4912_v12 = vsel %vm1020_vm2, %v4907_v39, 0 }
0x103f   :  { %4921 = vmatpush.bf16.msrb.mxu2 %v4912_v12 }
0x1040   :  { %5792 = vrot.lane.b32.xlu1 %v5791_v34, %s6266_s21 }
0x1045   :  { %v4707_v23 = vpop.xlane.xlu1 %4706 }
0x1046   :  { %v4715_v50 = vsub.f32 %v7967_v29, %v4707_v23 }
0x1047   :  { %4927 = vrot.lane.b32.xlu2 %v7650_v41, %s6266_s21 }
0x1048   :  { %v4730_v52 = vmul.f32 1.442695, %v4715_v50  ;;  %5802 = vrot.lane.b32.xlu1 %v5801_v61, %s6265_s4 }
0x104a   :  { %6081 = vpow2.f32 %v4730_v52 }
0x104f   :  { %5782 = vrot.lane.b32.xlu2 %v5781_v53, %s6266_s21 }
0x1050   :  { %v6082_v47 = vpop.eup %6081  ;;  %5812 = vrot.lane.b32.xlu1 %v5811_v20, %s6266_s21 }
0x1051   :  { %v4753_v41 = vsel %vm3275_vm10, %v6082_v47, 0.0 }
0x1052   :  { %4754 = vadd.xlane.f32.xlu0 %v4753_v41 }
0x1057   :  { %5807 = vrot.lane.b32.xlu2 %v5806_v54, %s6265_s4 }
0x1066   :  { %4885 = vrot.lane.b32.xlu0 %v7697_v40, %s6266_s21 }
0x106e   :  { %5787 = vrot.lane.b32.xlu0 %v5786_v57, %s6265_s4 }
0x1076   :  { %5797 = vrot.lane.b32.xlu0 %v5796_v1, %s6266_s21 }
0x1080   :  { %v4740_v26 = vpop.xlane.xlu1 %4739 }
0x1081   :  { %6083 = vrcp.f32 %v4740_v26 }
0x1082   :  { %v4734_v0 = vpop.xlane.xlu0 %4733 }
0x1083   :  { %6085 = vrcp.f32 %v4734_v0 }
0x1087   :  { %v6084_v3 = vpop.eup %6083 }
0x1088   :  { %v4766_v53 = vmul.f32 %v6084_v3, %v7979_v33  ;;  %v4737_v4 = vpop.xlane.xlu1 %4736 }
0x1089   :  { %v6086_v13 = vpop.eup %6085  ;;  %6087 = vrcp.f32 %v4737_v4 }
0x108a   :  { %v4774_v40 = vpack.c.bf16 %v4766_v53, %v4766_v53  ;;  %v4764_v34 = vmul.f32 %v6086_v13, %v7983_v36 }
0x108c   :  { %v4772_v11 = vpack.c.bf16 %v4764_v34, %v4764_v34  ;;  %5663 = vmatmul.msk.bf16.vlgmr.msra.gmra.mxu2 %vm912_vm1, %v4774_v40 }
0x108e   :  { %5661 = vmatmul.msk.bf16.vlgmr.msra.gmra.mxu0 %vm912_vm1, %v4772_v11 }
0x108f   :  { %v6088_v55 = vpop.eup %6087 }
0x1090   :  { %v4765_v32 = vmul.f32 %v6088_v55, %v7987_v38  ;;  %v4752_v1 = vpop.xlane.xlu2 %4751 }
0x1091   :  { %6089 = vrcp.f32 %v4752_v1 }
0x1092   :  { %v4773_v20 = vpack.c.bf16 %v4765_v32, %v4765_v32  ;;  %v4746_v60 = vpop.xlane.xlu1 %4745  ;;  %v213_v32 = vld [vmem:[#allocation10 + $0x8] sm:$0xff] }
0x1093   :  { %6091 = vrcp.f32 %v4746_v60 }
0x1094   :  { %5662 = vmatmul.msk.bf16.vlgmr.msra.gmra.mxu1 %vm912_vm1, %v4773_v20  ;;  %v6267_v20 = vmov 0  }
0x1095   :  { %5841 = vset.pattern.permute.xlu2 %v6267_v20  ;;  %5842 = vset.pattern.permute.xlu0 %v6267_v20 }
0x1097   :  { %v6090_v17 = vpop.eup %6089 }
0x1098   :  { %v4770_v43 = vmul.f32 %v6090_v17, %v7991_v35 }
0x1099   :  { %v6092_v54 = vpop.eup %6091 }
0x109a   :  { %v4778_v9 = vpack.c.bf16 %v4770_v43, %v4770_v43  ;;  %v4749_v57 = vpop.xlane.xlu2 %4748  ;;  %v4768_v61 = vmul.f32 %v6092_v54, %v7996_v15 }
0x109c   :  { %5667 = vmatmul.msk.bf16.vlgmr.msrb.gmra.mxu2 %vm912_vm1, %v4778_v9  ;;  %v4776_v56 = vpack.c.bf16 %v4768_v61, %v4768_v61 }
0x10a2   :  { %v4743_v45 = vpop.xlane.xlu2 %4742 }
0x10a3   :  { %6093 = vrcp.f32 %v4743_v45 }
0x10a9   :  { %v6094_v44 = vpop.eup %6093 }
0x10aa   :  { %v4767_v29 = vmul.f32 %v6094_v44, %v6080_v2  ;;  %v4928_v33 = vpop.permute.xlu2 %4927  ;;  %v4865_v36 = vpop.permute.xlu1 %4864 }
0x10ab   :  { %v4933_v38 = vsel %vm1020_vm2, %v4928_v33, 0  ;;  %v4870_v22 = vsel %vm1020_vm2, %v4865_v36, 0 }
0x10ac   :  { %v4775_v35 = vpack.c.bf16 %v4767_v29, %v4767_v29  ;;  %4879 = vmatpush.bf16.msrb.mxu0 %v4870_v22  ;;  %4942 = vmatpush.bf16.msra.mxu3 %v4933_v38 }
0x10ae   :  { %5664 = vmatmul.msk.bf16.vlgmr.msrb.gmra.mxu3 %vm912_vm1, %v4775_v35 }
0x10af   :  { %5665 = vmatmul.msk.bf16.vlgmr.msrb.gmra.mxu0 %vm912_vm1, %v4776_v56 }
0x10b2   :  { %v5783_v13 = vpop.permute.xlu2 %5782  ;;  %v5793_v34 = vpop.permute.xlu1 %5792 }
0x10b3   :  { %v5784_v51 = vunpack.i.l.bf16 %v5783_v13  ;;  %v5794_v43 = vunpack.i.l.bf16 %v5793_v34  ;;  %v5795_v29 = vunpack.i.h.bf16 %v5793_v34 }
0x10b5   :  { %v5045_v45 = vsel %vm759_vm0, %v7628_v14, %v5784_v51  ;;  %v5044_v22 = vsel %vm759_vm0, %v7619_v24, %v5794_v43  ;;  %v5047_v24 = vsel %vm759_vm0, %v7624_v18, %v5795_v29  ;;  %v6100_v43 = vld [vmem:[#allocation10] sm:$0xff] }
0x10ba   :  { %v5808_v11 = vpop.permute.xlu2 %5807  ;;  %v5803_v7 = vpop.permute.xlu1 %5802 }
0x10bb   :  { %v5804_v60 = vunpack.i.l.bf16 %v5803_v7  ;;  %v5805_v35 = vunpack.i.h.bf16 %v5803_v7 }
0x10bd   :  { %v5053_v14 = vsel %vm5052_vm11, %v5044_v22, %v5804_v60 }
0x10c5   :  { %v4755_v30 = vpop.xlane.xlu0 %4754 }
0x10c6   :  { %6095 = vrcp.f32 %v4755_v30 }
0x10c7   :  { %6097 = vrcp.f32 %v4749_v57  ;;  %v5785_v57 = vunpack.i.h.bf16 %v5783_v13 }
0x10cc   :  { %v6096_v25 = vpop.eup %6095 }
0x10cd   :  { %v4771_v59 = vmul.f32 %v6096_v25, %v6082_v47  ;;  %v6098_v37 = vpop.eup %6097  ;;  %v5046_v25 = vsel %vm759_vm0, %v7617_v49, %v5785_v57  ;;  %v5056_v49 = vsel %vm5052_vm11, %v5047_v24, %v5805_v35 }
0x10ce   :  { %v4769_v63 = vmul.f32 %v6098_v37, %v8002_v21 }
0x10cf   :  { %v4779_v15 = vpack.c.bf16 %v4771_v59, %v4771_v59 }
0x10d0   :  { %v4777_v62 = vpack.c.bf16 %v4769_v63, %v4769_v63 }
0x10d1   :  { %5668 = vmatmul.msk.bf16.vlgmr.msra.gmra.mxu3 %vm912_vm1, %v4779_v15 }
0x10d8   :  { %v4886_v28 = vpop.permute.xlu0 %4885 }
0x10d9   :  { %v4891_v27 = vsel %vm1020_vm2, %v4886_v28, 0 }
0x10da   :  { %4900 = vmatpush.bf16.msrb.mxu1 %v4891_v27  ;;  %v5809_v27 = vunpack.i.l.bf16 %v5808_v11 }
0x10dd   :  { %5666 = vmatmul.msk.bf16.vlgmr.msrb.gmra.mxu1 %vm912_vm1, %v4777_v62  ;;  %v5813_v62 = vpop.permute.xlu1 %5812 }
0x10e0   :  { %v5788_v40 = vpop.permute.xlu0 %5787 }
0x10e1   :  { %v5790_v54 = vunpack.i.h.bf16 %v5788_v40 }
0x10e3   :  { %v5055_v15 = vsel %vm5052_vm11, %v5046_v25, %v5790_v54 }
0x10e8   :  { %v5798_v55 = vpop.permute.xlu0 %5797 }
0x10e9   :  { %v5799_v44 = vunpack.i.l.bf16 %v5798_v55  ;;  %v5800_v56 = vunpack.i.h.bf16 %v5798_v55 }
0x10eb   :  { %v5048_v37 = vsel %vm759_vm0, %v7626_v5, %v5799_v44 }
0x110b   :  { %v4797_v48 = vpop.f32.mrf.mxu0 }
0x110f   :  { %v4839_v2 = vpop.f32.mrf.mxu2 }
0x1111   :  { %v4818_v8 = vpop.f32.mrf.mxu1 }
0x1112   :  { %v5816_v46 = vpack.i.bf16 %v4839_v2, %v4818_v8  ;;  %v5049_v8 = vsel %vm759_vm0, %v7633_v16, %v5800_v56 }
0x1113   :  { %v4799_v42 = vpop.f32.mrf.mxu0 }
0x1114   :  { %5817 = vrot.lane.b32.xlu2 %v5816_v46, %s6264_s2  ;;  %v5057_v42 = vsel %vm5052_vm11, %v5048_v37, %v5809_v27 }
0x1117   :  { %v4841_v19 = vpop.f32.mrf.mxu2 }
0x1119   :  { %v4820_v10 = vpop.f32.mrf.mxu1 }
0x111a   :  { %v5810_v10 = vunpack.i.h.bf16 %v5808_v11 }
0x111f   :  { %v4923_v39 = vpop.f32.mrf.mxu2 }
0x1127   :  { %v4925_v12 = vpop.f32.mrf.mxu2 }
0x112c   :  { %v4881_v23 = vpop.f32.mrf.mxu0 }
0x1131   :  { %v4860_v21 = vpop.f32.mrf.mxu3 }
0x1132   :  { %v5826_v50 = vpack.i.bf16 %v4860_v21, %v4797_v48  ;;  %v5814_v21 = vunpack.i.l.bf16 %v5813_v62 }
0x1134   :  { %v4883_v52 = vpop.f32.mrf.mxu0  ;;  %5827 = vrot.lane.b32.xlu0 %v5826_v50, %s6264_s2 }
0x1139   :  { %v4862_v47 = vpop.f32.mrf.mxu3 }
0x113a   :  { %v5058_v47 = vsel %vm5052_vm11, %v5049_v8, %v5810_v10 }
0x113c   :  { %5832 = vrot.lane.b32.xlu0 %v5831_v58, %s6265_s4  ;;  %v5789_v58 = vunpack.i.l.bf16 %v5788_v40 }
0x113e   :  { %v5054_v33 = vsel %vm5052_vm11, %v5045_v45, %v5789_v58 }
0x1154   :  { %v4944_v41 = vpop.f32.mrf.mxu3 }
0x1155   :  { %v5836_v26 = vpack.i.bf16 %v4944_v41, %v4923_v39 }
0x1157   :  { %5837 = vrot.lane.b32.xlu1 %v5836_v26, %s6264_s2 }
0x115a   :  { %v4902_v0 = vpop.f32.mrf.mxu1 }
0x115b   :  { %v5821_v3 = vpack.i.bf16 %v4902_v0, %v4881_v23  ;;  %v5815_v23 = vunpack.i.h.bf16 %v5813_v62 }
0x115c   :  { %v4946_v53 = vpop.f32.mrf.mxu3 }
0x115d   :  { %5822 = vrot.lane.b32.xlu2 %v5821_v3, %s6264_s2  ;;  %v5051_v3 = vsel %vm759_vm0, %v7631_v31, %v5815_v23  ;;  %v5050_v53 = vsel %vm759_vm0, %v7621_v6, %v5814_v21 }
0x1162   :  { %v4904_v4 = vpop.f32.mrf.mxu1 }
0x1165   :  { %5072 = vperm.xlu2 %5841, %v213_v32  }
0x116e   :  { %v5818_v1 = vpop.permute.xlu2 %5817 }
0x116f   :  { %v5819_v9 = vunpack.i.l.bf16 %v5818_v1  ;;  %v5820_v36 = vunpack.i.h.bf16 %v5818_v1 }
0x1171   :  { %v5063_v30 = vsel %vm5061_vm12, %v5054_v33, %v5819_v9  ;;  %v5064_v48 = vsel %vm5061_vm12, %v5055_v15, %v5820_v36  ;;  %v5076_v9 = vrot.slane %v6100_v43, 7 }
0x1172   :  { %v5086_v2 = vrot.slane %v5063_v30, 7  ;;  %v5088_v39 = vrot.slane %v5064_v48, 6 }
0x11a6   :  { %v5828_v17 = vpop.permute.xlu0 %5827 }
0x11a7   :  { %v5829_v61 = vunpack.i.l.bf16 %v5828_v17  ;;  %v5830_v59 = vunpack.i.h.bf16 %v5828_v17 }
0x11a9   :  { %v5062_v63 = vsel %vm5061_vm12, %v5053_v14, %v5829_v61  ;;  %v5065_v46 = vsel %vm5061_vm12, %v5056_v49, %v5830_v59 }
0x11aa   :  { %v5087_v5 = vsel %vm3025_vm3, %v5086_v2, %v5062_v63  ;;  %v5090_v50 = vrot.slane %v5065_v46, 5 }
0x11ab   :  { %v5089_v52 = vsel %vm3028_vm4, %v5088_v39, %v5087_v5 }
0x11ac   :  { %v5091_v13 = vsel %vm3031_vm5, %v5090_v50, %v5089_v52 }
0x11ae   :  { %v5833_v18 = vpop.permute.xlu0 %5832 }
0x11af   :  { %v5835_v16 = vunpack.i.h.bf16 %v5833_v18  ;;  %v5834_v41 = vunpack.i.l.bf16 %v5833_v18 }
0x11b1   :  { %v5060_v55 = vsel %vm5052_vm11, %v5051_v3, %v5835_v16  ;;  %v5059_v32 = vsel %vm5052_vm11, %v5050_v53, %v5834_v41 }
0x11b7   :  { %v5823_v38 = vpop.permute.xlu2 %5822 }
0x11b8   :  { %v5824_v28 = vunpack.i.l.bf16 %v5823_v38  ;;  %v5825_v19 = vunpack.i.h.bf16 %v5823_v38 }
0x11ba   :  { %v5066_v12 = vsel %vm5061_vm12, %v5057_v42, %v5824_v28  ;;  %v5067_v26 = vsel %vm5061_vm12, %v5058_v47, %v5825_v19 }
0x11bb   :  { %v5092_v0 = vrot.slane %v5066_v12, 4  ;;  %v5094_v40 = vrot.slane %v5067_v26, 3 }
0x11bd   :  { %v5093_v1 = vsel %vm3034_vm6, %v5092_v0, %v5091_v13 }
0x11be   :  { %v5095_v6 = vsel %vm3037_vm7, %v5094_v40, %v5093_v1 }
0x11bf   :  { %v5073_v57 = vpop.permute.xlu2 %5072 }
0x11c9   :  { %v5838_v4 = vpop.permute.xlu1 %5837 }
0x11ca   :  { %v5840_v34 = vunpack.i.h.bf16 %v5838_v4  ;;  %v5839_v11 = vunpack.i.l.bf16 %v5838_v4 }
0x11cc   :  { %v5069_v20 = vsel %vm5061_vm12, %v5060_v55, %v5840_v34  ;;  %v5068_v7 = vsel %vm5061_vm12, %v5059_v32, %v5839_v11 }
0x11cd   :  { %v5098_v31 = vrot.slane %v5069_v20, 1  ;;  %v5096_v51 = vrot.slane %v5068_v7, 2 }
0x11cf   :  { %v5097_v58 = vsel %vm3040_vm8, %v5096_v51, %v5095_v6 }
0x11d0   :  { %v5099_v17 = vsel %vm3043_vm9, %v5098_v31, %v5097_v58 }
0x11d1   :  { %5116 = vmatpush.xpose.msra.mxu0 %v5099_v17 }
0x11d4   :  { %5117 = vmatmul.f32.vlgmr.msra.gmra.mxu0 %v5076_v9 }
0x1251   :  { %v5118_v60 = vpop.f32.mrf.mxu0 }
0x1252   :  { %v5119_v45 = vadd.f32 %v5118_v60, %v5073_v57 }
0x1254   :  { %5121 = vst.msk [vmem:[#allocation11] sm:$0x1] %vm3275_vm10, %v5119_v45 }
0x1255   :  { %5132 = dma.vmem_to_hbm [thread:$0]  %s5128_s23, 16, %s5130_s26, [#allocation4]  }
0x1256   :  { %6251 = dma.done.wait [#allocation4], 16  }
0x1257   :  { %6252 = vsyncadd [#allocation4], 4294967280 }
0x1258   :  { %5137 = vsyncpa [#allocation3], 1 }
0x1259   :  { %5138 = vsyncpa [#allocation6], 1 }
0x125a   :  { %5139 = vsyncpa [#allocation9], 1 }
0x125b   :  { %5140 = vsyncpa [#allocation4], 1 }

</bundles_post_ra>
